<compile_context>
chip_gen: v6e
topology: v6e:2x2x1
jax: 0.10.0
libtpu: 0.0.40
codegen_flags: <defaults>
</compile_context>

<pallas_src>
import jax
import jax.numpy as jnp
from jax import lax
from jax.experimental import pallas as pl
from jax.experimental.pallas import tpu as pltpu
import numpy as np


def _round_up(v, m):
    return ((v + m - 1) // m) * m


# ----------------------------------------------------------------------------
# Fused Pallas kernel
# ----------------------------------------------------------------------------
def _make_vadnet_kernel(T, Bp, H, L):
    H2 = 2 * H
    H8 = 8 * H

    def kernel(*refs):
        x_ref = refs[0]                              # (T*Bp, D_in)
        layer_refs = refs[1:1 + 3 * L]               # per layer: wih_cat, whh_blk, b_cat
        h0_ref = refs[1 + 3 * L]                     # (L, Bp, 2H)   [fwd | rev]
        c0_ref = refs[2 + 3 * L]                     # (L, Bp, 2H)
        fcw_ref = refs[3 + 3 * L]                    # (2H, 1)
        fcb_ref = refs[4 + 3 * L]                    # (1, 1)
        out_ref = refs[5 + 3 * L]                    # (T*Bp, 1)
        act_f_ref = refs[6 + 3 * L]                  # scratch (T*Bp, H) fwd hidden
        act_r_ref = refs[7 + 3 * L]                  # scratch (T*Bp, H) rev hidden

        # Reverse-direction column mask for the gate-major / dir-minor layout:
        # per gate block of width 2H, columns [H:2H) belong to the reverse dir.
        col = lax.broadcasted_iota(jnp.int32, (T * Bp, H8), 1)
        rev_cols = (col % H2) >= H

        for l in range(L):
            wih_ref = layer_refs[3 * l + 0]          # (D_l, 8H)
            whh_ref = layer_refs[3 * l + 1]          # (2H, 8H) block-diagonal
            b_ref = layer_refs[3 * l + 2]            # (1, 8H)

            # ---- Hoisted input projection: all T steps, both directions, bias
            #      folded in.  Off the serial critical path.
            if l == 0:
                xp = jnp.dot(x_ref[...], wih_ref[...],
                             preferred_element_type=jnp.float32) + b_ref[...]
            else:
                xp = (jnp.dot(act_f_ref[...], wih_ref[0:H, :],
                              preferred_element_type=jnp.float32)
                      + jnp.dot(act_r_ref[...], wih_ref[H:H2, :],
                                preferred_element_type=jnp.float32)
                      + b_ref[...])                  # (T*Bp, 8H)

            # The reverse direction consumes the sequence back-to-front:
            # pre-flip its columns once so the step loop is one aligned row read.
            xp_rev = jnp.concatenate(
                [xp[(T - 1 - t) * Bp:(T - t) * Bp, :] for t in range(T)], axis=0)
            xp = jnp.where(rev_cols, xp_rev, xp)

            whh = whh_ref[...]
            h_state = h0_ref[l]                      # (Bp, 2H)  [fwd | rev]
            c_state = c0_ref[l]

            # ---- Recurrence: statically unrolled (T is small).
            for s in range(T):
                gates = xp[s * Bp:(s + 1) * Bp, :] + jnp.dot(
                    h_state, whh, preferred_element_type=jnp.float32)  # (Bp, 8H)
                i_g = jax.nn.sigmoid(gates[:, 0 * H2:1 * H2])
                f_g = jax.nn.sigmoid(gates[:, 1 * H2:2 * H2])
                g_g = jnp.tanh(gates[:, 2 * H2:3 * H2])
                o_g = jax.nn.sigmoid(gates[:, 3 * H2:4 * H2])
                c_state = f_g * c_state + i_g * g_g
                h_state = o_g * jnp.tanh(c_state)
                # fwd hidden belongs to time s, rev hidden to time T-1-s
                act_f_ref[s * Bp:(s + 1) * Bp, :] = h_state[:, 0:H]
                act_r_ref[(T - 1 - s) * Bp:(T - s) * Bp, :] = h_state[:, H:H2]

        # ---- Fused FC + sigmoid epilogue (activations never leave VMEM).
        z = (jnp.dot(act_f_ref[...], fcw_ref[0:H, :],
                     preferred_element_type=jnp.float32)
             + jnp.dot(act_r_ref[...], fcw_ref[H:H2, :],
                       preferred_element_type=jnp.float32)
             + fcb_ref[...])
        out_ref[...] = jax.nn.sigmoid(z)

    return kernel


# ----------------------------------------------------------------------------
# Wrapper: pad batch to a sublane tile, pack initial states, call the kernel.
# ----------------------------------------------------------------------------
def vadnet_forward(packed, input_data, hiddens):
    """input_data: (T, B, input_dim); hiddens = (h0, c0), each (2L, B, H)."""
    h0, c0 = hiddens
    T, B, D = input_data.shape
    H = packed["hidden_size"]
    L = packed["num_layers"]
    Bp = _round_up(B, 8)                 # pad batch to a full sublane tile

    x_pad = jnp.zeros((T, Bp, D), jnp.float32).at[:, :B, :].set(input_data)
    x_flat = x_pad.reshape(T * Bp, D)

    def pack_state(s):                   # (2L, B, H) -> (L, Bp, 2H) = [fwd | rev]
        s2 = jnp.concatenate([s[0::2], s[1::2]], axis=-1)
        return jnp.zeros((L, Bp, 2 * H), jnp.float32).at[:, :B, :].set(s2)

    h0p = pack_state(h0)
    c0p = pack_state(c0)

    args = [x_flat]
    for (wih, whh, b) in packed["layers"]:
        args += [wih, whh, b]
    args += [h0p, c0p, packed["fc_w"], packed["fc_b"]]

    out = pl.pallas_call(
        _make_vadnet_kernel(T, Bp, H, L),
        out_shape=jax.ShapeDtypeStruct((T * Bp, 1), jnp.float32),
        in_specs=[pl.BlockSpec(memory_space=pltpu.MemorySpace.VMEM)] * len(args),
        out_specs=pl.BlockSpec(memory_space=pltpu.MemorySpace.VMEM),
        scratch_shapes=[pltpu.VMEM((T * Bp, H), jnp.float32),
                        pltpu.VMEM((T * Bp, H), jnp.float32)],
    )(*args)
    return out.reshape(T, Bp, 1)[:, :B, :]


# ----------------------------------------------------------------------------
# Parameter construction (raw PyTorch layout) + packing into kernel layout.
# ----------------------------------------------------------------------------
def init_params(key, input_dim, hidden_size, num_layers):
    H = hidden_size
    k_lstm = 1.0 / np.sqrt(H)
    params = {"hidden_size": H, "num_layers": num_layers, "lstm": []}
    for l in range(num_layers):
        d_in = input_dim if l == 0 else 2 * H
        layer = []
        for d in range(2):
            key, k1, k2, k3, k4 = jax.random.split(key, 5)
            w_ih = jax.random.uniform(k1, (4 * H, d_in), jnp.float32, -k_lstm, k_lstm)
            w_hh = jax.random.uniform(k2, (4 * H, H), jnp.float32, -k_lstm, k_lstm)
            b_ih = jax.random.uniform(k3, (4 * H,), jnp.float32, -k_lstm, k_lstm)
            b_hh = jax.random.uniform(k4, (4 * H,), jnp.float32, -k_lstm, k_lstm)
            layer.append((w_ih, w_hh, b_ih, b_hh))
        params["lstm"].append(layer)
    key, kf1, kf2 = jax.random.split(key, 3)
    k_fc = 1.0 / np.sqrt(2 * H)
    params["fc_w"] = jax.random.uniform(kf1, (1, 2 * H), jnp.float32, -k_fc, k_fc)
    params["fc_b"] = jax.random.uniform(kf2, (1,), jnp.float32, -k_fc, k_fc)
    return params


def pack_params(raw):
    """Pack PyTorch-layout weights into the fused, direction-batched layout.

    Columns (8H wide) are gate-major / direction-minor:
      [i_f, i_r, f_f, f_r, g_f, g_r, o_f, o_r], each block H wide.
    W_hh is block-diagonal over the [fwd | rev] state rows.
    """
    H = raw["hidden_size"]
    L = raw["num_layers"]
    layers = []
    zero = jnp.zeros((H, H), jnp.float32)
    for l in range(L):
        wih_cols, whh_cols, b_cols = [], [], []
        for g in range(4):                 # PyTorch gate order: i, f, g, o
            for d in range(2):             # direction: 0 = fwd, 1 = rev
                w_ih, w_hh, b_ih, b_hh = raw["lstm"][l][d]
                wih_cols.append(w_ih[g * H:(g + 1) * H, :].T)          # (D_l, H)
                blk = w_hh[g * H:(g + 1) * H, :].T                     # (H, H)
                whh_cols.append(jnp.concatenate([blk, zero], axis=0) if d == 0
                                else jnp.concatenate([zero, blk], axis=0))
                b_cols.append(b_ih[g * H:(g + 1) * H] + b_hh[g * H:(g + 1) * H])
        layers.append((jnp.concatenate(wih_cols, axis=1),              # (D_l, 8H)
                       jnp.concatenate(whh_cols, axis=1),              # (2H, 8H)
                       jnp.concatenate(b_cols).reshape(1, 8 * H)))     # (1, 8H)
    return {"hidden_size": H, "num_layers": L, "layers": layers,
            "fc_w": raw["fc_w"].T,                                     # (2H, 1)
            "fc_b": raw["fc_b"].reshape(1, 1)}


# ----------------------------------------------------------------------------
# Pure-JAX reference (PyTorch semantics) for correctness check
# ----------------------------------------------------------------------------
def _lstm_layer_ref(x, w_ih, w_hh, b_ih, b_hh, h0, c0):
    T = x.shape[0]
    H = h0.shape[1]
    h, c = h0, c0
    outs = []
    for t in range(T):
        gates = x[t] @ w_ih.T + h @ w_hh.T + b_ih + b_hh
        i_g = jax.nn.sigmoid(gates[:, 0 * H:1 * H])
        f_g = jax.nn.sigmoid(gates[:, 1 * H:2 * H])
        g_g = jnp.tanh(gates[:, 2 * H:3 * H])
        o_g = jax.nn.sigmoid(gates[:, 3 * H:4 * H])
        c = f_g * c + i_g * g_g
        h = o_g * jnp.tanh(c)
        outs.append(h)
    return jnp.stack(outs)


def vadnet_forward_ref(raw, input_data, hiddens):
    h0, c0 = hiddens
    L = raw["num_layers"]
    layer_in = input_data
    for l in range(L):
        dir_outs = []
        for d in range(2):
            w_ih, w_hh, b_ih, b_hh = raw["lstm"][l][d]
            idx = 2 * l + d
            if d == 0:
                out = _lstm_layer_ref(layer_in, w_ih, w_hh, b_ih, b_hh,
                                      h0[idx], c0[idx])
            else:
                out = _lstm_layer_ref(layer_in[::-1], w_ih, w_hh, b_ih, b_hh,
                                      h0[idx], c0[idx])[::-1]
            dir_outs.append(out)
        layer_in = jnp.concatenate(dir_outs, axis=-1)
    z = layer_in @ raw["fc_w"].T + raw["fc_b"]
    return jax.nn.sigmoid(z)


# ----------------------------------------------------------------------------
if __name__ == "__main__":
    seq_len, batch, input_dim, hidden_size, num_layers = 8, 2, 16, 32, 2

    key = jax.random.PRNGKey(0)
    key, k_x, k_h, k_p = jax.random.split(key, 4)

    x = jax.random.normal(k_x, (seq_len, batch, input_dim), jnp.float32)
    # VADnet.init_hiddens returns the SAME tensor for h0 and c0 (torch.rand ,)*2
    h0 = jax.random.uniform(k_h, (num_layers * 2, batch, hidden_size), jnp.float32)
    hiddens = (h0, h0)

    raw = init_params(k_p, input_dim, hidden_size, num_layers)
    packed = pack_params(raw)

    pred = vadnet_forward(packed, x, hiddens)
    pred = jax.block_until_ready(pred)

    ref = vadnet_forward_ref(raw, x, hiddens)
    np.testing.assert_allclose(np.asarray(pred), np.asarray(ref),
                               rtol=1e-3, atol=1e-3)
    assert pred.shape == (seq_len, batch, 1)

    print("KERNEL_OK")
</pallas_src>

<mosaic_0001>
module attributes {stable_mosaic.version = 11 : i64} {
  func.func @kernel(%arg0: memref<64x16xf32, #tpu.memory_space<vmem>>, %arg1: memref<16x256xf32, #tpu.memory_space<vmem>>, %arg2: memref<64x256xf32, #tpu.memory_space<vmem>>, %arg3: memref<1x256xf32, #tpu.memory_space<vmem>>, %arg4: memref<64x256xf32, #tpu.memory_space<vmem>>, %arg5: memref<64x256xf32, #tpu.memory_space<vmem>>, %arg6: memref<1x256xf32, #tpu.memory_space<vmem>>, %arg7: memref<2x8x64xf32, #tpu.memory_space<vmem>>, %arg8: memref<2x8x64xf32, #tpu.memory_space<vmem>>, %arg9: memref<64x1xf32, #tpu.memory_space<vmem>>, %arg10: memref<1x1xf32, #tpu.memory_space<vmem>>, %arg11: memref<64x1xf32, #tpu.memory_space<vmem>>, %arg12: memref<64x32xf32, #tpu.memory_space<vmem>>, %arg13: memref<64x32xf32, #tpu.memory_space<vmem>>) attributes {dimension_semantics = [], scalar_prefetch = 0 : i64, scratch_operands = 2 : i64, tpu.core_type = #tpu.core_type<tc>} {
    %0 = tpu.iota {dimensions = array<i32: 1>} : vector<64x256xi32>
    %c64_i32 = arith.constant 64 : i32
    %c0_i32 = arith.constant 0 : i32
    %1 = arith.cmpi eq, %c64_i32, %c0_i32 : i32
    %c1_i32 = arith.constant 1 : i32
    %2 = arith.select %1, %c1_i32, %c64_i32 : i32
    %3 = vector.broadcast %2 : i32 to vector<64x256xi32>
    %4 = arith.remsi %0, %3 : vector<64x256xi32>
    %c0_i32_0 = arith.constant 0 : i32
    %5 = vector.broadcast %c0_i32_0 : i32 to vector<64x256xi32>
    %6 = arith.cmpi ne, %4, %5 : vector<64x256xi32>
    %c0_i32_1 = arith.constant 0 : i32
    %7 = vector.broadcast %c0_i32_1 : i32 to vector<64x256xi32>
    %8 = arith.cmpi slt, %4, %7 : vector<64x256xi32>
    %c0_i32_2 = arith.constant 0 : i32
    %9 = arith.cmpi slt, %2, %c0_i32_2 : i32
    %10 = vector.broadcast %9 : i1 to vector<64x256xi1>
    %11 = vector.broadcast %10 : vector<64x256xi1> to vector<64x256xi1>
    %12 = arith.xori %8, %11 : vector<64x256xi1>
    %13 = arith.andi %12, %6 : vector<64x256xi1>
    %14 = vector.broadcast %2 : i32 to vector<64x256xi32>
    %15 = arith.addi %4, %14 : vector<64x256xi32>
    %16 = arith.select %13, %15, %4 : vector<64x256xi1>, vector<64x256xi32>
    %c32_i32 = arith.constant 32 : i32
    %17 = vector.broadcast %c32_i32 : i32 to vector<64x256xi32>
    %18 = arith.cmpi sge, %16, %17 : vector<64x256xi32>
    %c0 = arith.constant 0 : index
    %c0_3 = arith.constant 0 : index
    %19 = vector.load %arg0[%c0, %c0_3] : memref<64x16xf32, #tpu.memory_space<vmem>>, vector<64x16xf32>
    %c0_4 = arith.constant 0 : index
    %c0_5 = arith.constant 0 : index
    %20 = vector.load %arg1[%c0_4, %c0_5] : memref<16x256xf32, #tpu.memory_space<vmem>>, vector<16x256xf32>
    %cst = arith.constant dense<0.000000e+00> : vector<64x256xf32>
    %21 = tpu.matmul %19, %20, %cst {dimension_numbers = #tpu.dot_dimension_numbers<[1], [0], [0], [1], [0, 0, 1, 1], [], []>} : vector<64x16xf32>, vector<16x256xf32>, vector<64x256xf32> -> vector<64x256xf32>
    %c0_6 = arith.constant 0 : index
    %c0_7 = arith.constant 0 : index
    %22 = vector.load %arg3[%c0_6, %c0_7] : memref<1x256xf32, #tpu.memory_space<vmem>>, vector<1x256xf32>
    %23 = vector.broadcast %22 : vector<1x256xf32> to vector<64x256xf32>
    %24 = arith.addf %21, %23 : vector<64x256xf32>
    %25 = vector.extract_strided_slice %24 {offsets = [56, 0], sizes = [8, 256], strides = [1, 1]} : vector<64x256xf32> to vector<8x256xf32>
    %26 = vector.extract_strided_slice %24 {offsets = [48, 0], sizes = [8, 256], strides = [1, 1]} : vector<64x256xf32> to vector<8x256xf32>
    %27 = vector.extract_strided_slice %24 {offsets = [40, 0], sizes = [8, 256], strides = [1, 1]} : vector<64x256xf32> to vector<8x256xf32>
    %28 = vector.extract_strided_slice %24 {offsets = [32, 0], sizes = [8, 256], strides = [1, 1]} : vector<64x256xf32> to vector<8x256xf32>
    %29 = vector.extract_strided_slice %24 {offsets = [24, 0], sizes = [8, 256], strides = [1, 1]} : vector<64x256xf32> to vector<8x256xf32>
    %30 = vector.extract_strided_slice %24 {offsets = [16, 0], sizes = [8, 256], strides = [1, 1]} : vector<64x256xf32> to vector<8x256xf32>
    %31 = vector.extract_strided_slice %24 {offsets = [8, 0], sizes = [8, 256], strides = [1, 1]} : vector<64x256xf32> to vector<8x256xf32>
    %32 = vector.extract_strided_slice %24 {offsets = [0, 0], sizes = [8, 256], strides = [1, 1]} : vector<64x256xf32> to vector<8x256xf32>
    %33 = tpu.concatenate %25, %26, %27, %28, %29, %30, %31, %32 in 0 : vector<8x256xf32>, vector<8x256xf32>, vector<8x256xf32>, vector<8x256xf32>, vector<8x256xf32>, vector<8x256xf32>, vector<8x256xf32>, vector<8x256xf32> -> vector<64x256xf32>
    %34 = arith.select %18, %33, %24 : vector<64x256xi1>, vector<64x256xf32>
    %c0_8 = arith.constant 0 : index
    %c0_9 = arith.constant 0 : index
    %35 = vector.load %arg2[%c0_8, %c0_9] : memref<64x256xf32, #tpu.memory_space<vmem>>, vector<64x256xf32>
    %c0_10 = arith.constant 0 : index
    %c0_11 = arith.constant 0 : index
    %c0_12 = arith.constant 0 : index
    %36 = vector.load %arg7[%c0_10, %c0_11, %c0_12] : memref<2x8x64xf32, #tpu.memory_space<vmem>>, vector<1x8x64xf32>
    %37 = vector.shape_cast %36 : vector<1x8x64xf32> to vector<8x64xf32>
    %c0_13 = arith.constant 0 : index
    %c0_14 = arith.constant 0 : index
    %c0_15 = arith.constant 0 : index
    %38 = vector.load %arg8[%c0_13, %c0_14, %c0_15] : memref<2x8x64xf32, #tpu.memory_space<vmem>>, vector<1x8x64xf32>
    %39 = vector.shape_cast %38 : vector<1x8x64xf32> to vector<8x64xf32>
    %40 = vector.extract_strided_slice %34 {offsets = [0, 0], sizes = [8, 256], strides = [1, 1]} : vector<64x256xf32> to vector<8x256xf32>
    %cst_16 = arith.constant dense<0.000000e+00> : vector<8x256xf32>
    %41 = tpu.matmul %37, %35, %cst_16 {dimension_numbers = #tpu.dot_dimension_numbers<[1], [0], [0], [1], [0, 0, 1, 1], [], []>} : vector<8x64xf32>, vector<64x256xf32>, vector<8x256xf32> -> vector<8x256xf32>
    %42 = arith.addf %40, %41 : vector<8x256xf32>
    %43 = vector.extract_strided_slice %42 {offsets = [0, 0], sizes = [8, 64], strides = [1, 1]} : vector<8x256xf32> to vector<8x64xf32>
    %44 = arith.negf %43 : vector<8x64xf32>
    %45 = math.exp %44 : vector<8x64xf32>
    %cst_17 = arith.constant 1.000000e+00 : f32
    %46 = vector.broadcast %cst_17 : f32 to vector<8x64xf32>
    %47 = arith.addf %46, %45 : vector<8x64xf32>
    %48 = arith.divf %46, %47 : vector<8x64xf32>
    %49 = vector.extract_strided_slice %42 {offsets = [0, 64], sizes = [8, 64], strides = [1, 1]} : vector<8x256xf32> to vector<8x64xf32>
    %50 = arith.negf %49 : vector<8x64xf32>
    %51 = math.exp %50 : vector<8x64xf32>
    %cst_18 = arith.constant 1.000000e+00 : f32
    %52 = vector.broadcast %cst_18 : f32 to vector<8x64xf32>
    %53 = arith.addf %52, %51 : vector<8x64xf32>
    %54 = arith.divf %52, %53 : vector<8x64xf32>
    %55 = vector.extract_strided_slice %42 {offsets = [0, 128], sizes = [8, 64], strides = [1, 1]} : vector<8x256xf32> to vector<8x64xf32>
    %56 = math.tanh %55 : vector<8x64xf32>
    %57 = vector.extract_strided_slice %42 {offsets = [0, 192], sizes = [8, 64], strides = [1, 1]} : vector<8x256xf32> to vector<8x64xf32>
    %58 = arith.negf %57 : vector<8x64xf32>
    %59 = math.exp %58 : vector<8x64xf32>
    %cst_19 = arith.constant 1.000000e+00 : f32
    %60 = vector.broadcast %cst_19 : f32 to vector<8x64xf32>
    %61 = arith.addf %60, %59 : vector<8x64xf32>
    %62 = arith.divf %60, %61 : vector<8x64xf32>
    %63 = arith.mulf %54, %39 : vector<8x64xf32>
    %64 = arith.mulf %48, %56 : vector<8x64xf32>
    %65 = arith.addf %63, %64 : vector<8x64xf32>
    %66 = math.tanh %65 : vector<8x64xf32>
    %67 = arith.mulf %62, %66 : vector<8x64xf32>
    %68 = vector.extract_strided_slice %67 {offsets = [0, 0], sizes = [8, 32], strides = [1, 1]} : vector<8x64xf32> to vector<8x32xf32>
    %c0_20 = arith.constant 0 : index
    %c0_21 = arith.constant 0 : index
    %69 = vector.load %arg12[%c0_20, %c0_21] : memref<64x32xf32, #tpu.memory_space<vmem>>, vector<8x32xf32>
    tpu.vector_store %arg12[%c0_20, %c0_21], %68 {strides = array<i32>} : memref<64x32xf32, #tpu.memory_space<vmem>>, vector<8x32xf32>,
    %70 = vector.extract_strided_slice %67 {offsets = [0, 32], sizes = [8, 32], strides = [1, 1]} : vector<8x64xf32> to vector<8x32xf32>
    %c56 = arith.constant 56 : index
    %c0_22 = arith.constant 0 : index
    %71 = vector.load %arg13[%c56, %c0_22] : memref<64x32xf32, #tpu.memory_space<vmem>>, vector<8x32xf32>
    tpu.vector_store %arg13[%c56, %c0_22], %70 {strides = array<i32>} : memref<64x32xf32, #tpu.memory_space<vmem>>, vector<8x32xf32>,
    %72 = vector.extract_strided_slice %34 {offsets = [8, 0], sizes = [8, 256], strides = [1, 1]} : vector<64x256xf32> to vector<8x256xf32>
    %cst_23 = arith.constant dense<0.000000e+00> : vector<8x256xf32>
    %73 = tpu.matmul %67, %35, %cst_23 {dimension_numbers = #tpu.dot_dimension_numbers<[1], [0], [0], [1], [0, 0, 1, 1], [], []>} : vector<8x64xf32>, vector<64x256xf32>, vector<8x256xf32> -> vector<8x256xf32>
    %74 = arith.addf %72, %73 : vector<8x256xf32>
    %75 = vector.extract_strided_slice %74 {offsets = [0, 0], sizes = [8, 64], strides = [1, 1]} : vector<8x256xf32> to vector<8x64xf32>
    %76 = arith.negf %75 : vector<8x64xf32>
    %77 = math.exp %76 : vector<8x64xf32>
    %cst_24 = arith.constant 1.000000e+00 : f32
    %78 = vector.broadcast %cst_24 : f32 to vector<8x64xf32>
    %79 = arith.addf %78, %77 : vector<8x64xf32>
    %80 = arith.divf %78, %79 : vector<8x64xf32>
    %81 = vector.extract_strided_slice %74 {offsets = [0, 64], sizes = [8, 64], strides = [1, 1]} : vector<8x256xf32> to vector<8x64xf32>
    %82 = arith.negf %81 : vector<8x64xf32>
    %83 = math.exp %82 : vector<8x64xf32>
    %cst_25 = arith.constant 1.000000e+00 : f32
    %84 = vector.broadcast %cst_25 : f32 to vector<8x64xf32>
    %85 = arith.addf %84, %83 : vector<8x64xf32>
    %86 = arith.divf %84, %85 : vector<8x64xf32>
    %87 = vector.extract_strided_slice %74 {offsets = [0, 128], sizes = [8, 64], strides = [1, 1]} : vector<8x256xf32> to vector<8x64xf32>
    %88 = math.tanh %87 : vector<8x64xf32>
    %89 = vector.extract_strided_slice %74 {offsets = [0, 192], sizes = [8, 64], strides = [1, 1]} : vector<8x256xf32> to vector<8x64xf32>
    %90 = arith.negf %89 : vector<8x64xf32>
    %91 = math.exp %90 : vector<8x64xf32>
    %cst_26 = arith.constant 1.000000e+00 : f32
    %92 = vector.broadcast %cst_26 : f32 to vector<8x64xf32>
    %93 = arith.addf %92, %91 : vector<8x64xf32>
    %94 = arith.divf %92, %93 : vector<8x64xf32>
    %95 = arith.mulf %86, %65 : vector<8x64xf32>
    %96 = arith.mulf %80, %88 : vector<8x64xf32>
    %97 = arith.addf %95, %96 : vector<8x64xf32>
    %98 = math.tanh %97 : vector<8x64xf32>
    %99 = arith.mulf %94, %98 : vector<8x64xf32>
    %100 = vector.extract_strided_slice %99 {offsets = [0, 0], sizes = [8, 32], strides = [1, 1]} : vector<8x64xf32> to vector<8x32xf32>
    %c8 = arith.constant 8 : index
    %c0_27 = arith.constant 0 : index
    %101 = vector.load %arg12[%c8, %c0_27] : memref<64x32xf32, #tpu.memory_space<vmem>>, vector<8x32xf32>
    tpu.vector_store %arg12[%c8, %c0_27], %100 {strides = array<i32>} : memref<64x32xf32, #tpu.memory_space<vmem>>, vector<8x32xf32>,
    %102 = vector.extract_strided_slice %99 {offsets = [0, 32], sizes = [8, 32], strides = [1, 1]} : vector<8x64xf32> to vector<8x32xf32>
    %c48 = arith.constant 48 : index
    %c0_28 = arith.constant 0 : index
    %103 = vector.load %arg13[%c48, %c0_28] : memref<64x32xf32, #tpu.memory_space<vmem>>, vector<8x32xf32>
    tpu.vector_store %arg13[%c48, %c0_28], %102 {strides = array<i32>} : memref<64x32xf32, #tpu.memory_space<vmem>>, vector<8x32xf32>,
    %104 = vector.extract_strided_slice %34 {offsets = [16, 0], sizes = [8, 256], strides = [1, 1]} : vector<64x256xf32> to vector<8x256xf32>
    %cst_29 = arith.constant dense<0.000000e+00> : vector<8x256xf32>
    %105 = tpu.matmul %99, %35, %cst_29 {dimension_numbers = #tpu.dot_dimension_numbers<[1], [0], [0], [1], [0, 0, 1, 1], [], []>} : vector<8x64xf32>, vector<64x256xf32>, vector<8x256xf32> -> vector<8x256xf32>
    %106 = arith.addf %104, %105 : vector<8x256xf32>
    %107 = vector.extract_strided_slice %106 {offsets = [0, 0], sizes = [8, 64], strides = [1, 1]} : vector<8x256xf32> to vector<8x64xf32>
    %108 = arith.negf %107 : vector<8x64xf32>
    %109 = math.exp %108 : vector<8x64xf32>
    %cst_30 = arith.constant 1.000000e+00 : f32
    %110 = vector.broadcast %cst_30 : f32 to vector<8x64xf32>
    %111 = arith.addf %110, %109 : vector<8x64xf32>
    %112 = arith.divf %110, %111 : vector<8x64xf32>
    %113 = vector.extract_strided_slice %106 {offsets = [0, 64], sizes = [8, 64], strides = [1, 1]} : vector<8x256xf32> to vector<8x64xf32>
    %114 = arith.negf %113 : vector<8x64xf32>
    %115 = math.exp %114 : vector<8x64xf32>
    %cst_31 = arith.constant 1.000000e+00 : f32
    %116 = vector.broadcast %cst_31 : f32 to vector<8x64xf32>
    %117 = arith.addf %116, %115 : vector<8x64xf32>
    %118 = arith.divf %116, %117 : vector<8x64xf32>
    %119 = vector.extract_strided_slice %106 {offsets = [0, 128], sizes = [8, 64], strides = [1, 1]} : vector<8x256xf32> to vector<8x64xf32>
    %120 = math.tanh %119 : vector<8x64xf32>
    %121 = vector.extract_strided_slice %106 {offsets = [0, 192], sizes = [8, 64], strides = [1, 1]} : vector<8x256xf32> to vector<8x64xf32>
    %122 = arith.negf %121 : vector<8x64xf32>
    %123 = math.exp %122 : vector<8x64xf32>
    %cst_32 = arith.constant 1.000000e+00 : f32
    %124 = vector.broadcast %cst_32 : f32 to vector<8x64xf32>
    %125 = arith.addf %124, %123 : vector<8x64xf32>
    %126 = arith.divf %124, %125 : vector<8x64xf32>
    %127 = arith.mulf %118, %97 : vector<8x64xf32>
    %128 = arith.mulf %112, %120 : vector<8x64xf32>
    %129 = arith.addf %127, %128 : vector<8x64xf32>
    %130 = math.tanh %129 : vector<8x64xf32>
    %131 = arith.mulf %126, %130 : vector<8x64xf32>
    %132 = vector.extract_strided_slice %131 {offsets = [0, 0], sizes = [8, 32], strides = [1, 1]} : vector<8x64xf32> to vector<8x32xf32>
    %c16 = arith.constant 16 : index
    %c0_33 = arith.constant 0 : index
    %133 = vector.load %arg12[%c16, %c0_33] : memref<64x32xf32, #tpu.memory_space<vmem>>, vector<8x32xf32>
    tpu.vector_store %arg12[%c16, %c0_33], %132 {strides = array<i32>} : memref<64x32xf32, #tpu.memory_space<vmem>>, vector<8x32xf32>,
    %134 = vector.extract_strided_slice %131 {offsets = [0, 32], sizes = [8, 32], strides = [1, 1]} : vector<8x64xf32> to vector<8x32xf32>
    %c40 = arith.constant 40 : index
    %c0_34 = arith.constant 0 : index
    %135 = vector.load %arg13[%c40, %c0_34] : memref<64x32xf32, #tpu.memory_space<vmem>>, vector<8x32xf32>
    tpu.vector_store %arg13[%c40, %c0_34], %134 {strides = array<i32>} : memref<64x32xf32, #tpu.memory_space<vmem>>, vector<8x32xf32>,
    %136 = vector.extract_strided_slice %34 {offsets = [24, 0], sizes = [8, 256], strides = [1, 1]} : vector<64x256xf32> to vector<8x256xf32>
    %cst_35 = arith.constant dense<0.000000e+00> : vector<8x256xf32>
    %137 = tpu.matmul %131, %35, %cst_35 {dimension_numbers = #tpu.dot_dimension_numbers<[1], [0], [0], [1], [0, 0, 1, 1], [], []>} : vector<8x64xf32>, vector<64x256xf32>, vector<8x256xf32> -> vector<8x256xf32>
    %138 = arith.addf %136, %137 : vector<8x256xf32>
    %139 = vector.extract_strided_slice %138 {offsets = [0, 0], sizes = [8, 64], strides = [1, 1]} : vector<8x256xf32> to vector<8x64xf32>
    %140 = arith.negf %139 : vector<8x64xf32>
    %141 = math.exp %140 : vector<8x64xf32>
    %cst_36 = arith.constant 1.000000e+00 : f32
    %142 = vector.broadcast %cst_36 : f32 to vector<8x64xf32>
    %143 = arith.addf %142, %141 : vector<8x64xf32>
    %144 = arith.divf %142, %143 : vector<8x64xf32>
    %145 = vector.extract_strided_slice %138 {offsets = [0, 64], sizes = [8, 64], strides = [1, 1]} : vector<8x256xf32> to vector<8x64xf32>
    %146 = arith.negf %145 : vector<8x64xf32>
    %147 = math.exp %146 : vector<8x64xf32>
    %cst_37 = arith.constant 1.000000e+00 : f32
    %148 = vector.broadcast %cst_37 : f32 to vector<8x64xf32>
    %149 = arith.addf %148, %147 : vector<8x64xf32>
    %150 = arith.divf %148, %149 : vector<8x64xf32>
    %151 = vector.extract_strided_slice %138 {offsets = [0, 128], sizes = [8, 64], strides = [1, 1]} : vector<8x256xf32> to vector<8x64xf32>
    %152 = math.tanh %151 : vector<8x64xf32>
    %153 = vector.extract_strided_slice %138 {offsets = [0, 192], sizes = [8, 64], strides = [1, 1]} : vector<8x256xf32> to vector<8x64xf32>
    %154 = arith.negf %153 : vector<8x64xf32>
    %155 = math.exp %154 : vector<8x64xf32>
    %cst_38 = arith.constant 1.000000e+00 : f32
    %156 = vector.broadcast %cst_38 : f32 to vector<8x64xf32>
    %157 = arith.addf %156, %155 : vector<8x64xf32>
    %158 = arith.divf %156, %157 : vector<8x64xf32>
    %159 = arith.mulf %150, %129 : vector<8x64xf32>
    %160 = arith.mulf %144, %152 : vector<8x64xf32>
    %161 = arith.addf %159, %160 : vector<8x64xf32>
    %162 = math.tanh %161 : vector<8x64xf32>
    %163 = arith.mulf %158, %162 : vector<8x64xf32>
    %164 = vector.extract_strided_slice %163 {offsets = [0, 0], sizes = [8, 32], strides = [1, 1]} : vector<8x64xf32> to vector<8x32xf32>
    %c24 = arith.constant 24 : index
    %c0_39 = arith.constant 0 : index
    %165 = vector.load %arg12[%c24, %c0_39] : memref<64x32xf32, #tpu.memory_space<vmem>>, vector<8x32xf32>
    tpu.vector_store %arg12[%c24, %c0_39], %164 {strides = array<i32>} : memref<64x32xf32, #tpu.memory_space<vmem>>, vector<8x32xf32>,
    %166 = vector.extract_strided_slice %163 {offsets = [0, 32], sizes = [8, 32], strides = [1, 1]} : vector<8x64xf32> to vector<8x32xf32>
    %c32 = arith.constant 32 : index
    %c0_40 = arith.constant 0 : index
    %167 = vector.load %arg13[%c32, %c0_40] : memref<64x32xf32, #tpu.memory_space<vmem>>, vector<8x32xf32>
    tpu.vector_store %arg13[%c32, %c0_40], %166 {strides = array<i32>} : memref<64x32xf32, #tpu.memory_space<vmem>>, vector<8x32xf32>,
    %168 = vector.extract_strided_slice %34 {offsets = [32, 0], sizes = [8, 256], strides = [1, 1]} : vector<64x256xf32> to vector<8x256xf32>
    %cst_41 = arith.constant dense<0.000000e+00> : vector<8x256xf32>
    %169 = tpu.matmul %163, %35, %cst_41 {dimension_numbers = #tpu.dot_dimension_numbers<[1], [0], [0], [1], [0, 0, 1, 1], [], []>} : vector<8x64xf32>, vector<64x256xf32>, vector<8x256xf32> -> vector<8x256xf32>
    %170 = arith.addf %168, %169 : vector<8x256xf32>
    %171 = vector.extract_strided_slice %170 {offsets = [0, 0], sizes = [8, 64], strides = [1, 1]} : vector<8x256xf32> to vector<8x64xf32>
    %172 = arith.negf %171 : vector<8x64xf32>
    %173 = math.exp %172 : vector<8x64xf32>
    %cst_42 = arith.constant 1.000000e+00 : f32
    %174 = vector.broadcast %cst_42 : f32 to vector<8x64xf32>
    %175 = arith.addf %174, %173 : vector<8x64xf32>
    %176 = arith.divf %174, %175 : vector<8x64xf32>
    %177 = vector.extract_strided_slice %170 {offsets = [0, 64], sizes = [8, 64], strides = [1, 1]} : vector<8x256xf32> to vector<8x64xf32>
    %178 = arith.negf %177 : vector<8x64xf32>
    %179 = math.exp %178 : vector<8x64xf32>
    %cst_43 = arith.constant 1.000000e+00 : f32
    %180 = vector.broadcast %cst_43 : f32 to vector<8x64xf32>
    %181 = arith.addf %180, %179 : vector<8x64xf32>
    %182 = arith.divf %180, %181 : vector<8x64xf32>
    %183 = vector.extract_strided_slice %170 {offsets = [0, 128], sizes = [8, 64], strides = [1, 1]} : vector<8x256xf32> to vector<8x64xf32>
    %184 = math.tanh %183 : vector<8x64xf32>
    %185 = vector.extract_strided_slice %170 {offsets = [0, 192], sizes = [8, 64], strides = [1, 1]} : vector<8x256xf32> to vector<8x64xf32>
    %186 = arith.negf %185 : vector<8x64xf32>
    %187 = math.exp %186 : vector<8x64xf32>
    %cst_44 = arith.constant 1.000000e+00 : f32
    %188 = vector.broadcast %cst_44 : f32 to vector<8x64xf32>
    %189 = arith.addf %188, %187 : vector<8x64xf32>
    %190 = arith.divf %188, %189 : vector<8x64xf32>
    %191 = arith.mulf %182, %161 : vector<8x64xf32>
    %192 = arith.mulf %176, %184 : vector<8x64xf32>
    %193 = arith.addf %191, %192 : vector<8x64xf32>
    %194 = math.tanh %193 : vector<8x64xf32>
    %195 = arith.mulf %190, %194 : vector<8x64xf32>
    %196 = vector.extract_strided_slice %195 {offsets = [0, 0], sizes = [8, 32], strides = [1, 1]} : vector<8x64xf32> to vector<8x32xf32>
    %c32_45 = arith.constant 32 : index
    %c0_46 = arith.constant 0 : index
    %197 = vector.load %arg12[%c32_45, %c0_46] : memref<64x32xf32, #tpu.memory_space<vmem>>, vector<8x32xf32>
    tpu.vector_store %arg12[%c32_45, %c0_46], %196 {strides = array<i32>} : memref<64x32xf32, #tpu.memory_space<vmem>>, vector<8x32xf32>,
    %198 = vector.extract_strided_slice %195 {offsets = [0, 32], sizes = [8, 32], strides = [1, 1]} : vector<8x64xf32> to vector<8x32xf32>
    %c24_47 = arith.constant 24 : index
    %c0_48 = arith.constant 0 : index
    %199 = vector.load %arg13[%c24_47, %c0_48] : memref<64x32xf32, #tpu.memory_space<vmem>>, vector<8x32xf32>
    tpu.vector_store %arg13[%c24_47, %c0_48], %198 {strides = array<i32>} : memref<64x32xf32, #tpu.memory_space<vmem>>, vector<8x32xf32>,
    %200 = vector.extract_strided_slice %34 {offsets = [40, 0], sizes = [8, 256], strides = [1, 1]} : vector<64x256xf32> to vector<8x256xf32>
    %cst_49 = arith.constant dense<0.000000e+00> : vector<8x256xf32>
    %201 = tpu.matmul %195, %35, %cst_49 {dimension_numbers = #tpu.dot_dimension_numbers<[1], [0], [0], [1], [0, 0, 1, 1], [], []>} : vector<8x64xf32>, vector<64x256xf32>, vector<8x256xf32> -> vector<8x256xf32>
    %202 = arith.addf %200, %201 : vector<8x256xf32>
    %203 = vector.extract_strided_slice %202 {offsets = [0, 0], sizes = [8, 64], strides = [1, 1]} : vector<8x256xf32> to vector<8x64xf32>
    %204 = arith.negf %203 : vector<8x64xf32>
    %205 = math.exp %204 : vector<8x64xf32>
    %cst_50 = arith.constant 1.000000e+00 : f32
    %206 = vector.broadcast %cst_50 : f32 to vector<8x64xf32>
    %207 = arith.addf %206, %205 : vector<8x64xf32>
    %208 = arith.divf %206, %207 : vector<8x64xf32>
    %209 = vector.extract_strided_slice %202 {offsets = [0, 64], sizes = [8, 64], strides = [1, 1]} : vector<8x256xf32> to vector<8x64xf32>
    %210 = arith.negf %209 : vector<8x64xf32>
    %211 = math.exp %210 : vector<8x64xf32>
    %cst_51 = arith.constant 1.000000e+00 : f32
    %212 = vector.broadcast %cst_51 : f32 to vector<8x64xf32>
    %213 = arith.addf %212, %211 : vector<8x64xf32>
    %214 = arith.divf %212, %213 : vector<8x64xf32>
    %215 = vector.extract_strided_slice %202 {offsets = [0, 128], sizes = [8, 64], strides = [1, 1]} : vector<8x256xf32> to vector<8x64xf32>
    %216 = math.tanh %215 : vector<8x64xf32>
    %217 = vector.extract_strided_slice %202 {offsets = [0, 192], sizes = [8, 64], strides = [1, 1]} : vector<8x256xf32> to vector<8x64xf32>
    %218 = arith.negf %217 : vector<8x64xf32>
    %219 = math.exp %218 : vector<8x64xf32>
    %cst_52 = arith.constant 1.000000e+00 : f32
    %220 = vector.broadcast %cst_52 : f32 to vector<8x64xf32>
    %221 = arith.addf %220, %219 : vector<8x64xf32>
    %222 = arith.divf %220, %221 : vector<8x64xf32>
    %223 = arith.mulf %214, %193 : vector<8x64xf32>
    %224 = arith.mulf %208, %216 : vector<8x64xf32>
    %225 = arith.addf %223, %224 : vector<8x64xf32>
    %226 = math.tanh %225 : vector<8x64xf32>
    %227 = arith.mulf %222, %226 : vector<8x64xf32>
    %228 = vector.extract_strided_slice %227 {offsets = [0, 0], sizes = [8, 32], strides = [1, 1]} : vector<8x64xf32> to vector<8x32xf32>
    %c40_53 = arith.constant 40 : index
    %c0_54 = arith.constant 0 : index
    %229 = vector.load %arg12[%c40_53, %c0_54] : memref<64x32xf32, #tpu.memory_space<vmem>>, vector<8x32xf32>
    tpu.vector_store %arg12[%c40_53, %c0_54], %228 {strides = array<i32>} : memref<64x32xf32, #tpu.memory_space<vmem>>, vector<8x32xf32>,
    %230 = vector.extract_strided_slice %227 {offsets = [0, 32], sizes = [8, 32], strides = [1, 1]} : vector<8x64xf32> to vector<8x32xf32>
    %c16_55 = arith.constant 16 : index
    %c0_56 = arith.constant 0 : index
    %231 = vector.load %arg13[%c16_55, %c0_56] : memref<64x32xf32, #tpu.memory_space<vmem>>, vector<8x32xf32>
    tpu.vector_store %arg13[%c16_55, %c0_56], %230 {strides = array<i32>} : memref<64x32xf32, #tpu.memory_space<vmem>>, vector<8x32xf32>,
    %232 = vector.extract_strided_slice %34 {offsets = [48, 0], sizes = [8, 256], strides = [1, 1]} : vector<64x256xf32> to vector<8x256xf32>
    %cst_57 = arith.constant dense<0.000000e+00> : vector<8x256xf32>
    %233 = tpu.matmul %227, %35, %cst_57 {dimension_numbers = #tpu.dot_dimension_numbers<[1], [0], [0], [1], [0, 0, 1, 1], [], []>} : vector<8x64xf32>, vector<64x256xf32>, vector<8x256xf32> -> vector<8x256xf32>
    %234 = arith.addf %232, %233 : vector<8x256xf32>
    %235 = vector.extract_strided_slice %234 {offsets = [0, 0], sizes = [8, 64], strides = [1, 1]} : vector<8x256xf32> to vector<8x64xf32>
    %236 = arith.negf %235 : vector<8x64xf32>
    %237 = math.exp %236 : vector<8x64xf32>
    %cst_58 = arith.constant 1.000000e+00 : f32
    %238 = vector.broadcast %cst_58 : f32 to vector<8x64xf32>
    %239 = arith.addf %238, %237 : vector<8x64xf32>
    %240 = arith.divf %238, %239 : vector<8x64xf32>
    %241 = vector.extract_strided_slice %234 {offsets = [0, 64], sizes = [8, 64], strides = [1, 1]} : vector<8x256xf32> to vector<8x64xf32>
    %242 = arith.negf %241 : vector<8x64xf32>
    %243 = math.exp %242 : vector<8x64xf32>
    %cst_59 = arith.constant 1.000000e+00 : f32
    %244 = vector.broadcast %cst_59 : f32 to vector<8x64xf32>
    %245 = arith.addf %244, %243 : vector<8x64xf32>
    %246 = arith.divf %244, %245 : vector<8x64xf32>
    %247 = vector.extract_strided_slice %234 {offsets = [0, 128], sizes = [8, 64], strides = [1, 1]} : vector<8x256xf32> to vector<8x64xf32>
    %248 = math.tanh %247 : vector<8x64xf32>
    %249 = vector.extract_strided_slice %234 {offsets = [0, 192], sizes = [8, 64], strides = [1, 1]} : vector<8x256xf32> to vector<8x64xf32>
    %250 = arith.negf %249 : vector<8x64xf32>
    %251 = math.exp %250 : vector<8x64xf32>
    %cst_60 = arith.constant 1.000000e+00 : f32
    %252 = vector.broadcast %cst_60 : f32 to vector<8x64xf32>
    %253 = arith.addf %252, %251 : vector<8x64xf32>
    %254 = arith.divf %252, %253 : vector<8x64xf32>
    %255 = arith.mulf %246, %225 : vector<8x64xf32>
    %256 = arith.mulf %240, %248 : vector<8x64xf32>
    %257 = arith.addf %255, %256 : vector<8x64xf32>
    %258 = math.tanh %257 : vector<8x64xf32>
    %259 = arith.mulf %254, %258 : vector<8x64xf32>
    %260 = vector.extract_strided_slice %259 {offsets = [0, 0], sizes = [8, 32], strides = [1, 1]} : vector<8x64xf32> to vector<8x32xf32>
    %c48_61 = arith.constant 48 : index
    %c0_62 = arith.constant 0 : index
    %261 = vector.load %arg12[%c48_61, %c0_62] : memref<64x32xf32, #tpu.memory_space<vmem>>, vector<8x32xf32>
    tpu.vector_store %arg12[%c48_61, %c0_62], %260 {strides = array<i32>} : memref<64x32xf32, #tpu.memory_space<vmem>>, vector<8x32xf32>,
    %262 = vector.extract_strided_slice %259 {offsets = [0, 32], sizes = [8, 32], strides = [1, 1]} : vector<8x64xf32> to vector<8x32xf32>
    %c8_63 = arith.constant 8 : index
    %c0_64 = arith.constant 0 : index
    %263 = vector.load %arg13[%c8_63, %c0_64] : memref<64x32xf32, #tpu.memory_space<vmem>>, vector<8x32xf32>
    tpu.vector_store %arg13[%c8_63, %c0_64], %262 {strides = array<i32>} : memref<64x32xf32, #tpu.memory_space<vmem>>, vector<8x32xf32>,
    %264 = vector.extract_strided_slice %34 {offsets = [56, 0], sizes = [8, 256], strides = [1, 1]} : vector<64x256xf32> to vector<8x256xf32>
    %cst_65 = arith.constant dense<0.000000e+00> : vector<8x256xf32>
    %265 = tpu.matmul %259, %35, %cst_65 {dimension_numbers = #tpu.dot_dimension_numbers<[1], [0], [0], [1], [0, 0, 1, 1], [], []>} : vector<8x64xf32>, vector<64x256xf32>, vector<8x256xf32> -> vector<8x256xf32>
    %266 = arith.addf %264, %265 : vector<8x256xf32>
    %267 = vector.extract_strided_slice %266 {offsets = [0, 0], sizes = [8, 64], strides = [1, 1]} : vector<8x256xf32> to vector<8x64xf32>
    %268 = arith.negf %267 : vector<8x64xf32>
    %269 = math.exp %268 : vector<8x64xf32>
    %cst_66 = arith.constant 1.000000e+00 : f32
    %270 = vector.broadcast %cst_66 : f32 to vector<8x64xf32>
    %271 = arith.addf %270, %269 : vector<8x64xf32>
    %272 = arith.divf %270, %271 : vector<8x64xf32>
    %273 = vector.extract_strided_slice %266 {offsets = [0, 64], sizes = [8, 64], strides = [1, 1]} : vector<8x256xf32> to vector<8x64xf32>
    %274 = arith.negf %273 : vector<8x64xf32>
    %275 = math.exp %274 : vector<8x64xf32>
    %cst_67 = arith.constant 1.000000e+00 : f32
    %276 = vector.broadcast %cst_67 : f32 to vector<8x64xf32>
    %277 = arith.addf %276, %275 : vector<8x64xf32>
    %278 = arith.divf %276, %277 : vector<8x64xf32>
    %279 = vector.extract_strided_slice %266 {offsets = [0, 128], sizes = [8, 64], strides = [1, 1]} : vector<8x256xf32> to vector<8x64xf32>
    %280 = math.tanh %279 : vector<8x64xf32>
    %281 = vector.extract_strided_slice %266 {offsets = [0, 192], sizes = [8, 64], strides = [1, 1]} : vector<8x256xf32> to vector<8x64xf32>
    %282 = arith.negf %281 : vector<8x64xf32>
    %283 = math.exp %282 : vector<8x64xf32>
    %cst_68 = arith.constant 1.000000e+00 : f32
    %284 = vector.broadcast %cst_68 : f32 to vector<8x64xf32>
    %285 = arith.addf %284, %283 : vector<8x64xf32>
    %286 = arith.divf %284, %285 : vector<8x64xf32>
    %287 = arith.mulf %278, %257 : vector<8x64xf32>
    %288 = arith.mulf %272, %280 : vector<8x64xf32>
    %289 = arith.addf %287, %288 : vector<8x64xf32>
    %290 = math.tanh %289 : vector<8x64xf32>
    %291 = arith.mulf %286, %290 : vector<8x64xf32>
    %292 = vector.extract_strided_slice %291 {offsets = [0, 0], sizes = [8, 32], strides = [1, 1]} : vector<8x64xf32> to vector<8x32xf32>
    %c56_69 = arith.constant 56 : index
    %c0_70 = arith.constant 0 : index
    %293 = vector.load %arg12[%c56_69, %c0_70] : memref<64x32xf32, #tpu.memory_space<vmem>>, vector<8x32xf32>
    tpu.vector_store %arg12[%c56_69, %c0_70], %292 {strides = array<i32>} : memref<64x32xf32, #tpu.memory_space<vmem>>, vector<8x32xf32>,
    %294 = vector.extract_strided_slice %291 {offsets = [0, 32], sizes = [8, 32], strides = [1, 1]} : vector<8x64xf32> to vector<8x32xf32>
    %c0_71 = arith.constant 0 : index
    %c0_72 = arith.constant 0 : index
    %295 = vector.load %arg13[%c0_71, %c0_72] : memref<64x32xf32, #tpu.memory_space<vmem>>, vector<8x32xf32>
    tpu.vector_store %arg13[%c0_71, %c0_72], %294 {strides = array<i32>} : memref<64x32xf32, #tpu.memory_space<vmem>>, vector<8x32xf32>,
    %c0_73 = arith.constant 0 : index
    %c0_74 = arith.constant 0 : index
    %296 = vector.load %arg12[%c0_73, %c0_74] : memref<64x32xf32, #tpu.memory_space<vmem>>, vector<64x32xf32>
    %c0_75 = arith.constant 0 : index
    %c0_76 = arith.constant 0 : index
    %297 = vector.load %arg4[%c0_75, %c0_76] : memref<64x256xf32, #tpu.memory_space<vmem>>, vector<32x256xf32>
    %cst_77 = arith.constant dense<0.000000e+00> : vector<64x256xf32>
    %298 = tpu.matmul %296, %297, %cst_77 {dimension_numbers = #tpu.dot_dimension_numbers<[1], [0], [0], [1], [0, 0, 1, 1], [], []>} : vector<64x32xf32>, vector<32x256xf32>, vector<64x256xf32> -> vector<64x256xf32>
    %c0_78 = arith.constant 0 : index
    %c0_79 = arith.constant 0 : index
    %299 = vector.load %arg13[%c0_78, %c0_79] : memref<64x32xf32, #tpu.memory_space<vmem>>, vector<64x32xf32>
    %c32_80 = arith.constant 32 : index
    %c0_81 = arith.constant 0 : index
    %300 = vector.load %arg4[%c32_80, %c0_81] : memref<64x256xf32, #tpu.memory_space<vmem>>, vector<32x256xf32>
    %cst_82 = arith.constant dense<0.000000e+00> : vector<64x256xf32>
    %301 = tpu.matmul %299, %300, %cst_82 {dimension_numbers = #tpu.dot_dimension_numbers<[1], [0], [0], [1], [0, 0, 1, 1], [], []>} : vector<64x32xf32>, vector<32x256xf32>, vector<64x256xf32> -> vector<64x256xf32>
    %302 = arith.addf %298, %301 : vector<64x256xf32>
    %c0_83 = arith.constant 0 : index
    %c0_84 = arith.constant 0 : index
    %303 = vector.load %arg6[%c0_83, %c0_84] : memref<1x256xf32, #tpu.memory_space<vmem>>, vector<1x256xf32>
    %304 = vector.broadcast %303 : vector<1x256xf32> to vector<64x256xf32>
    %305 = arith.addf %302, %304 : vector<64x256xf32>
    %306 = vector.extract_strided_slice %305 {offsets = [56, 0], sizes = [8, 256], strides = [1, 1]} : vector<64x256xf32> to vector<8x256xf32>
    %307 = vector.extract_strided_slice %305 {offsets = [48, 0], sizes = [8, 256], strides = [1, 1]} : vector<64x256xf32> to vector<8x256xf32>
    %308 = vector.extract_strided_slice %305 {offsets = [40, 0], sizes = [8, 256], strides = [1, 1]} : vector<64x256xf32> to vector<8x256xf32>
    %309 = vector.extract_strided_slice %305 {offsets = [32, 0], sizes = [8, 256], strides = [1, 1]} : vector<64x256xf32> to vector<8x256xf32>
    %310 = vector.extract_strided_slice %305 {offsets = [24, 0], sizes = [8, 256], strides = [1, 1]} : vector<64x256xf32> to vector<8x256xf32>
    %311 = vector.extract_strided_slice %305 {offsets = [16, 0], sizes = [8, 256], strides = [1, 1]} : vector<64x256xf32> to vector<8x256xf32>
    %312 = vector.extract_strided_slice %305 {offsets = [8, 0], sizes = [8, 256], strides = [1, 1]} : vector<64x256xf32> to vector<8x256xf32>
    %313 = vector.extract_strided_slice %305 {offsets = [0, 0], sizes = [8, 256], strides = [1, 1]} : vector<64x256xf32> to vector<8x256xf32>
    %314 = tpu.concatenate %306, %307, %308, %309, %310, %311, %312, %313 in 0 : vector<8x256xf32>, vector<8x256xf32>, vector<8x256xf32>, vector<8x256xf32>, vector<8x256xf32>, vector<8x256xf32>, vector<8x256xf32>, vector<8x256xf32> -> vector<64x256xf32>
    %315 = arith.select %18, %314, %305 : vector<64x256xi1>, vector<64x256xf32>
    %c0_85 = arith.constant 0 : index
    %c0_86 = arith.constant 0 : index
    %316 = vector.load %arg5[%c0_85, %c0_86] : memref<64x256xf32, #tpu.memory_space<vmem>>, vector<64x256xf32>
    %c1 = arith.constant 1 : index
    %c0_87 = arith.constant 0 : index
    %c0_88 = arith.constant 0 : index
    %317 = vector.load %arg7[%c1, %c0_87, %c0_88] : memref<2x8x64xf32, #tpu.memory_space<vmem>>, vector<1x8x64xf32>
    %318 = vector.shape_cast %317 : vector<1x8x64xf32> to vector<8x64xf32>
    %c1_89 = arith.constant 1 : index
    %c0_90 = arith.constant 0 : index
    %c0_91 = arith.constant 0 : index
    %319 = vector.load %arg8[%c1_89, %c0_90, %c0_91] : memref<2x8x64xf32, #tpu.memory_space<vmem>>, vector<1x8x64xf32>
    %320 = vector.shape_cast %319 : vector<1x8x64xf32> to vector<8x64xf32>
    %321 = vector.extract_strided_slice %315 {offsets = [0, 0], sizes = [8, 256], strides = [1, 1]} : vector<64x256xf32> to vector<8x256xf32>
    %cst_92 = arith.constant dense<0.000000e+00> : vector<8x256xf32>
    %322 = tpu.matmul %318, %316, %cst_92 {dimension_numbers = #tpu.dot_dimension_numbers<[1], [0], [0], [1], [0, 0, 1, 1], [], []>} : vector<8x64xf32>, vector<64x256xf32>, vector<8x256xf32> -> vector<8x256xf32>
    %323 = arith.addf %321, %322 : vector<8x256xf32>
    %324 = vector.extract_strided_slice %323 {offsets = [0, 0], sizes = [8, 64], strides = [1, 1]} : vector<8x256xf32> to vector<8x64xf32>
    %325 = arith.negf %324 : vector<8x64xf32>
    %326 = math.exp %325 : vector<8x64xf32>
    %cst_93 = arith.constant 1.000000e+00 : f32
    %327 = vector.broadcast %cst_93 : f32 to vector<8x64xf32>
    %328 = arith.addf %327, %326 : vector<8x64xf32>
    %329 = arith.divf %327, %328 : vector<8x64xf32>
    %330 = vector.extract_strided_slice %323 {offsets = [0, 64], sizes = [8, 64], strides = [1, 1]} : vector<8x256xf32> to vector<8x64xf32>
    %331 = arith.negf %330 : vector<8x64xf32>
    %332 = math.exp %331 : vector<8x64xf32>
    %cst_94 = arith.constant 1.000000e+00 : f32
    %333 = vector.broadcast %cst_94 : f32 to vector<8x64xf32>
    %334 = arith.addf %333, %332 : vector<8x64xf32>
    %335 = arith.divf %333, %334 : vector<8x64xf32>
    %336 = vector.extract_strided_slice %323 {offsets = [0, 128], sizes = [8, 64], strides = [1, 1]} : vector<8x256xf32> to vector<8x64xf32>
    %337 = math.tanh %336 : vector<8x64xf32>
    %338 = vector.extract_strided_slice %323 {offsets = [0, 192], sizes = [8, 64], strides = [1, 1]} : vector<8x256xf32> to vector<8x64xf32>
    %339 = arith.negf %338 : vector<8x64xf32>
    %340 = math.exp %339 : vector<8x64xf32>
    %cst_95 = arith.constant 1.000000e+00 : f32
    %341 = vector.broadcast %cst_95 : f32 to vector<8x64xf32>
    %342 = arith.addf %341, %340 : vector<8x64xf32>
    %343 = arith.divf %341, %342 : vector<8x64xf32>
    %344 = arith.mulf %335, %320 : vector<8x64xf32>
    %345 = arith.mulf %329, %337 : vector<8x64xf32>
    %346 = arith.addf %344, %345 : vector<8x64xf32>
    %347 = math.tanh %346 : vector<8x64xf32>
    %348 = arith.mulf %343, %347 : vector<8x64xf32>
    %349 = vector.extract_strided_slice %348 {offsets = [0, 0], sizes = [8, 32], strides = [1, 1]} : vector<8x64xf32> to vector<8x32xf32>
    %c0_96 = arith.constant 0 : index
    %c0_97 = arith.constant 0 : index
    %350 = vector.load %arg12[%c0_96, %c0_97] : memref<64x32xf32, #tpu.memory_space<vmem>>, vector<8x32xf32>
    tpu.vector_store %arg12[%c0_96, %c0_97], %349 {strides = array<i32>} : memref<64x32xf32, #tpu.memory_space<vmem>>, vector<8x32xf32>,
    %351 = vector.extract_strided_slice %348 {offsets = [0, 32], sizes = [8, 32], strides = [1, 1]} : vector<8x64xf32> to vector<8x32xf32>
    %c56_98 = arith.constant 56 : index
    %c0_99 = arith.constant 0 : index
    %352 = vector.load %arg13[%c56_98, %c0_99] : memref<64x32xf32, #tpu.memory_space<vmem>>, vector<8x32xf32>
    tpu.vector_store %arg13[%c56_98, %c0_99], %351 {strides = array<i32>} : memref<64x32xf32, #tpu.memory_space<vmem>>, vector<8x32xf32>,
    %353 = vector.extract_strided_slice %315 {offsets = [8, 0], sizes = [8, 256], strides = [1, 1]} : vector<64x256xf32> to vector<8x256xf32>
    %cst_100 = arith.constant dense<0.000000e+00> : vector<8x256xf32>
    %354 = tpu.matmul %348, %316, %cst_100 {dimension_numbers = #tpu.dot_dimension_numbers<[1], [0], [0], [1], [0, 0, 1, 1], [], []>} : vector<8x64xf32>, vector<64x256xf32>, vector<8x256xf32> -> vector<8x256xf32>
    %355 = arith.addf %353, %354 : vector<8x256xf32>
    %356 = vector.extract_strided_slice %355 {offsets = [0, 0], sizes = [8, 64], strides = [1, 1]} : vector<8x256xf32> to vector<8x64xf32>
    %357 = arith.negf %356 : vector<8x64xf32>
    %358 = math.exp %357 : vector<8x64xf32>
    %cst_101 = arith.constant 1.000000e+00 : f32
    %359 = vector.broadcast %cst_101 : f32 to vector<8x64xf32>
    %360 = arith.addf %359, %358 : vector<8x64xf32>
    %361 = arith.divf %359, %360 : vector<8x64xf32>
    %362 = vector.extract_strided_slice %355 {offsets = [0, 64], sizes = [8, 64], strides = [1, 1]} : vector<8x256xf32> to vector<8x64xf32>
    %363 = arith.negf %362 : vector<8x64xf32>
    %364 = math.exp %363 : vector<8x64xf32>
    %cst_102 = arith.constant 1.000000e+00 : f32
    %365 = vector.broadcast %cst_102 : f32 to vector<8x64xf32>
    %366 = arith.addf %365, %364 : vector<8x64xf32>
    %367 = arith.divf %365, %366 : vector<8x64xf32>
    %368 = vector.extract_strided_slice %355 {offsets = [0, 128], sizes = [8, 64], strides = [1, 1]} : vector<8x256xf32> to vector<8x64xf32>
    %369 = math.tanh %368 : vector<8x64xf32>
    %370 = vector.extract_strided_slice %355 {offsets = [0, 192], sizes = [8, 64], strides = [1, 1]} : vector<8x256xf32> to vector<8x64xf32>
    %371 = arith.negf %370 : vector<8x64xf32>
    %372 = math.exp %371 : vector<8x64xf32>
    %cst_103 = arith.constant 1.000000e+00 : f32
    %373 = vector.broadcast %cst_103 : f32 to vector<8x64xf32>
    %374 = arith.addf %373, %372 : vector<8x64xf32>
    %375 = arith.divf %373, %374 : vector<8x64xf32>
    %376 = arith.mulf %367, %346 : vector<8x64xf32>
    %377 = arith.mulf %361, %369 : vector<8x64xf32>
    %378 = arith.addf %376, %377 : vector<8x64xf32>
    %379 = math.tanh %378 : vector<8x64xf32>
    %380 = arith.mulf %375, %379 : vector<8x64xf32>
    %381 = vector.extract_strided_slice %380 {offsets = [0, 0], sizes = [8, 32], strides = [1, 1]} : vector<8x64xf32> to vector<8x32xf32>
    %c8_104 = arith.constant 8 : index
    %c0_105 = arith.constant 0 : index
    %382 = vector.load %arg12[%c8_104, %c0_105] : memref<64x32xf32, #tpu.memory_space<vmem>>, vector<8x32xf32>
    tpu.vector_store %arg12[%c8_104, %c0_105], %381 {strides = array<i32>} : memref<64x32xf32, #tpu.memory_space<vmem>>, vector<8x32xf32>,
    %383 = vector.extract_strided_slice %380 {offsets = [0, 32], sizes = [8, 32], strides = [1, 1]} : vector<8x64xf32> to vector<8x32xf32>
    %c48_106 = arith.constant 48 : index
    %c0_107 = arith.constant 0 : index
    %384 = vector.load %arg13[%c48_106, %c0_107] : memref<64x32xf32, #tpu.memory_space<vmem>>, vector<8x32xf32>
    tpu.vector_store %arg13[%c48_106, %c0_107], %383 {strides = array<i32>} : memref<64x32xf32, #tpu.memory_space<vmem>>, vector<8x32xf32>,
    %385 = vector.extract_strided_slice %315 {offsets = [16, 0], sizes = [8, 256], strides = [1, 1]} : vector<64x256xf32> to vector<8x256xf32>
    %cst_108 = arith.constant dense<0.000000e+00> : vector<8x256xf32>
    %386 = tpu.matmul %380, %316, %cst_108 {dimension_numbers = #tpu.dot_dimension_numbers<[1], [0], [0], [1], [0, 0, 1, 1], [], []>} : vector<8x64xf32>, vector<64x256xf32>, vector<8x256xf32> -> vector<8x256xf32>
    %387 = arith.addf %385, %386 : vector<8x256xf32>
    %388 = vector.extract_strided_slice %387 {offsets = [0, 0], sizes = [8, 64], strides = [1, 1]} : vector<8x256xf32> to vector<8x64xf32>
    %389 = arith.negf %388 : vector<8x64xf32>
    %390 = math.exp %389 : vector<8x64xf32>
    %cst_109 = arith.constant 1.000000e+00 : f32
    %391 = vector.broadcast %cst_109 : f32 to vector<8x64xf32>
    %392 = arith.addf %391, %390 : vector<8x64xf32>
    %393 = arith.divf %391, %392 : vector<8x64xf32>
    %394 = vector.extract_strided_slice %387 {offsets = [0, 64], sizes = [8, 64], strides = [1, 1]} : vector<8x256xf32> to vector<8x64xf32>
    %395 = arith.negf %394 : vector<8x64xf32>
    %396 = math.exp %395 : vector<8x64xf32>
    %cst_110 = arith.constant 1.000000e+00 : f32
    %397 = vector.broadcast %cst_110 : f32 to vector<8x64xf32>
    %398 = arith.addf %397, %396 : vector<8x64xf32>
    %399 = arith.divf %397, %398 : vector<8x64xf32>
    %400 = vector.extract_strided_slice %387 {offsets = [0, 128], sizes = [8, 64], strides = [1, 1]} : vector<8x256xf32> to vector<8x64xf32>
    %401 = math.tanh %400 : vector<8x64xf32>
    %402 = vector.extract_strided_slice %387 {offsets = [0, 192], sizes = [8, 64], strides = [1, 1]} : vector<8x256xf32> to vector<8x64xf32>
    %403 = arith.negf %402 : vector<8x64xf32>
    %404 = math.exp %403 : vector<8x64xf32>
    %cst_111 = arith.constant 1.000000e+00 : f32
    %405 = vector.broadcast %cst_111 : f32 to vector<8x64xf32>
    %406 = arith.addf %405, %404 : vector<8x64xf32>
    %407 = arith.divf %405, %406 : vector<8x64xf32>
    %408 = arith.mulf %399, %378 : vector<8x64xf32>
    %409 = arith.mulf %393, %401 : vector<8x64xf32>
    %410 = arith.addf %408, %409 : vector<8x64xf32>
    %411 = math.tanh %410 : vector<8x64xf32>
    %412 = arith.mulf %407, %411 : vector<8x64xf32>
    %413 = vector.extract_strided_slice %412 {offsets = [0, 0], sizes = [8, 32], strides = [1, 1]} : vector<8x64xf32> to vector<8x32xf32>
    %c16_112 = arith.constant 16 : index
    %c0_113 = arith.constant 0 : index
    %414 = vector.load %arg12[%c16_112, %c0_113] : memref<64x32xf32, #tpu.memory_space<vmem>>, vector<8x32xf32>
    tpu.vector_store %arg12[%c16_112, %c0_113], %413 {strides = array<i32>} : memref<64x32xf32, #tpu.memory_space<vmem>>, vector<8x32xf32>,
    %415 = vector.extract_strided_slice %412 {offsets = [0, 32], sizes = [8, 32], strides = [1, 1]} : vector<8x64xf32> to vector<8x32xf32>
    %c40_114 = arith.constant 40 : index
    %c0_115 = arith.constant 0 : index
    %416 = vector.load %arg13[%c40_114, %c0_115] : memref<64x32xf32, #tpu.memory_space<vmem>>, vector<8x32xf32>
    tpu.vector_store %arg13[%c40_114, %c0_115], %415 {strides = array<i32>} : memref<64x32xf32, #tpu.memory_space<vmem>>, vector<8x32xf32>,
    %417 = vector.extract_strided_slice %315 {offsets = [24, 0], sizes = [8, 256], strides = [1, 1]} : vector<64x256xf32> to vector<8x256xf32>
    %cst_116 = arith.constant dense<0.000000e+00> : vector<8x256xf32>
    %418 = tpu.matmul %412, %316, %cst_116 {dimension_numbers = #tpu.dot_dimension_numbers<[1], [0], [0], [1], [0, 0, 1, 1], [], []>} : vector<8x64xf32>, vector<64x256xf32>, vector<8x256xf32> -> vector<8x256xf32>
    %419 = arith.addf %417, %418 : vector<8x256xf32>
    %420 = vector.extract_strided_slice %419 {offsets = [0, 0], sizes = [8, 64], strides = [1, 1]} : vector<8x256xf32> to vector<8x64xf32>
    %421 = arith.negf %420 : vector<8x64xf32>
    %422 = math.exp %421 : vector<8x64xf32>
    %cst_117 = arith.constant 1.000000e+00 : f32
    %423 = vector.broadcast %cst_117 : f32 to vector<8x64xf32>
    %424 = arith.addf %423, %422 : vector<8x64xf32>
    %425 = arith.divf %423, %424 : vector<8x64xf32>
    %426 = vector.extract_strided_slice %419 {offsets = [0, 64], sizes = [8, 64], strides = [1, 1]} : vector<8x256xf32> to vector<8x64xf32>
    %427 = arith.negf %426 : vector<8x64xf32>
    %428 = math.exp %427 : vector<8x64xf32>
    %cst_118 = arith.constant 1.000000e+00 : f32
    %429 = vector.broadcast %cst_118 : f32 to vector<8x64xf32>
    %430 = arith.addf %429, %428 : vector<8x64xf32>
    %431 = arith.divf %429, %430 : vector<8x64xf32>
    %432 = vector.extract_strided_slice %419 {offsets = [0, 128], sizes = [8, 64], strides = [1, 1]} : vector<8x256xf32> to vector<8x64xf32>
    %433 = math.tanh %432 : vector<8x64xf32>
    %434 = vector.extract_strided_slice %419 {offsets = [0, 192], sizes = [8, 64], strides = [1, 1]} : vector<8x256xf32> to vector<8x64xf32>
    %435 = arith.negf %434 : vector<8x64xf32>
    %436 = math.exp %435 : vector<8x64xf32>
    %cst_119 = arith.constant 1.000000e+00 : f32
    %437 = vector.broadcast %cst_119 : f32 to vector<8x64xf32>
    %438 = arith.addf %437, %436 : vector<8x64xf32>
    %439 = arith.divf %437, %438 : vector<8x64xf32>
    %440 = arith.mulf %431, %410 : vector<8x64xf32>
    %441 = arith.mulf %425, %433 : vector<8x64xf32>
    %442 = arith.addf %440, %441 : vector<8x64xf32>
    %443 = math.tanh %442 : vector<8x64xf32>
    %444 = arith.mulf %439, %443 : vector<8x64xf32>
    %445 = vector.extract_strided_slice %444 {offsets = [0, 0], sizes = [8, 32], strides = [1, 1]} : vector<8x64xf32> to vector<8x32xf32>
    %c24_120 = arith.constant 24 : index
    %c0_121 = arith.constant 0 : index
    %446 = vector.load %arg12[%c24_120, %c0_121] : memref<64x32xf32, #tpu.memory_space<vmem>>, vector<8x32xf32>
    tpu.vector_store %arg12[%c24_120, %c0_121], %445 {strides = array<i32>} : memref<64x32xf32, #tpu.memory_space<vmem>>, vector<8x32xf32>,
    %447 = vector.extract_strided_slice %444 {offsets = [0, 32], sizes = [8, 32], strides = [1, 1]} : vector<8x64xf32> to vector<8x32xf32>
    %c32_122 = arith.constant 32 : index
    %c0_123 = arith.constant 0 : index
    %448 = vector.load %arg13[%c32_122, %c0_123] : memref<64x32xf32, #tpu.memory_space<vmem>>, vector<8x32xf32>
    tpu.vector_store %arg13[%c32_122, %c0_123], %447 {strides = array<i32>} : memref<64x32xf32, #tpu.memory_space<vmem>>, vector<8x32xf32>,
    %449 = vector.extract_strided_slice %315 {offsets = [32, 0], sizes = [8, 256], strides = [1, 1]} : vector<64x256xf32> to vector<8x256xf32>
    %cst_124 = arith.constant dense<0.000000e+00> : vector<8x256xf32>
    %450 = tpu.matmul %444, %316, %cst_124 {dimension_numbers = #tpu.dot_dimension_numbers<[1], [0], [0], [1], [0, 0, 1, 1], [], []>} : vector<8x64xf32>, vector<64x256xf32>, vector<8x256xf32> -> vector<8x256xf32>
    %451 = arith.addf %449, %450 : vector<8x256xf32>
    %452 = vector.extract_strided_slice %451 {offsets = [0, 0], sizes = [8, 64], strides = [1, 1]} : vector<8x256xf32> to vector<8x64xf32>
    %453 = arith.negf %452 : vector<8x64xf32>
    %454 = math.exp %453 : vector<8x64xf32>
    %cst_125 = arith.constant 1.000000e+00 : f32
    %455 = vector.broadcast %cst_125 : f32 to vector<8x64xf32>
    %456 = arith.addf %455, %454 : vector<8x64xf32>
    %457 = arith.divf %455, %456 : vector<8x64xf32>
    %458 = vector.extract_strided_slice %451 {offsets = [0, 64], sizes = [8, 64], strides = [1, 1]} : vector<8x256xf32> to vector<8x64xf32>
    %459 = arith.negf %458 : vector<8x64xf32>
    %460 = math.exp %459 : vector<8x64xf32>
    %cst_126 = arith.constant 1.000000e+00 : f32
    %461 = vector.broadcast %cst_126 : f32 to vector<8x64xf32>
    %462 = arith.addf %461, %460 : vector<8x64xf32>
    %463 = arith.divf %461, %462 : vector<8x64xf32>
    %464 = vector.extract_strided_slice %451 {offsets = [0, 128], sizes = [8, 64], strides = [1, 1]} : vector<8x256xf32> to vector<8x64xf32>
    %465 = math.tanh %464 : vector<8x64xf32>
    %466 = vector.extract_strided_slice %451 {offsets = [0, 192], sizes = [8, 64], strides = [1, 1]} : vector<8x256xf32> to vector<8x64xf32>
    %467 = arith.negf %466 : vector<8x64xf32>
    %468 = math.exp %467 : vector<8x64xf32>
    %cst_127 = arith.constant 1.000000e+00 : f32
    %469 = vector.broadcast %cst_127 : f32 to vector<8x64xf32>
    %470 = arith.addf %469, %468 : vector<8x64xf32>
    %471 = arith.divf %469, %470 : vector<8x64xf32>
    %472 = arith.mulf %463, %442 : vector<8x64xf32>
    %473 = arith.mulf %457, %465 : vector<8x64xf32>
    %474 = arith.addf %472, %473 : vector<8x64xf32>
    %475 = math.tanh %474 : vector<8x64xf32>
    %476 = arith.mulf %471, %475 : vector<8x64xf32>
    %477 = vector.extract_strided_slice %476 {offsets = [0, 0], sizes = [8, 32], strides = [1, 1]} : vector<8x64xf32> to vector<8x32xf32>
    %c32_128 = arith.constant 32 : index
    %c0_129 = arith.constant 0 : index
    %478 = vector.load %arg12[%c32_128, %c0_129] : memref<64x32xf32, #tpu.memory_space<vmem>>, vector<8x32xf32>
    tpu.vector_store %arg12[%c32_128, %c0_129], %477 {strides = array<i32>} : memref<64x32xf32, #tpu.memory_space<vmem>>, vector<8x32xf32>,
    %479 = vector.extract_strided_slice %476 {offsets = [0, 32], sizes = [8, 32], strides = [1, 1]} : vector<8x64xf32> to vector<8x32xf32>
    %c24_130 = arith.constant 24 : index
    %c0_131 = arith.constant 0 : index
    %480 = vector.load %arg13[%c24_130, %c0_131] : memref<64x32xf32, #tpu.memory_space<vmem>>, vector<8x32xf32>
    tpu.vector_store %arg13[%c24_130, %c0_131], %479 {strides = array<i32>} : memref<64x32xf32, #tpu.memory_space<vmem>>, vector<8x32xf32>,
    %481 = vector.extract_strided_slice %315 {offsets = [40, 0], sizes = [8, 256], strides = [1, 1]} : vector<64x256xf32> to vector<8x256xf32>
    %cst_132 = arith.constant dense<0.000000e+00> : vector<8x256xf32>
    %482 = tpu.matmul %476, %316, %cst_132 {dimension_numbers = #tpu.dot_dimension_numbers<[1], [0], [0], [1], [0, 0, 1, 1], [], []>} : vector<8x64xf32>, vector<64x256xf32>, vector<8x256xf32> -> vector<8x256xf32>
    %483 = arith.addf %481, %482 : vector<8x256xf32>
    %484 = vector.extract_strided_slice %483 {offsets = [0, 0], sizes = [8, 64], strides = [1, 1]} : vector<8x256xf32> to vector<8x64xf32>
    %485 = arith.negf %484 : vector<8x64xf32>
    %486 = math.exp %485 : vector<8x64xf32>
    %cst_133 = arith.constant 1.000000e+00 : f32
    %487 = vector.broadcast %cst_133 : f32 to vector<8x64xf32>
    %488 = arith.addf %487, %486 : vector<8x64xf32>
    %489 = arith.divf %487, %488 : vector<8x64xf32>
    %490 = vector.extract_strided_slice %483 {offsets = [0, 64], sizes = [8, 64], strides = [1, 1]} : vector<8x256xf32> to vector<8x64xf32>
    %491 = arith.negf %490 : vector<8x64xf32>
    %492 = math.exp %491 : vector<8x64xf32>
    %cst_134 = arith.constant 1.000000e+00 : f32
    %493 = vector.broadcast %cst_134 : f32 to vector<8x64xf32>
    %494 = arith.addf %493, %492 : vector<8x64xf32>
    %495 = arith.divf %493, %494 : vector<8x64xf32>
    %496 = vector.extract_strided_slice %483 {offsets = [0, 128], sizes = [8, 64], strides = [1, 1]} : vector<8x256xf32> to vector<8x64xf32>
    %497 = math.tanh %496 : vector<8x64xf32>
    %498 = vector.extract_strided_slice %483 {offsets = [0, 192], sizes = [8, 64], strides = [1, 1]} : vector<8x256xf32> to vector<8x64xf32>
    %499 = arith.negf %498 : vector<8x64xf32>
    %500 = math.exp %499 : vector<8x64xf32>
    %cst_135 = arith.constant 1.000000e+00 : f32
    %501 = vector.broadcast %cst_135 : f32 to vector<8x64xf32>
    %502 = arith.addf %501, %500 : vector<8x64xf32>
    %503 = arith.divf %501, %502 : vector<8x64xf32>
    %504 = arith.mulf %495, %474 : vector<8x64xf32>
    %505 = arith.mulf %489, %497 : vector<8x64xf32>
    %506 = arith.addf %504, %505 : vector<8x64xf32>
    %507 = math.tanh %506 : vector<8x64xf32>
    %508 = arith.mulf %503, %507 : vector<8x64xf32>
    %509 = vector.extract_strided_slice %508 {offsets = [0, 0], sizes = [8, 32], strides = [1, 1]} : vector<8x64xf32> to vector<8x32xf32>
    %c40_136 = arith.constant 40 : index
    %c0_137 = arith.constant 0 : index
    %510 = vector.load %arg12[%c40_136, %c0_137] : memref<64x32xf32, #tpu.memory_space<vmem>>, vector<8x32xf32>
    tpu.vector_store %arg12[%c40_136, %c0_137], %509 {strides = array<i32>} : memref<64x32xf32, #tpu.memory_space<vmem>>, vector<8x32xf32>,
    %511 = vector.extract_strided_slice %508 {offsets = [0, 32], sizes = [8, 32], strides = [1, 1]} : vector<8x64xf32> to vector<8x32xf32>
    %c16_138 = arith.constant 16 : index
    %c0_139 = arith.constant 0 : index
    %512 = vector.load %arg13[%c16_138, %c0_139] : memref<64x32xf32, #tpu.memory_space<vmem>>, vector<8x32xf32>
    tpu.vector_store %arg13[%c16_138, %c0_139], %511 {strides = array<i32>} : memref<64x32xf32, #tpu.memory_space<vmem>>, vector<8x32xf32>,
    %513 = vector.extract_strided_slice %315 {offsets = [48, 0], sizes = [8, 256], strides = [1, 1]} : vector<64x256xf32> to vector<8x256xf32>
    %cst_140 = arith.constant dense<0.000000e+00> : vector<8x256xf32>
    %514 = tpu.matmul %508, %316, %cst_140 {dimension_numbers = #tpu.dot_dimension_numbers<[1], [0], [0], [1], [0, 0, 1, 1], [], []>} : vector<8x64xf32>, vector<64x256xf32>, vector<8x256xf32> -> vector<8x256xf32>
    %515 = arith.addf %513, %514 : vector<8x256xf32>
    %516 = vector.extract_strided_slice %515 {offsets = [0, 0], sizes = [8, 64], strides = [1, 1]} : vector<8x256xf32> to vector<8x64xf32>
    %517 = arith.negf %516 : vector<8x64xf32>
    %518 = math.exp %517 : vector<8x64xf32>
    %cst_141 = arith.constant 1.000000e+00 : f32
    %519 = vector.broadcast %cst_141 : f32 to vector<8x64xf32>
    %520 = arith.addf %519, %518 : vector<8x64xf32>
    %521 = arith.divf %519, %520 : vector<8x64xf32>
    %522 = vector.extract_strided_slice %515 {offsets = [0, 64], sizes = [8, 64], strides = [1, 1]} : vector<8x256xf32> to vector<8x64xf32>
    %523 = arith.negf %522 : vector<8x64xf32>
    %524 = math.exp %523 : vector<8x64xf32>
    %cst_142 = arith.constant 1.000000e+00 : f32
    %525 = vector.broadcast %cst_142 : f32 to vector<8x64xf32>
    %526 = arith.addf %525, %524 : vector<8x64xf32>
    %527 = arith.divf %525, %526 : vector<8x64xf32>
    %528 = vector.extract_strided_slice %515 {offsets = [0, 128], sizes = [8, 64], strides = [1, 1]} : vector<8x256xf32> to vector<8x64xf32>
    %529 = math.tanh %528 : vector<8x64xf32>
    %530 = vector.extract_strided_slice %515 {offsets = [0, 192], sizes = [8, 64], strides = [1, 1]} : vector<8x256xf32> to vector<8x64xf32>
    %531 = arith.negf %530 : vector<8x64xf32>
    %532 = math.exp %531 : vector<8x64xf32>
    %cst_143 = arith.constant 1.000000e+00 : f32
    %533 = vector.broadcast %cst_143 : f32 to vector<8x64xf32>
    %534 = arith.addf %533, %532 : vector<8x64xf32>
    %535 = arith.divf %533, %534 : vector<8x64xf32>
    %536 = arith.mulf %527, %506 : vector<8x64xf32>
    %537 = arith.mulf %521, %529 : vector<8x64xf32>
    %538 = arith.addf %536, %537 : vector<8x64xf32>
    %539 = math.tanh %538 : vector<8x64xf32>
    %540 = arith.mulf %535, %539 : vector<8x64xf32>
    %541 = vector.extract_strided_slice %540 {offsets = [0, 0], sizes = [8, 32], strides = [1, 1]} : vector<8x64xf32> to vector<8x32xf32>
    %c48_144 = arith.constant 48 : index
    %c0_145 = arith.constant 0 : index
    %542 = vector.load %arg12[%c48_144, %c0_145] : memref<64x32xf32, #tpu.memory_space<vmem>>, vector<8x32xf32>
    tpu.vector_store %arg12[%c48_144, %c0_145], %541 {strides = array<i32>} : memref<64x32xf32, #tpu.memory_space<vmem>>, vector<8x32xf32>,
    %543 = vector.extract_strided_slice %540 {offsets = [0, 32], sizes = [8, 32], strides = [1, 1]} : vector<8x64xf32> to vector<8x32xf32>
    %c8_146 = arith.constant 8 : index
    %c0_147 = arith.constant 0 : index
    %544 = vector.load %arg13[%c8_146, %c0_147] : memref<64x32xf32, #tpu.memory_space<vmem>>, vector<8x32xf32>
    tpu.vector_store %arg13[%c8_146, %c0_147], %543 {strides = array<i32>} : memref<64x32xf32, #tpu.memory_space<vmem>>, vector<8x32xf32>,
    %545 = vector.extract_strided_slice %315 {offsets = [56, 0], sizes = [8, 256], strides = [1, 1]} : vector<64x256xf32> to vector<8x256xf32>
    %cst_148 = arith.constant dense<0.000000e+00> : vector<8x256xf32>
    %546 = tpu.matmul %540, %316, %cst_148 {dimension_numbers = #tpu.dot_dimension_numbers<[1], [0], [0], [1], [0, 0, 1, 1], [], []>} : vector<8x64xf32>, vector<64x256xf32>, vector<8x256xf32> -> vector<8x256xf32>
    %547 = arith.addf %545, %546 : vector<8x256xf32>
    %548 = vector.extract_strided_slice %547 {offsets = [0, 0], sizes = [8, 64], strides = [1, 1]} : vector<8x256xf32> to vector<8x64xf32>
    %549 = arith.negf %548 : vector<8x64xf32>
    %550 = math.exp %549 : vector<8x64xf32>
    %cst_149 = arith.constant 1.000000e+00 : f32
    %551 = vector.broadcast %cst_149 : f32 to vector<8x64xf32>
    %552 = arith.addf %551, %550 : vector<8x64xf32>
    %553 = arith.divf %551, %552 : vector<8x64xf32>
    %554 = vector.extract_strided_slice %547 {offsets = [0, 64], sizes = [8, 64], strides = [1, 1]} : vector<8x256xf32> to vector<8x64xf32>
    %555 = arith.negf %554 : vector<8x64xf32>
    %556 = math.exp %555 : vector<8x64xf32>
    %cst_150 = arith.constant 1.000000e+00 : f32
    %557 = vector.broadcast %cst_150 : f32 to vector<8x64xf32>
    %558 = arith.addf %557, %556 : vector<8x64xf32>
    %559 = arith.divf %557, %558 : vector<8x64xf32>
    %560 = vector.extract_strided_slice %547 {offsets = [0, 128], sizes = [8, 64], strides = [1, 1]} : vector<8x256xf32> to vector<8x64xf32>
    %561 = math.tanh %560 : vector<8x64xf32>
    %562 = vector.extract_strided_slice %547 {offsets = [0, 192], sizes = [8, 64], strides = [1, 1]} : vector<8x256xf32> to vector<8x64xf32>
    %563 = arith.negf %562 : vector<8x64xf32>
    %564 = math.exp %563 : vector<8x64xf32>
    %cst_151 = arith.constant 1.000000e+00 : f32
    %565 = vector.broadcast %cst_151 : f32 to vector<8x64xf32>
    %566 = arith.addf %565, %564 : vector<8x64xf32>
    %567 = arith.divf %565, %566 : vector<8x64xf32>
    %568 = arith.mulf %559, %538 : vector<8x64xf32>
    %569 = arith.mulf %553, %561 : vector<8x64xf32>
    %570 = arith.addf %568, %569 : vector<8x64xf32>
    %571 = math.tanh %570 : vector<8x64xf32>
    %572 = arith.mulf %567, %571 : vector<8x64xf32>
    %573 = vector.extract_strided_slice %572 {offsets = [0, 0], sizes = [8, 32], strides = [1, 1]} : vector<8x64xf32> to vector<8x32xf32>
    %c56_152 = arith.constant 56 : index
    %c0_153 = arith.constant 0 : index
    %574 = vector.load %arg12[%c56_152, %c0_153] : memref<64x32xf32, #tpu.memory_space<vmem>>, vector<8x32xf32>
    tpu.vector_store %arg12[%c56_152, %c0_153], %573 {strides = array<i32>} : memref<64x32xf32, #tpu.memory_space<vmem>>, vector<8x32xf32>,
    %575 = vector.extract_strided_slice %572 {offsets = [0, 32], sizes = [8, 32], strides = [1, 1]} : vector<8x64xf32> to vector<8x32xf32>
    %c0_154 = arith.constant 0 : index
    %c0_155 = arith.constant 0 : index
    %576 = vector.load %arg13[%c0_154, %c0_155] : memref<64x32xf32, #tpu.memory_space<vmem>>, vector<8x32xf32>
    tpu.vector_store %arg13[%c0_154, %c0_155], %575 {strides = array<i32>} : memref<64x32xf32, #tpu.memory_space<vmem>>, vector<8x32xf32>,
    %c0_156 = arith.constant 0 : index
    %c0_157 = arith.constant 0 : index
    %577 = vector.load %arg12[%c0_156, %c0_157] : memref<64x32xf32, #tpu.memory_space<vmem>>, vector<64x32xf32>
    %c0_158 = arith.constant 0 : index
    %c0_159 = arith.constant 0 : index
    %578 = vector.load %arg9[%c0_158, %c0_159] : memref<64x1xf32, #tpu.memory_space<vmem>>, vector<32x1xf32>
    %cst_160 = arith.constant dense<0.000000e+00> : vector<64x1xf32>
    %579 = tpu.matmul %577, %578, %cst_160 {dimension_numbers = #tpu.dot_dimension_numbers<[1], [0], [0], [1], [0, 0, 1, 1], [], []>} : vector<64x32xf32>, vector<32x1xf32>, vector<64x1xf32> -> vector<64x1xf32>
    %c0_161 = arith.constant 0 : index
    %c0_162 = arith.constant 0 : index
    %580 = vector.load %arg13[%c0_161, %c0_162] : memref<64x32xf32, #tpu.memory_space<vmem>>, vector<64x32xf32>
    %c32_163 = arith.constant 32 : index
    %c0_164 = arith.constant 0 : index
    %581 = vector.load %arg9[%c32_163, %c0_164] : memref<64x1xf32, #tpu.memory_space<vmem>>, vector<32x1xf32>
    %cst_165 = arith.constant dense<0.000000e+00> : vector<64x1xf32>
    %582 = tpu.matmul %580, %581, %cst_165 {dimension_numbers = #tpu.dot_dimension_numbers<[1], [0], [0], [1], [0, 0, 1, 1], [], []>} : vector<64x32xf32>, vector<32x1xf32>, vector<64x1xf32> -> vector<64x1xf32>
    %583 = arith.addf %579, %582 : vector<64x1xf32>
    %c0_166 = arith.constant 0 : index
    %c0_167 = arith.constant 0 : index
    %584 = vector.load %arg10[%c0_166, %c0_167] : memref<1x1xf32, #tpu.memory_space<vmem>>, vector<1x1xf32>
    %585 = vector.broadcast %584 : vector<1x1xf32> to vector<64x1xf32>
    %586 = arith.addf %583, %585 : vector<64x1xf32>
    %587 = arith.negf %586 : vector<64x1xf32>
    %588 = math.exp %587 : vector<64x1xf32>
    %cst_168 = arith.constant 1.000000e+00 : f32
    %589 = vector.broadcast %cst_168 : f32 to vector<64x1xf32>
    %590 = arith.addf %589, %588 : vector<64x1xf32>
    %591 = arith.divf %589, %590 : vector<64x1xf32>
    %c0_169 = arith.constant 0 : index
    %c0_170 = arith.constant 0 : index
    %592 = vector.load %arg11[%c0_169, %c0_170] : memref<64x1xf32, #tpu.memory_space<vmem>>, vector<64x1xf32>
    tpu.vector_store %arg11[%c0_169, %c0_170], %591 {strides = array<i32>} : memref<64x1xf32, #tpu.memory_space<vmem>>, vector<64x1xf32>,
    return
  }
}

</mosaic_0001>

<bundles_post_ra>
// kernel: tpu_custom_call.1
= control target key start
LH: loop header
LB: loop body
LE: loop exit
PB: predicated region body
PF: predicated region fallthrough
CT: control target
= control target key end

     0   :  { %s4441_s0 = inlined_call_operand.vmem [shape: f32[64,16], index: 0, kind: input, shape index: {}]   ;;  %s4442_s1 = inlined_call_operand.hbm [shape: f32[16,256], index: 1, kind: input, shape index: {}]   ;;  %s4443_s2 = inlined_call_operand.vmem [shape: f32[64,256], index: 2, kind: input, shape index: {}]   ;;  %s4444_s3 = inlined_call_operand.hbm [shape: f32[1,256], index: 3, kind: input, shape index: {}]   ;;  %s4445_s4 = inlined_call_operand.hbm [shape: f32[64,256], index: 4, kind: input, shape index: {}]   ;;  %s4446_s5 = inlined_call_operand.hbm [shape: f32[64,256], index: 5, kind: input, shape index: {}]   ;;  %s4447_s6 = inlined_call_operand.hbm [shape: f32[1,256], index: 6, kind: input, shape index: {}]   ;;  %s4448_s7 = inlined_call_operand.vmem [shape: f32[2,8,64], index: 7, kind: input, shape index: {}]   ;;  %s4449_s8 = inlined_call_operand.vmem [shape: f32[2,8,64], index: 8, kind: input, shape index: {}]   ;;  %s4450_s9 = inlined_call_operand.vmem [shape: f32[64,1], index: 9, kind: input, shape index: {}]   ;;  %s4451_s10 = inlined_call_operand.<no memory space> [shape: f32[1,1], index: 10, kind: input, shape index: {}]   ;;  %s4452_s11 = inlined_call_operand.vmem [shape: f32[64,1], index: 11, kind: output, shape index: {}]  }
   0x1   :  { %v16_v0 = vstv %s4451_s10 }
   0x2   :  { %17 = vst [vmem:[#allocation4] sm:$0x1] %v16_v0 }
   0x3   :  { %18 = vsyncpa [#allocation6], 0 }
   0x4   :  { %19 = vsyncpa [#allocation8], 0 }
   0x5   :  { %20 = vsyncpa [#allocation11], 0  ;;  %s3279_s19 = smov [#allocation7]  }
   0x6   :  { %s43_s20 = sshll.u32 %s3279_s19, 4  ;;  %s44_s20 = int_to_ptr.vmem [resolvable:$true] %s43_s20 }
   0x7   :  { %s3181_s21 = scalar_lea.vmem %s44_s20, 32  ;;  %p3186_p1 = scmp.lt.s32.totalorder %s44_s20, %s44_s20 }
   0x8   :  { %p3182_p0 = scmp.ne.s32.totalorder %s44_s20, %s3181_s21  ;;  %p3187_p2 = scmp.lt.s32.totalorder %s3181_s21, %s3181_s21 }
   0xa   :  { %p3188_p3 = por %p3187_p2, %p3186_p1 }
   0xc   :  { %p3189_p4 = pnand %p3188_p3, %p3182_p0 }
   0xe   :  { %3192 = shalt.err (!%p3189_p4)
}
   0xf   :  { %46 = dma.hbm_to_vmem [thread:$0]  %s4444_s3, 32, %s44_s20, [#allocation8]  }
  0x10   :  { %s3280_s24 = smov [#allocation10]   ;;  %s3281_s25 = smov [#allocation5]  }
  0x11   :  { %s64_s10 = sshll.u32 %s3280_s24, 4  ;;  %s28_s26 = sshll.u32 %s3281_s25, 4  ;;  %s65_s10 = int_to_ptr.vmem [resolvable:$true] %s64_s10  ;;  %s29_s26 = int_to_ptr.vmem [resolvable:$true] %s28_s26 }
  0x12   :  { %s3201_s27 = scalar_lea.vmem %s65_s10, 2048  ;;  %p3206_p6 = scmp.lt.s32.totalorder %s65_s10, %s65_s10 }
  0x13   :  { %p3202_p5 = scmp.ne.s32.totalorder %s65_s10, %s3201_s27  ;;  %p3207_p7 = scmp.lt.s32.totalorder %s3201_s27, %s3201_s27 }
  0x15   :  { %p3208_p8 = por %p3207_p7, %p3206_p6 }
  0x17   :  { %p3209_p9 = pnand %p3208_p8, %p3202_p5 }
  0x19   :  { %3212 = shalt.err (!%p3209_p9)
}
  0x1a   :  { %s3282_s28 = smov 256   ;;  %s3283_s29 = smov 16  }
  0x1b   :  { %70 = dma.hbm_to_vmem [thread:$0]  %s4446_s5, 2048, %s65_s10, [#allocation11], %s3282_s28, %s3282_s28, %s3283_s29  }
  0x1c   :  { %s3221_s3 = scalar_lea.vmem %s29_s26, 512  ;;  %p3226_p11 = scmp.lt.s32.totalorder %s29_s26, %s29_s26 }
  0x1d   :  { %p3222_p10 = scmp.ne.s32.totalorder %s29_s26, %s3221_s3  ;;  %p3227_p12 = scmp.lt.s32.totalorder %s3221_s3, %s3221_s3 }
  0x1f   :  { %p3228_p13 = por %p3227_p12, %p3226_p11 }
  0x21   :  { %p3229_p0 = pnand %p3228_p13, %p3222_p10 }
  0x23   :  { %3232 = shalt.err (!%p3229_p0)
}
  0x24   :  { %34 = dma.hbm_to_vmem [thread:$0]  %s4442_s1, 512, %s29_s26, [#allocation6], %s3282_s28, %s3282_s28, %s3283_s29  }
  0x25   :  { %s3284_s15 = smov [#allocation9]   ;;  %s3285_s17 = smov [#allocation12]  }
  0x26   :  { %s52_s16 = sshll.u32 %s3284_s15, 4  ;;  %s77_s18 = sshll.u32 %s3285_s17, 4  ;;  %s53_s16 = int_to_ptr.vmem [resolvable:$true] %s52_s16  ;;  %s78_s18 = int_to_ptr.vmem [resolvable:$true] %s77_s18 }
  0x27   :  { %s3241_s19 = scalar_lea.vmem %s53_s16, 2048  ;;  %p3246_p2 = scmp.lt.s32.totalorder %s53_s16, %s53_s16 }
  0x28   :  { %p3242_p1 = scmp.ne.s32.totalorder %s53_s16, %s3241_s19  ;;  %p3247_p3 = scmp.lt.s32.totalorder %s3241_s19, %s3241_s19 }
  0x2a   :  { %p3248_p4 = por %p3247_p3, %p3246_p2 }
  0x2c   :  { %p3249_p5 = pnand %p3248_p4, %p3242_p1 }
  0x2e   :  { %3252 = shalt.err (!%p3249_p5)
}
  0x2f   :  { %58 = dma.hbm_to_vmem [thread:$0]  %s4445_s4, 2048, %s53_s16, [#allocation8], %s3282_s28, %s3282_s28, %s3283_s29  }
  0x30   :  { %s3261_s21 = scalar_lea.vmem %s78_s18, 32  ;;  %p3266_p7 = scmp.lt.s32.totalorder %s78_s18, %s78_s18 }
  0x31   :  { %p3262_p6 = scmp.ne.s32.totalorder %s78_s18, %s3261_s21  ;;  %p3267_p8 = scmp.lt.s32.totalorder %s3261_s21, %s3261_s21 }
  0x33   :  { %p3268_p9 = por %p3267_p8, %p3266_p7 }
  0x35   :  { %p3269_p10 = pnand %p3268_p9, %p3262_p6 }
  0x37   :  { %3272 = shalt.err (!%p3269_p10)
}
  0x38   :  { %80 = dma.hbm_to_vmem [thread:$0]  %s4447_s6, 32, %s78_s18, [#allocation11]  }
  0x39   :  { %3273 = dma.done.wait [#allocation6], 512  }
  0x3a   :  { %3274 = vsyncadd [#allocation6], 4294966784 }
  0x3b   :  { %3275 = dma.done.wait [#allocation8], 2080  }
  0x3c   :  { %3276 = vsyncadd [#allocation8], 4294965216 }
  0x3d   :  { %3277 = dma.done.wait [#allocation11], 2080  }
  0x3e   :  { %3278 = vsyncadd [#allocation11], 4294965216  ;;  %v3286_v1 = vmov 0.0   ;;  %v144_v2 = vld [vmem:[#allocation5 + $0x18] sm:$0xff]  ;;  %v143_v3 = vld [vmem:[#allocation5 + $0x10] sm:$0xff]  ;;  %vm157_vm0 = vcmask 130048   ;;  %v104_v32 = vlaneseq }
  0x3f   :  { %246 = vmatprep.mubr.f32.mxu0 %v3286_v1  ;;  %397 = vmatprep.mubr.f32.mxu1 %v3286_v1  ;;  %v142_v4 = vld [vmem:[#allocation5 + $0x8] sm:$0xff]  ;;  %v141_v5 = vld [vmem:[#allocation5] sm:$0xff]  ;;  %v3375_v7 = vld [vmem:[%s4443_s2 + $0x78] sm:$0xff]  ;;  %s3287_s27 = smov 64   ;;  %vm329_vm1 = vcmask 523264   ;;  %vm436_vm4 = vcmask 261120  }
  0x40   :  { %210 = vmatprep.subr.mxu0 %v144_v2  ;;  %v133_v6 = vld [vmem:[%s4441_s0] sm:$0xff]  ;;  %349 = vmatprep.subr.mxu1 %v3375_v7  ;;  %v3381_v8 = vld [vmem:[%s4443_s2 + $0x70] sm:$0xff]  ;;  %v3386_v9 = vld [vmem:[%s4443_s2 + $0x68] sm:$0xff]  ;;  %v3548_v33 = vshrl.u32 %v104_v32, 7  ;;  %v105_v43 = vand.u32 127, %v104_v32  ;;  %vm2752_vm5 = vcmask 7168  }
  0x41   :  { %211 = vmatpush1.msra.mxu0 %v143_v3  ;;  %350 = vmatpush1.msra.mxu1 %v3381_v8  ;;  %v3392_v10 = vld [vmem:[%s4443_s2 + $0x60] sm:$0xff]  ;;  %v3397_v11 = vld [vmem:[%s4443_s2 + $0x58] sm:$0xff]  ;;  %v3404_v12 = vld [vmem:[%s4443_s2 + $0x50] sm:$0xff] }
  0x42   :  { %212 = vmatprep.subr.mxu0 %v142_v4  ;;  %351 = vmatprep.subr.mxu1 %v3386_v9  ;;  %v134_v13 = vld [vmem:[%s4441_s0 + $0x8] sm:$0xff]  ;;  %v3420_v15 = vld [vmem:[%s4443_s2 + $0x40] sm:$0xff]  ;;  %v3427_v16 = vld [vmem:[%s4443_s2 + $0x38] sm:$0xff]  ;;  %v4454_v34 = vsub.s32 0, %v3548_v33  ;;  %v4453_v37 = vsub.s32 1, %v3548_v33  ;;  %v106_v48 = vadd.s32 128, %v105_v43 }
  0x43   :  { %213 = vmatpush1.msra.mxu0 %v141_v5  ;;  %352 = vmatpush1.msra.mxu1 %v3392_v10  ;;  %v3414_v14 = vld [vmem:[%s4443_s2 + $0x48] sm:$0xff]  ;;  %v3435_v17 = vld [vmem:[%s4443_s2 + $0x30] sm:$0xff]  ;;  %v328_v18 = vld [vmem:[%s4449_s8] sm:$0xff]  ;;  %v111_v51 = vand.u32 63, %v105_v43 }
  0x44   :  { %2768 = vmatmul.mubr.msk.f32.vlgmr.msra.gmra.mxu0 %vm157_vm0, %v133_v6  ;;  %353 = vmatprep.subr.mxu1 %v3397_v11  ;;  %v135_v19 = vld [vmem:[%s4441_s0 + $0x10] sm:$0xff]  ;;  %v3448_v20 = vld [vmem:[%s4443_s2 + $0x28] sm:$0xff]  ;;  %v3454_v21 = vld [vmem:[%s4443_s2 + $0x20] sm:$0xff]  ;;  %v118_v54 = vand.u32 63, %v106_v48 }
  0x45   :  { %252 = vmatprep.mubr.f32.mxu0 %v3286_v1  ;;  %566 = vmatprep.subr.mxu0 %v3375_v7  ;;  %v3461_v22 = vld [vmem:[%s4443_s2 + $0x18] sm:$0xff]  ;;  %v3469_v23 = vld [vmem:[%s4443_s2 + $0x10] sm:$0xff]  ;;  %v3479_v25 = vld [vmem:[%s4443_s2 + $0x8] sm:$0xff]  ;;  %vm3568_vm2 = vcmp.ge.s32.totalorder %v111_v51, 32 }
  0x46   :  { %354 = vmatpush1.msra.mxu1 %v3404_v12  ;;  %567 = vmatpush1.msra.mxu0 %v3381_v8  ;;  %v136_v24 = vld [vmem:[%s4441_s0 + $0x18] sm:$0xff]  ;;  %v3485_v26 = vld [vmem:[%s4443_s2] sm:$0xff]  ;;  %v138_v29 = vld [vmem:[%s4441_s0 + $0x28] sm:$0xff]  ;;  %vm3574_vm3 = vcmp.ge.s32.totalorder %v118_v54, 32 }
  0x47   :  { %355 = vmatprep.subr.mxu1 %v3414_v14  ;;  %420 = vrot.lane.b32.xlu0 %v328_v18, %s3287_s27  ;;  %v327_v27 = vld [vmem:[%s4448_s7] sm:$0xff]  ;;  %v139_v30 = vld [vmem:[%s4441_s0 + $0x30] sm:$0xff]  ;;  %v140_v31 = vld [vmem:[%s4441_s0 + $0x38] sm:$0xff] }
  0x48   :  { %2769 = vmatmul.mubr.msk.f32.gmra.mxu0 %vm157_vm0, %v134_v13  ;;  %356 = vmatpush1.msra.mxu1 %v3420_v15  ;;  %v137_v28 = vld [vmem:[%s4441_s0 + $0x20] sm:$0xff]  ;;  %s3288_s0 = smov 32  }
  0x49   :  { %258 = vmatprep.mubr.f32.mxu0 %v3286_v1  ;;  %357 = vmatprep.subr.mxu1 %v3427_v16  ;;  %v145_v35 = vld [vmem:[#allocation7] sm:$0x3] }
  0x4a   :  { %358 = vmatpush1.msra.mxu1 %v3435_v17  ;;  %568 = vmatprep.subr.mxu0 %v3386_v9  ;;  %v150_v39 = vrot.slane %v145_v35, %v4454_v34  ;;  %v154_v41 = vrot.slane %v145_v35, %v4453_v37 }
  0x4b   :  { %359 = vmatprep.subr.mxu1 %v3448_v20  ;;  %569 = vmatpush1.msra.mxu0 %v3392_v10 }
  0x4c   :  { %2770 = vmatmul.mubr.msk.f32.gmra.mxu0 %vm157_vm0, %v135_v19  ;;  %360 = vmatpush1.msra.mxu1 %v3454_v21 }
  0x4d   :  { %264 = vmatprep.mubr.f32.mxu0 %v3286_v1  ;;  %361 = vmatprep.subr.mxu1 %v3461_v22 }
  0x4e   :  { %362 = vmatpush1.msra.mxu1 %v3469_v23  ;;  %570 = vmatprep.subr.mxu0 %v3397_v11 }
  0x4f   :  { %363 = vmatprep.subr.mxu1 %v3479_v25  ;;  %571 = vmatpush1.msra.mxu0 %v3404_v12 }
  0x50   :  { %2771 = vmatmul.mubr.msk.f32.gmra.mxu0 %vm157_vm0, %v136_v24  ;;  %364 = vmatpush1.msra.mxu1 %v3485_v26 }
  0x51   :  { %270 = vmatprep.mubr.f32.mxu0 %v3286_v1  ;;  %2776 = vmatmul.mubr.msk.f32.vlgmr.msra.gmra.mxu1 %vm329_vm1, %v327_v27 }
  0x52   :  { %460 = vmatprep.subr.mxu1 %v3375_v7  ;;  %508 = vmatprep.mubr.f32.mxu1 %v3286_v1 }
  0x53   :  { %461 = vmatpush1.msra.mxu1 %v3381_v8  ;;  %572 = vmatprep.subr.mxu0 %v3414_v14 }
  0x54   :  { %2772 = vmatmul.mubr.msk.f32.gmra.mxu0 %vm157_vm0, %v137_v28  ;;  %462 = vmatprep.subr.mxu1 %v3386_v9 }
  0x55   :  { %276 = vmatprep.mubr.f32.mxu0 %v3286_v1  ;;  %463 = vmatpush1.msra.mxu1 %v3392_v10 }
  0x56   :  { %464 = vmatprep.subr.mxu1 %v3397_v11  ;;  %573 = vmatpush1.msra.mxu0 %v3420_v15 }
  0x57   :  { %465 = vmatpush1.msra.mxu1 %v3404_v12  ;;  %574 = vmatprep.subr.mxu0 %v3427_v16 }
  0x58   :  { %2773 = vmatmul.mubr.msk.f32.gmra.mxu0 %vm157_vm0, %v138_v29  ;;  %466 = vmatprep.subr.mxu1 %v3414_v14 }
  0x59   :  { %282 = vmatprep.mubr.f32.mxu0 %v3286_v1  ;;  %467 = vmatpush1.msra.mxu1 %v3420_v15 }
  0x5a   :  { %468 = vmatprep.subr.mxu1 %v3427_v16  ;;  %575 = vmatpush1.msra.mxu0 %v3435_v17 }
  0x5b   :  { %469 = vmatpush1.msra.mxu1 %v3435_v17  ;;  %576 = vmatprep.subr.mxu0 %v3448_v20 }
  0x5c   :  { %2774 = vmatmul.mubr.msk.f32.gmra.mxu0 %vm157_vm0, %v139_v30  ;;  %470 = vmatprep.subr.mxu1 %v3448_v20 }
  0x5d   :  { %288 = vmatprep.mubr.f32.mxu0 %v3286_v1  ;;  %471 = vmatpush1.msra.mxu1 %v3454_v21 }
  0x5e   :  { %472 = vmatprep.subr.mxu1 %v3461_v22  ;;  %577 = vmatpush1.msra.mxu0 %v3454_v21 }
  0x5f   :  { %473 = vmatpush1.msra.mxu1 %v3469_v23  ;;  %578 = vmatprep.subr.mxu0 %v3461_v22 }
  0x60   :  { %2775 = vmatmul.mubr.msk.f32.gmra.mxu0 %vm157_vm0, %v140_v31  ;;  %474 = vmatprep.subr.mxu1 %v3479_v25 }
  0x61   :  { %475 = vmatpush1.msra.mxu1 %v3485_v26  ;;  %614 = vmatprep.mubr.f32.mxu0 %v3286_v1 }
  0x62   :  { %579 = vmatpush1.msra.mxu0 %v3469_v23  ;;  %672 = vmatprep.subr.mxu1 %v3375_v7 }
  0x63   :  { %580 = vmatprep.subr.mxu0 %v3479_v25 }
  0x64   :  { %581 = vmatpush1.msra.mxu0 %v3485_v26 }
  0x65   :  { %778 = vmatprep.subr.mxu0 %v3375_v7 }
 0x104   :  { %v248_v36 = vpop.f32.mrf.mxu0 }
 0x105   :  { %v3628_v43 = vadd.f32 %v248_v36, %v150_v39 }
 0x106   :  { %v250_v38 = vpop.f32.mrf.mxu0 }
 0x107   :  { %v3640_v51 = vadd.f32 %v250_v38, %v154_v41 }
 0x108   :  { %v254_v40 = vpop.f32.mrf.mxu0 }
 0x109   :  { %v3556_v42 = vadd.f32 %v254_v40, %v150_v39 }
 0x10a   :  { %v256_v44 = vpop.f32.mrf.mxu0 }
 0x10b   :  { %v3558_v45 = vadd.f32 %v256_v44, %v154_v41 }
 0x10c   :  { %v260_v46 = vpop.f32.mrf.mxu0 }
 0x10d   :  { %v3560_v47 = vadd.f32 %v260_v46, %v150_v39 }
 0x10e   :  { %v262_v49 = vpop.f32.mrf.mxu0 }
 0x10f   :  { %v3562_v50 = vadd.f32 %v262_v49, %v154_v41 }
 0x110   :  { %v266_v52 = vpop.f32.mrf.mxu0 }
 0x111   :  { %v3564_v53 = vadd.f32 %v266_v52, %v150_v39 }
 0x112   :  { %v268_v55 = vpop.f32.mrf.mxu0 }
 0x113   :  { %v3566_v56 = vadd.f32 %v268_v55, %v154_v41 }
 0x114   :  { %v272_v58 = vpop.f32.mrf.mxu0 }
 0x115   :  { %v3572_v59 = vadd.f32 %v272_v58, %v150_v39 }
 0x116   :  { %v274_v61 = vpop.f32.mrf.mxu0 }
 0x117   :  { %v3578_v62 = vadd.f32 %v274_v61, %v154_v41  ;;  %v301_v63 = vsel %vm3568_vm2, %v3572_v59, %v3564_v53  ;;  %v303_v0 = vsel %vm3568_vm2, %v3564_v53, %v3572_v59 }
 0x118   :  { %v278_v2 = vpop.f32.mrf.mxu0 }
 0x119   :  { %v3588_v3 = vadd.f32 %v278_v2, %v150_v39  ;;  %v302_v4 = vsel %vm3574_vm3, %v3578_v62, %v3566_v56  ;;  %v304_v5 = vsel %vm3574_vm3, %v3566_v56, %v3578_v62 }
 0x11a   :  { %v280_v6 = vpop.f32.mrf.mxu0 }
 0x11b   :  { %v3598_v13 = vadd.f32 %v280_v6, %v154_v41  ;;  %v299_v18 = vsel %vm3568_vm2, %v3588_v3, %v3560_v47  ;;  %v305_v19 = vsel %vm3568_vm2, %v3560_v47, %v3588_v3 }
 0x11c   :  { %v284_v24 = vpop.f32.mrf.mxu0 }
 0x11d   :  { %v3608_v27 = vadd.f32 %v284_v24, %v150_v39  ;;  %v300_v28 = vsel %vm3574_vm3, %v3598_v13, %v3562_v50  ;;  %v306_v29 = vsel %vm3574_vm3, %v3562_v50, %v3598_v13 }
 0x11e   :  { %v286_v30 = vpop.f32.mrf.mxu0 }
 0x11f   :  { %v3618_v31 = vadd.f32 %v286_v30, %v154_v41  ;;  %v297_v32 = vsel %vm3568_vm2, %v3608_v27, %v3556_v42  ;;  %v307_v35 = vsel %vm3568_vm2, %v3556_v42, %v3608_v27  ;;  %v1199_v42 = vld [vmem:[#allocation9 + $0x38] sm:$0xff] }
 0x120   :  { %v290_v40 = vpop.f32.mrf.mxu0 }
 0x121   :  { %v3630_v44 = vadd.f32 %v290_v40, %v150_v39  ;;  %v298_v46 = vsel %vm3574_vm3, %v3618_v31, %v3558_v45  ;;  %v308_v48 = vsel %vm3574_vm3, %v3558_v45, %v3618_v31  ;;  %v399_v39 = vpop.f32.mrf.mxu1 }
 0x122   :  { %v292_v49 = vpop.f32.mrf.mxu0 }
 0x123   :  { %v295_v36 = vsel %vm3568_vm2, %v3630_v44, %v3628_v43  ;;  %v3646_v52 = vadd.f32 %v292_v49, %v154_v41  ;;  %v309_v54 = vsel %vm3568_vm2, %v3628_v43, %v3630_v44  ;;  %v401_v41 = vpop.f32.mrf.mxu1 }
 0x124   :  { %v404_v55 = vadd.f32 %v399_v39, %v295_v36 }
 0x125   :  { %v296_v61 = vsel %vm3574_vm3, %v3646_v52, %v3640_v51 }
 0x126   :  { %v2777_v58 = vmul.f32 -1.442695, %v404_v55  ;;  %v405_v2 = vadd.f32 %v401_v41, %v296_v61  ;;  %v421_v55 = vpop.permute.xlu0 %420 }
 0x128   :  { %2949 = vpow2.f32 %v2777_v58  ;;  %v2778_v36 = vmul.f32 -1.442695, %v405_v2 }
 0x129   :  { %2951 = vtanh.f32 %v405_v2 }
 0x135   :  { %v2950_v6 = vpop.eup %2949 }
 0x136   :  { %v409_v24 = vadd.f32 1.0, %v2950_v6  ;;  %v2952_v30 = vpop.eup %2951 }
 0x138   :  { %2953 = vrcp.f32 %v409_v24 }
 0x139   :  { %2955 = vpow2.f32 %v2778_v36 }
 0x145   :  { %v2954_v40 = vpop.eup %2953 }
 0x146   :  { %v424_v49 = vmul.f32 %v2954_v40, %v2952_v30  ;;  %v2956_v39 = vpop.eup %2955  ;;  %v423_v37 = vmul.f32 %v2954_v40, %v421_v55 }
 0x147   :  { %v416_v58 = vadd.f32 1.0, %v2956_v39 }
 0x148   :  { %426 = vrot.lane.b32.xlu0 %v424_v49, %s3287_s27 }
 0x149   :  { %2957 = vrcp.f32 %v416_v58 }
 0x156   :  { %v2958_v61 = vpop.eup %2957 }
 0x1ba   :  { %v427_v34 = vpop.permute.xlu0 %426 }
 0x1bb   :  { %v429_v38 = vadd.f32 %v427_v34, %v423_v37 }
 0x1bd   :  { %2959 = vtanh.f32 %v429_v38 }
 0x1ca   :  { %v2960_v41 = vpop.eup %2959 }
 0x1cb   :  { %v3661_v6 = vmul.f32 %v2960_v41, %v2958_v61 }
 0x1cd   :  { %433 = vrot.lane.b32.xlu1 %v3661_v6, %s3287_s27 }
 0x23f   :  { %v434_v24 = vpop.permute.xlu1 %433 }
 0x240   :  { %437 = vst.msk [vmem:[#allocation2] sm:$0xff] %vm436_vm4, %v434_v24  ;;  %2779 = vmatmul.mubr.msk.f32.vlgmr.msra.gmra.mxu1 %vm329_vm1, %v434_v24 }
 0x241   :  { %673 = vmatpush1.msra.mxu1 %v3381_v8  ;;  %720 = vmatprep.mubr.f32.mxu1 %v3286_v1 }
 0x242   :  { %674 = vmatprep.subr.mxu1 %v3386_v9 }
 0x243   :  { %675 = vmatpush1.msra.mxu1 %v3392_v10 }
 0x244   :  { %676 = vmatprep.subr.mxu1 %v3397_v11 }
 0x245   :  { %677 = vmatpush1.msra.mxu1 %v3404_v12 }
 0x246   :  { %678 = vmatprep.subr.mxu1 %v3414_v14 }
 0x247   :  { %679 = vmatpush1.msra.mxu1 %v3420_v15 }
 0x248   :  { %680 = vmatprep.subr.mxu1 %v3427_v16 }
 0x249   :  { %681 = vmatpush1.msra.mxu1 %v3435_v17 }
 0x24a   :  { %682 = vmatprep.subr.mxu1 %v3448_v20 }
 0x24b   :  { %683 = vmatpush1.msra.mxu1 %v3454_v21 }
 0x24c   :  { %684 = vmatprep.subr.mxu1 %v3461_v22 }
 0x24d   :  { %685 = vmatpush1.msra.mxu1 %v3469_v23 }
 0x24e   :  { %686 = vmatprep.subr.mxu1 %v3479_v25 }
 0x24f   :  { %687 = vmatpush1.msra.mxu1 %v3485_v26 }
 0x250   :  { %884 = vmatprep.subr.mxu1 %v3375_v7 }
 0x300   :  { %v510_v34 = vpop.f32.mrf.mxu1 }
 0x301   :  { %v515_v37 = vadd.f32 %v510_v34, %v297_v32 }
 0x302   :  { %v512_v30 = vpop.f32.mrf.mxu1 }
 0x303   :  { %v2780_v2 = vmul.f32 -1.442695, %v515_v37  ;;  %v516_v40 = vadd.f32 %v512_v30, %v298_v46 }
 0x305   :  { %2961 = vpow2.f32 %v2780_v2  ;;  %v2781_v61 = vmul.f32 -1.442695, %v516_v40 }
 0x306   :  { %2963 = vtanh.f32 %v516_v40 }
 0x312   :  { %v2962_v49 = vpop.eup %2961 }
 0x313   :  { %v520_v36 = vadd.f32 1.0, %v2962_v49  ;;  %v2964_v39 = vpop.eup %2963 }
 0x315   :  { %2965 = vrcp.f32 %v520_v36 }
 0x316   :  { %2967 = vpow2.f32 %v2781_v61 }
 0x322   :  { %v2966_v55 = vpop.eup %2965 }
 0x323   :  { %v531_v58 = vmul.f32 %v2966_v55, %v2964_v39  ;;  %v2968_v32 = vpop.eup %2967  ;;  %v530_v24 = vmul.f32 %v2966_v55, %v429_v38 }
 0x324   :  { %v527_v41 = vadd.f32 1.0, %v2968_v32 }
 0x325   :  { %533 = vrot.lane.b32.xlu1 %v531_v58, %s3287_s27 }
 0x326   :  { %2969 = vrcp.f32 %v527_v41 }
 0x333   :  { %v2970_v2 = vpop.eup %2969 }
 0x397   :  { %v534_v34 = vpop.permute.xlu1 %533 }
 0x398   :  { %v536_v37 = vadd.f32 %v534_v34, %v530_v24 }
 0x39a   :  { %2971 = vtanh.f32 %v536_v37 }
 0x3a7   :  { %v2972_v46 = vpop.eup %2971 }
 0x3a8   :  { %v3695_v30 = vmul.f32 %v2972_v46, %v2970_v2 }
 0x3aa   :  { %540 = vrot.lane.b32.xlu0 %v3695_v30, %s3287_s27 }
 0x41c   :  { %v541_v49 = vpop.permute.xlu0 %540 }
 0x41d   :  { %543 = vst.msk [vmem:[#allocation2 + $0x8] sm:$0xff] %vm436_vm4, %v541_v49  ;;  %2782 = vmatmul.mubr.msk.f32.vlgmr.msra.gmra.mxu0 %vm329_vm1, %v541_v49 }
 0x41e   :  { %779 = vmatpush1.msra.mxu0 %v3381_v8  ;;  %826 = vmatprep.mubr.f32.mxu0 %v3286_v1 }
 0x41f   :  { %780 = vmatprep.subr.mxu0 %v3386_v9 }
 0x420   :  { %781 = vmatpush1.msra.mxu0 %v3392_v10 }
 0x421   :  { %782 = vmatprep.subr.mxu0 %v3397_v11 }
 0x422   :  { %783 = vmatpush1.msra.mxu0 %v3404_v12 }
 0x423   :  { %784 = vmatprep.subr.mxu0 %v3414_v14 }
 0x424   :  { %785 = vmatpush1.msra.mxu0 %v3420_v15 }
 0x425   :  { %786 = vmatprep.subr.mxu0 %v3427_v16 }
 0x426   :  { %787 = vmatpush1.msra.mxu0 %v3435_v17 }
 0x427   :  { %788 = vmatprep.subr.mxu0 %v3448_v20 }
 0x428   :  { %789 = vmatpush1.msra.mxu0 %v3454_v21 }
 0x429   :  { %790 = vmatprep.subr.mxu0 %v3461_v22 }
 0x42a   :  { %791 = vmatpush1.msra.mxu0 %v3469_v23 }
 0x42b   :  { %792 = vmatprep.subr.mxu0 %v3479_v25 }
 0x42c   :  { %793 = vmatpush1.msra.mxu0 %v3485_v26 }
 0x42d   :  { %990 = vmatprep.subr.mxu0 %v3375_v7 }
 0x4dd   :  { %v616_v38 = vpop.f32.mrf.mxu0 }
 0x4de   :  { %v621_v40 = vadd.f32 %v616_v38, %v299_v18 }
 0x4df   :  { %v618_v39 = vpop.f32.mrf.mxu0 }
 0x4e0   :  { %v2783_v36 = vmul.f32 -1.442695, %v621_v40  ;;  %v622_v55 = vadd.f32 %v618_v39, %v300_v28 }
 0x4e2   :  { %2973 = vpow2.f32 %v2783_v36  ;;  %v2784_v34 = vmul.f32 -1.442695, %v622_v55 }
 0x4e3   :  { %2975 = vtanh.f32 %v622_v55 }
 0x4ef   :  { %v2974_v58 = vpop.eup %2973 }
 0x4f0   :  { %v626_v61 = vadd.f32 1.0, %v2974_v58  ;;  %v2976_v32 = vpop.eup %2975 }
 0x4f2   :  { %2977 = vrcp.f32 %v626_v61 }
 0x4f3   :  { %2979 = vpow2.f32 %v2784_v34 }
 0x4ff   :  { %v2978_v41 = vpop.eup %2977 }
 0x500   :  { %v637_v24 = vmul.f32 %v2978_v41, %v2976_v32  ;;  %v2980_v18 = vpop.eup %2979  ;;  %v636_v46 = vmul.f32 %v2978_v41, %v536_v37 }
 0x501   :  { %v633_v2 = vadd.f32 1.0, %v2980_v18 }
 0x502   :  { %639 = vrot.lane.b32.xlu1 %v637_v24, %s3287_s27 }
 0x503   :  { %2981 = vrcp.f32 %v633_v2 }
 0x510   :  { %v2982_v40 = vpop.eup %2981 }
 0x574   :  { %v640_v49 = vpop.permute.xlu1 %639 }
 0x575   :  { %v642_v38 = vadd.f32 %v640_v49, %v636_v46 }
 0x577   :  { %2983 = vtanh.f32 %v642_v38 }
 0x584   :  { %v2984_v28 = vpop.eup %2983 }
 0x585   :  { %v3729_v36 = vmul.f32 %v2984_v28, %v2982_v40 }
 0x587   :  { %646 = vrot.lane.b32.xlu0 %v3729_v36, %s3287_s27 }
 0x5f9   :  { %v647_v39 = vpop.permute.xlu0 %646 }
 0x5fa   :  { %649 = vst.msk [vmem:[#allocation2 + $0x10] sm:$0xff] %vm436_vm4, %v647_v39  ;;  %2785 = vmatmul.mubr.msk.f32.vlgmr.msra.gmra.mxu1 %vm329_vm1, %v647_v39 }
 0x5fb   :  { %885 = vmatpush1.msra.mxu1 %v3381_v8  ;;  %932 = vmatprep.mubr.f32.mxu1 %v3286_v1 }
 0x5fc   :  { %886 = vmatprep.subr.mxu1 %v3386_v9 }
 0x5fd   :  { %887 = vmatpush1.msra.mxu1 %v3392_v10 }
 0x5fe   :  { %888 = vmatprep.subr.mxu1 %v3397_v11 }
 0x5ff   :  { %889 = vmatpush1.msra.mxu1 %v3404_v12 }
 0x600   :  { %890 = vmatprep.subr.mxu1 %v3414_v14 }
 0x601   :  { %891 = vmatpush1.msra.mxu1 %v3420_v15 }
 0x602   :  { %892 = vmatprep.subr.mxu1 %v3427_v16 }
 0x603   :  { %893 = vmatpush1.msra.mxu1 %v3435_v17 }
 0x604   :  { %894 = vmatprep.subr.mxu1 %v3448_v20 }
 0x605   :  { %895 = vmatpush1.msra.mxu1 %v3454_v21 }
 0x606   :  { %896 = vmatprep.subr.mxu1 %v3461_v22 }
 0x607   :  { %897 = vmatpush1.msra.mxu1 %v3469_v23 }
 0x608   :  { %898 = vmatprep.subr.mxu1 %v3479_v25 }
 0x609   :  { %899 = vmatpush1.msra.mxu1 %v3485_v26 }
 0x60a   :  { %1096 = vmatprep.subr.mxu1 %v3375_v7 }
 0x6ba   :  { %v722_v37 = vpop.f32.mrf.mxu1 }
 0x6bb   :  { %v727_v55 = vadd.f32 %v722_v37, %v301_v63 }
 0x6bc   :  { %v724_v61 = vpop.f32.mrf.mxu1 }
 0x6bd   :  { %v2786_v58 = vmul.f32 -1.442695, %v727_v55  ;;  %v728_v32 = vadd.f32 %v724_v61, %v302_v4 }
 0x6bf   :  { %2985 = vpow2.f32 %v2786_v58  ;;  %v2787_v2 = vmul.f32 -1.442695, %v728_v32 }
 0x6c0   :  { %2987 = vtanh.f32 %v728_v32 }
 0x6cc   :  { %v2986_v41 = vpop.eup %2985 }
 0x6cd   :  { %v732_v24 = vadd.f32 1.0, %v2986_v41  ;;  %v2988_v7 = vpop.eup %2987 }
 0x6cf   :  { %2989 = vrcp.f32 %v732_v24 }
 0x6d0   :  { %2991 = vpow2.f32 %v2787_v2 }
 0x6dc   :  { %v2990_v34 = vpop.eup %2989 }
 0x6dd   :  { %v743_v18 = vmul.f32 %v2990_v34, %v2988_v7  ;;  %v2992_v63 = vpop.eup %2991  ;;  %v742_v49 = vmul.f32 %v2990_v34, %v642_v38 }
 0x6de   :  { %v739_v46 = vadd.f32 1.0, %v2992_v63 }
 0x6df   :  { %745 = vrot.lane.b32.xlu1 %v743_v18, %s3287_s27 }
 0x6e0   :  { %2993 = vrcp.f32 %v739_v46 }
 0x6ed   :  { %v2994_v39 = vpop.eup %2993 }
 0x751   :  { %v746_v40 = vpop.permute.xlu1 %745 }
 0x752   :  { %v748_v28 = vadd.f32 %v746_v40, %v742_v49 }
 0x754   :  { %2995 = vtanh.f32 %v748_v28 }
 0x761   :  { %v2996_v4 = vpop.eup %2995 }
 0x762   :  { %v3763_v37 = vmul.f32 %v2996_v4, %v2994_v39 }
 0x764   :  { %752 = vrot.lane.b32.xlu0 %v3763_v37, %s3287_s27 }
 0x7d6   :  { %v753_v55 = vpop.permute.xlu0 %752 }
 0x7d7   :  { %755 = vst.msk [vmem:[#allocation2 + $0x18] sm:$0xff] %vm436_vm4, %v753_v55  ;;  %2788 = vmatmul.mubr.msk.f32.vlgmr.msra.gmra.mxu0 %vm329_vm1, %v753_v55 }
 0x7d8   :  { %991 = vmatpush1.msra.mxu0 %v3381_v8  ;;  %1038 = vmatprep.mubr.f32.mxu0 %v3286_v1 }
 0x7d9   :  { %992 = vmatprep.subr.mxu0 %v3386_v9 }
 0x7da   :  { %993 = vmatpush1.msra.mxu0 %v3392_v10 }
 0x7db   :  { %994 = vmatprep.subr.mxu0 %v3397_v11 }
 0x7dc   :  { %995 = vmatpush1.msra.mxu0 %v3404_v12 }
 0x7dd   :  { %996 = vmatprep.subr.mxu0 %v3414_v14 }
 0x7de   :  { %997 = vmatpush1.msra.mxu0 %v3420_v15 }
 0x7df   :  { %998 = vmatprep.subr.mxu0 %v3427_v16 }
 0x7e0   :  { %999 = vmatpush1.msra.mxu0 %v3435_v17 }
 0x7e1   :  { %1000 = vmatprep.subr.mxu0 %v3448_v20 }
 0x7e2   :  { %1001 = vmatpush1.msra.mxu0 %v3454_v21 }
 0x7e3   :  { %1002 = vmatprep.subr.mxu0 %v3461_v22 }
 0x7e4   :  { %1003 = vmatpush1.msra.mxu0 %v3469_v23 }
 0x7e5   :  { %1004 = vmatprep.subr.mxu0 %v3479_v25 }
 0x7e6   :  { %1005 = vmatpush1.msra.mxu0 %v3485_v26 }
 0x897   :  { %v828_v38 = vpop.f32.mrf.mxu0 }
 0x898   :  { %v833_v58 = vadd.f32 %v828_v38, %v303_v0 }
 0x899   :  { %v830_v32 = vpop.f32.mrf.mxu0 }
 0x89a   :  { %v2789_v61 = vmul.f32 -1.442695, %v833_v58  ;;  %v834_v41 = vadd.f32 %v830_v32, %v304_v5 }
 0x89c   :  { %2997 = vpow2.f32 %v2789_v61  ;;  %v2790_v53 = vmul.f32 -1.442695, %v834_v41 }
 0x89d   :  { %2999 = vtanh.f32 %v834_v41 }
 0x8a9   :  { %v2998_v24 = vpop.eup %2997 }
 0x8aa   :  { %v838_v7 = vadd.f32 1.0, %v2998_v24  ;;  %v3000_v34 = vpop.eup %2999 }
 0x8ac   :  { %3001 = vrcp.f32 %v838_v7 }
 0x8ad   :  { %3003 = vpow2.f32 %v2790_v53 }
 0x8b9   :  { %v3002_v18 = vpop.eup %3001 }
 0x8ba   :  { %v849_v2 = vmul.f32 %v3002_v18, %v3000_v34  ;;  %v3004_v59 = vpop.eup %3003  ;;  %v848_v63 = vmul.f32 %v3002_v18, %v748_v28 }
 0x8bb   :  { %v845_v0 = vadd.f32 1.0, %v3004_v59  ;;  %v1197_v59 = vld [vmem:[#allocation9 + $0x28] sm:$0xff] }
 0x8bc   :  { %851 = vrot.lane.b32.xlu1 %v849_v2, %s3287_s27  ;;  %v1198_v2 = vld [vmem:[#allocation9 + $0x30] sm:$0xff] }
 0x8bd   :  { %3005 = vrcp.f32 %v845_v0  ;;  %v1196_v0 = vld [vmem:[#allocation9 + $0x20] sm:$0xff] }
 0x8ca   :  { %v3006_v56 = vpop.eup %3005 }
 0x92e   :  { %v852_v46 = vpop.permute.xlu1 %851 }
 0x92f   :  { %v854_v49 = vadd.f32 %v852_v46, %v848_v63  ;;  %v1195_v63 = vld [vmem:[#allocation9 + $0x18] sm:$0xff]  ;;  %v1194_v46 = vld [vmem:[#allocation9 + $0x10] sm:$0xff] }
 0x931   :  { %3007 = vtanh.f32 %v854_v49 }
 0x93e   :  { %v3008_v62 = vpop.eup %3007 }
 0x93f   :  { %v3796_v5 = vmul.f32 %v3008_v62, %v3006_v56  ;;  %v1192_v56 = vld [vmem:[#allocation9] sm:$0xff] }
 0x940   :  { %v1184_v62 = vld [vmem:[#allocation2] sm:$0xff] }
 0x941   :  { %858 = vrot.lane.b32.xlu0 %v3796_v5, %s3287_s27 }
 0x9b3   :  { %v859_v40 = vpop.permute.xlu0 %858 }
 0x9b4   :  { %861 = vst.msk [vmem:[#allocation2 + $0x20] sm:$0xff] %vm436_vm4, %v859_v40  ;;  %2791 = vmatmul.mubr.msk.f32.vlgmr.msra.gmra.mxu1 %vm329_vm1, %v859_v40  ;;  %v1185_v40 = vld [vmem:[#allocation2 + $0x8] sm:$0xff] }
 0x9b5   :  { %1097 = vmatpush1.msra.mxu1 %v3381_v8  ;;  %1144 = vmatprep.mubr.f32.mxu1 %v3286_v1 }
 0x9b6   :  { %1098 = vmatprep.subr.mxu1 %v3386_v9 }
 0x9b7   :  { %1099 = vmatpush1.msra.mxu1 %v3392_v10 }
 0x9b8   :  { %1100 = vmatprep.subr.mxu1 %v3397_v11 }
 0x9b9   :  { %1101 = vmatpush1.msra.mxu1 %v3404_v12 }
 0x9ba   :  { %1102 = vmatprep.subr.mxu1 %v3414_v14 }
 0x9bb   :  { %1103 = vmatpush1.msra.mxu1 %v3420_v15 }
 0x9bc   :  { %1104 = vmatprep.subr.mxu1 %v3427_v16 }
 0x9bd   :  { %1105 = vmatpush1.msra.mxu1 %v3435_v17 }
 0x9be   :  { %1106 = vmatprep.subr.mxu1 %v3448_v20 }
 0x9bf   :  { %1107 = vmatpush1.msra.mxu1 %v3454_v21 }
 0x9c0   :  { %1108 = vmatprep.subr.mxu1 %v3461_v22 }
 0x9c1   :  { %1109 = vmatpush1.msra.mxu1 %v3469_v23 }
 0x9c2   :  { %1110 = vmatprep.subr.mxu1 %v3479_v25 }
 0x9c3   :  { %1111 = vmatpush1.msra.mxu1 %v3485_v26 }
 0x9c4   :  { %1401 = vmatprep.subr.mxu1 %v1199_v42 }
 0xa74   :  { %v934_v8 = vpop.f32.mrf.mxu1 }
 0xa75   :  { %v939_v9 = vadd.f32 %v934_v8, %v305_v19  ;;  %v1186_v8 = vld [vmem:[#allocation2 + $0x10] sm:$0xff] }
 0xa76   :  { %v936_v11 = vpop.f32.mrf.mxu1 }
 0xa77   :  { %v2792_v10 = vmul.f32 -1.442695, %v939_v9  ;;  %v940_v12 = vadd.f32 %v936_v11, %v306_v29  ;;  %v1187_v9 = vld [vmem:[#allocation2 + $0x18] sm:$0xff] }
 0xa79   :  { %3009 = vpow2.f32 %v2792_v10  ;;  %v2793_v21 = vmul.f32 -1.442695, %v940_v12  ;;  %v1188_v10 = vld [vmem:[#allocation2 + $0x20] sm:$0xff] }
 0xa7a   :  { %3011 = vtanh.f32 %v940_v12 }
 0xa86   :  { %v3010_v14 = vpop.eup %3009 }
 0xa87   :  { %v944_v15 = vadd.f32 1.0, %v3010_v14  ;;  %v3012_v16 = vpop.eup %3011 }
 0xa89   :  { %3013 = vrcp.f32 %v944_v15 }
 0xa8a   :  { %3015 = vpow2.f32 %v2793_v21 }
 0xa96   :  { %v3014_v17 = vpop.eup %3013 }
 0xa97   :  { %v955_v20 = vmul.f32 %v3014_v17, %v3012_v16  ;;  %v3016_v22 = vpop.eup %3015  ;;  %v954_v25 = vmul.f32 %v3014_v17, %v854_v49  ;;  %v1193_v49 = vld [vmem:[#allocation9 + $0x8] sm:$0xff] }
 0xa98   :  { %v951_v23 = vadd.f32 1.0, %v3016_v22 }
 0xa99   :  { %957 = vrot.lane.b32.xlu1 %v955_v20, %s3287_s27  ;;  %v4459_v20 = vsel %vm3574_vm3, %v3640_v51, %v3646_v52 }
 0xa9a   :  { %3017 = vrcp.f32 %v951_v23 }
 0xaa7   :  { %v3018_v50 = vpop.eup %3017 }
 0xb0b   :  { %v958_v26 = vpop.permute.xlu1 %957 }
 0xb0c   :  { %v960_v47 = vadd.f32 %v958_v26, %v954_v25 }
 0xb0e   :  { %3019 = vtanh.f32 %v960_v47 }
 0xb1b   :  { %v3020_v3 = vpop.eup %3019 }
 0xb1c   :  { %v3829_v13 = vmul.f32 %v3020_v3, %v3018_v50 }
 0xb1e   :  { %964 = vrot.lane.b32.xlu0 %v3829_v13, %s3287_s27 }
 0xb90   :  { %v965_v19 = vpop.permute.xlu0 %964 }
 0xb91   :  { %967 = vst.msk [vmem:[#allocation2 + $0x28] sm:$0xff] %vm436_vm4, %v965_v19  ;;  %2794 = vmatmul.mubr.msk.f32.vlgmr.msra.gmra.mxu0 %vm329_vm1, %v965_v19  ;;  %v1214_v19 = vld [vmem:[#allocation9 + $0x70] sm:$0xff] }
 0xb92   :  { %1304 = vmatprep.mubr.f32.mxu0 %v3286_v1 }
 0xb98   :  { %v1189_v11 = vld [vmem:[#allocation2 + $0x28] sm:$0xff] }
 0xc51   :  { %v1040_v29 = vpop.f32.mrf.mxu0 }
 0xc52   :  { %v1045_v28 = vadd.f32 %v1040_v29, %v307_v35  ;;  %v1213_v29 = vld [vmem:[#allocation9 + $0x68] sm:$0xff] }
 0xc53   :  { %v1042_v4 = vpop.f32.mrf.mxu0 }
 0xc54   :  { %v2795_v39 = vmul.f32 -1.442695, %v1045_v28  ;;  %v1046_v55 = vadd.f32 %v1042_v4, %v308_v48  ;;  %v1209_v4 = vld [vmem:[#allocation9 + $0x48] sm:$0xff] }
 0xc56   :  { %3021 = vpow2.f32 %v2795_v39  ;;  %v2796_v27 = vmul.f32 -1.442695, %v1046_v55  ;;  %v1210_v39 = vld [vmem:[#allocation9 + $0x50] sm:$0xff] }
 0xc57   :  { %3023 = vtanh.f32 %v1046_v55  ;;  %v1208_v55 = vld [vmem:[#allocation9 + $0x40] sm:$0xff] }
 0xc63   :  { %v3022_v38 = vpop.eup %3021 }
 0xc64   :  { %v1050_v58 = vadd.f32 1.0, %v3022_v38  ;;  %v3024_v61 = vpop.eup %3023 }
 0xc66   :  { %3025 = vrcp.f32 %v1050_v58  ;;  %v3890_v58 = vld [vmem:[#allocation10 + $0x78] sm:$0xff] }
 0xc67   :  { %3027 = vpow2.f32 %v2796_v27 }
 0xc73   :  { %v3026_v32 = vpop.eup %3025 }
 0xc74   :  { %v1061_v41 = vmul.f32 %v3026_v32, %v3024_v61  ;;  %v3028_v35 = vpop.eup %3027  ;;  %v1060_v7 = vmul.f32 %v3026_v32, %v960_v47  ;;  %v3893_v32 = vld [vmem:[#allocation10 + $0x70] sm:$0xff] }
 0xc75   :  { %v1057_v24 = vadd.f32 1.0, %v3028_v35  ;;  %v3898_v35 = vld [vmem:[#allocation10 + $0x68] sm:$0xff] }
 0xc76   :  { %1063 = vrot.lane.b32.xlu1 %v1061_v41, %s3287_s27 }
 0xc77   :  { %3029 = vrcp.f32 %v1057_v24  ;;  %v3901_v24 = vld [vmem:[#allocation10 + $0x60] sm:$0xff] }
 0xc84   :  { %v3030_v45 = vpop.eup %3029 }
 0xce8   :  { %v1064_v34 = vpop.permute.xlu1 %1063 }
 0xce9   :  { %v3847_v18 = vadd.f32 %v1064_v34, %v1060_v7  ;;  %v3905_v7 = vld [vmem:[#allocation10 + $0x58] sm:$0xff]  ;;  %v3909_v34 = vld [vmem:[#allocation10 + $0x50] sm:$0xff] }
 0xceb   :  { %3031 = vtanh.f32 %v3847_v18 }
 0xcf8   :  { %v3032_v31 = vpop.eup %3031 }
 0xcf9   :  { %v1068_v48 = vmul.f32 %v3032_v31, %v3030_v45  ;;  %v3917_v45 = vld [vmem:[#allocation10 + $0x40] sm:$0xff]  ;;  %v3921_v31 = vld [vmem:[#allocation10 + $0x38] sm:$0xff] }
 0xcfb   :  { %1070 = vrot.lane.b32.xlu0 %v1068_v48, %s3287_s27 }
 0xd6d   :  { %v1071_v53 = vpop.permute.xlu0 %1070 }
 0xd6e   :  { %1073 = vst.msk [vmem:[#allocation2 + $0x30] sm:$0xff] %vm436_vm4, %v1071_v53  ;;  %2797 = vmatmul.mubr.msk.f32.vlgmr.msra.gmra.mxu1 %vm329_vm1, %v1071_v53  ;;  %v3938_v53 = vld [vmem:[#allocation10 + $0x10] sm:$0xff] }
 0xd6f   :  { %1402 = vmatpush1.msra.mxu1 %v1198_v2  ;;  %1441 = vmatprep.mubr.f32.mxu1 %v3286_v1  ;;  %v3936_v2 = vld [vmem:[#allocation10 + $0x18] sm:$0xff] }
 0xd70   :  { %1403 = vmatprep.subr.mxu1 %v1197_v59  ;;  %v3944_v59 = vld [vmem:[#allocation10] sm:$0xff] }
 0xd71   :  { %1404 = vmatpush1.msra.mxu1 %v1196_v0  ;;  %v2817_v0 = vld [vmem:[%s4449_s8 + $0x8] sm:$0xff] }
 0xd72   :  { %1405 = vmatprep.subr.mxu1 %v1195_v63 }
 0xd73   :  { %1406 = vmatpush1.msra.mxu1 %v1194_v46 }
 0xd74   :  { %1407 = vmatprep.subr.mxu1 %v1193_v49 }
 0xd75   :  { %1408 = vmatpush1.msra.mxu1 %v1192_v56  ;;  %v1190_v12 = vld [vmem:[#allocation2 + $0x30] sm:$0xff] }
 0xd76   :  { %2808 = vmatmul.mubr.msk.f32.vlgmr.msra.gmra.mxu1 %vm436_vm4, %v1184_v62  ;;  %1683 = vmatprep.subr.mxu1 %v3890_v58 }
 0xd77   :  { %1447 = vmatprep.mubr.f32.mxu1 %v3286_v1  ;;  %1684 = vmatpush1.msra.mxu1 %v3893_v32 }
 0xd78   :  { %1685 = vmatprep.subr.mxu1 %v3898_v35 }
 0xd79   :  { %1686 = vmatpush1.msra.mxu1 %v3901_v24 }
 0xd7a   :  { %2809 = vmatmul.mubr.msk.f32.gmra.mxu1 %vm436_vm4, %v1185_v40  ;;  %1687 = vmatprep.subr.mxu1 %v3905_v7 }
 0xd7b   :  { %1453 = vmatprep.mubr.f32.mxu1 %v3286_v1  ;;  %1688 = vmatpush1.msra.mxu1 %v3909_v34 }
 0xd7e   :  { %2810 = vmatmul.mubr.msk.f32.gmra.mxu1 %vm436_vm4, %v1186_v8 }
 0xd7f   :  { %1459 = vmatprep.mubr.f32.mxu1 %v3286_v1 }
 0xd82   :  { %2811 = vmatmul.mubr.msk.f32.gmra.mxu1 %vm436_vm4, %v1187_v9 }
 0xd83   :  { %1465 = vmatprep.mubr.f32.mxu1 %v3286_v1 }
 0xd86   :  { %2812 = vmatmul.mubr.msk.f32.gmra.mxu1 %vm436_vm4, %v1188_v10 }
 0xd87   :  { %1471 = vmatprep.mubr.f32.mxu1 %v3286_v1 }
 0xd8a   :  { %2813 = vmatmul.mubr.msk.f32.gmra.mxu1 %vm436_vm4, %v1189_v11 }
 0xd8b   :  { %1477 = vmatprep.mubr.f32.mxu1 %v3286_v1 }
 0xd8e   :  { %2814 = vmatmul.mubr.msk.f32.gmra.mxu1 %vm436_vm4, %v1190_v12 }
 0xd8f   :  { %1483 = vmatprep.mubr.f32.mxu1 %v3286_v1 }
 0xe2e   :  { %v1146_v14 = vpop.f32.mrf.mxu1 }
 0xe2f   :  { %v1151_v15 = vadd.f32 %v1146_v14, %v309_v54 }
 0xe30   :  { %v1148_v17 = vpop.f32.mrf.mxu1 }
 0xe31   :  { %v2798_v16 = vmul.f32 -1.442695, %v1151_v15  ;;  %v1152_v21 = vadd.f32 %v1148_v17, %v4459_v20  ;;  %v2816_v17 = vld [vmem:[%s4448_s7 + $0x8] sm:$0xff] }
 0xe33   :  { %3033 = vpow2.f32 %v2798_v16  ;;  %v2799_v43 = vmul.f32 -1.442695, %v1152_v21 }
 0xe34   :  { %3035 = vtanh.f32 %v1152_v21 }
 0xe36   :  { %v1443_v20 = vpop.f32.mrf.mxu1 }
 0xe38   :  { %v4013_v21 = vpop.f32.mrf.mxu1 }
 0xe40   :  { %v3034_v22 = vpop.eup %3033 }
 0xe41   :  { %v1156_v23 = vadd.f32 1.0, %v3034_v22  ;;  %v3036_v25 = vpop.eup %3035  ;;  %v1449_v22 = vpop.f32.mrf.mxu1 }
 0xe43   :  { %3037 = vrcp.f32 %v1156_v23  ;;  %v1451_v23 = vpop.f32.mrf.mxu1 }
 0xe44   :  { %3039 = vpow2.f32 %v2799_v43 }
 0xe50   :  { %v3038_v26 = vpop.eup %3037 }
 0xe51   :  { %v1167_v47 = vmul.f32 %v3038_v26, %v3036_v25  ;;  %v3040_v44 = vpop.eup %3039  ;;  %v1166_v52 = vmul.f32 %v3038_v26, %v3847_v18  ;;  %v3913_v18 = vld [vmem:[#allocation10 + $0x48] sm:$0xff]  ;;  %v1455_v25 = vpop.f32.mrf.mxu1 }
 0xe52   :  { %v1163_v51 = vadd.f32 1.0, %v3040_v44  ;;  %1689 = vmatprep.subr.mxu1 %v3913_v18 }
 0xe53   :  { %1169 = vrot.lane.b32.xlu1 %v1167_v47, %s3287_s27  ;;  %1690 = vmatpush1.msra.mxu1 %v3917_v45  ;;  %v1457_v26 = vpop.f32.mrf.mxu1 }
 0xe54   :  { %3041 = vrcp.f32 %v1163_v51  ;;  %1691 = vmatprep.subr.mxu1 %v3921_v31  ;;  %v1490_v51 = vld [vmem:[#allocation12] sm:$0x3] }
 0xe55   :  { %v1461_v47 = vpop.f32.mrf.mxu1 }
 0xe57   :  { %1074 = vrot.lane.b32.xlu1 %v1068_v48, %s3288_s0  ;;  %v3929_v48 = vld [vmem:[#allocation10 + $0x28] sm:$0xff]  ;;  %v1463_v43 = vpop.f32.mrf.mxu1 }
 0xe5b   :  { %862 = vrot.lane.b32.xlu1 %v3796_v5, %s3288_s0  ;;  %v1215_v5 = vld [vmem:[#allocation9 + $0x78] sm:$0xff] }
 0xe5c   :  { %1264 = vmatprep.subr.mxu0 %v1215_v5 }
 0xe5d   :  { %1265 = vmatpush1.msra.mxu0 %v1214_v19 }
 0xe5e   :  { %1266 = vmatprep.subr.mxu0 %v1213_v29 }
 0xe5f   :  { %650 = vrot.lane.b32.xlu1 %v3729_v36, %s3288_s0  ;;  %v1212_v36 = vld [vmem:[#allocation9 + $0x60] sm:$0xff] }
 0xe60   :  { %1267 = vmatpush1.msra.mxu0 %v1212_v36  ;;  %v4461_v36 = vsub.s32 1, %v3548_v33 }
 0xe61   :  { %v3042_v61 = vpop.eup %3041 }
 0xe63   :  { %438 = vrot.lane.b32.xlu1 %v3661_v6, %s3288_s0  ;;  %v1211_v6 = vld [vmem:[#allocation9 + $0x58] sm:$0xff] }
 0xe64   :  { %1268 = vmatprep.subr.mxu0 %v1211_v6 }
 0xe65   :  { %1269 = vmatpush1.msra.mxu0 %v1210_v39 }
 0xe66   :  { %1270 = vmatprep.subr.mxu0 %v1209_v4 }
 0xe67   :  { %1271 = vmatpush1.msra.mxu0 %v1208_v55  ;;  %1644 = vrot.lane.b32.xlu1 %v2817_v0, %s3287_s27 }
 0xe68   :  { %1573 = vmatprep.subr.mxu0 %v3890_v58 }
 0xec5   :  { %v1170_v54 = vpop.permute.xlu1 %1169 }
 0xec6   :  { %v1172_v50 = vadd.f32 %v1170_v54, %v1166_v52  ;;  %v1467_v54 = vpop.f32.mrf.mxu1 }
 0xec8   :  { %3043 = vtanh.f32 %v1172_v50  ;;  %v1469_v4 = vpop.f32.mrf.mxu1 }
 0xec9   :  { %v1075_v3 = vpop.permute.xlu1 %1074 }
 0xeca   :  { %1077 = vst.msk [vmem:[#allocation3 + $0x8] sm:$0xff] %vm436_vm4, %v1075_v3  ;;  %v4460_v3 = vsub.s32 0, %v3548_v33  ;;  %v1473_v0 = vpop.f32.mrf.mxu1 }
 0xecc   :  { %v1495_v5 = vrot.slane %v1490_v51, %v4460_v3 }
 0xecd   :  { %v863_v28 = vpop.permute.xlu1 %862 }
 0xece   :  { %865 = vst.msk [vmem:[#allocation3 + $0x18] sm:$0xff] %vm436_vm4, %v863_v28  ;;  %v4019_v28 = vrot.slane %v1490_v51, %v4461_v36 }
 0xed1   :  { %v651_v38 = vpop.permute.xlu1 %650  ;;  %v1201_v40 = vld [vmem:[#allocation3 + $0x8] sm:$0xff] }
 0xed2   :  { %653 = vst.msk [vmem:[#allocation3 + $0x28] sm:$0xff] %vm436_vm4, %v651_v38 }
 0xed5   :  { %v3044_v41 = vpop.eup %3043  ;;  %v439_v42 = vpop.permute.xlu1 %438  ;;  %v1203_v10 = vld [vmem:[#allocation3 + $0x18] sm:$0xff] }
 0xed6   :  { %441 = vst.msk [vmem:[#allocation3 + $0x38] sm:$0xff] %vm436_vm4, %v439_v42  ;;  %v1174_v27 = vmul.f32 %v3044_v41, %v3042_v61 }
 0xed8   :  { %1180 = vrot.lane.b32.xlu0 %v1174_v27, %s3288_s0 }
 0xed9   :  { %v1205_v14 = vld [vmem:[#allocation3 + $0x28] sm:$0xff] }
 0xedc   :  { %968 = vrot.lane.b32.xlu0 %v3829_v13, %s3288_s0  ;;  %v3925_v13 = vld [vmem:[#allocation10 + $0x30] sm:$0xff] }
 0xedd   :  { %1692 = vmatpush1.msra.mxu1 %v3925_v13  ;;  %v1207_v16 = vld [vmem:[#allocation3 + $0x38] sm:$0xff] }
 0xede   :  { %1693 = vmatprep.subr.mxu1 %v3929_v48 }
 0xee0   :  { %756 = vrot.lane.b32.xlu0 %v3763_v37, %s3288_s0  ;;  %v3932_v37 = vld [vmem:[#allocation10 + $0x20] sm:$0xff] }
 0xee1   :  { %1694 = vmatpush1.msra.mxu1 %v3932_v37 }
 0xee2   :  { %1695 = vmatprep.subr.mxu1 %v3936_v2 }
 0xee3   :  { %1696 = vmatpush1.msra.mxu1 %v3938_v53 }
 0xee4   :  { %544 = vrot.lane.b32.xlu0 %v3695_v30, %s3288_s0  ;;  %v3942_v30 = vld [vmem:[#allocation10 + $0x8] sm:$0xff] }
 0xee5   :  { %1697 = vmatprep.subr.mxu1 %v3942_v30 }
 0xee6   :  { %1698 = vmatpush1.msra.mxu1 %v3944_v59 }
 0xee7   :  { %1895 = vmatprep.subr.mxu1 %v3890_v58 }
 0xee8   :  { %1176 = vrot.lane.b32.xlu0 %v1174_v27, %s3287_s27 }
 0xf4a   :  { %v1181_v63 = vpop.permute.xlu0 %1180 }
 0xf4b   :  { %1183 = vst.msk [vmem:[#allocation3] sm:$0xff] %vm436_vm4, %v1181_v63 }
 0xf4e   :  { %v969_v46 = vpop.permute.xlu0 %968 }
 0xf4f   :  { %971 = vst.msk [vmem:[#allocation3 + $0x10] sm:$0xff] %vm436_vm4, %v969_v46 }
 0xf52   :  { %v757_v49 = vpop.permute.xlu0 %756  ;;  %v1200_v56 = vld [vmem:[#allocation3] sm:$0xff] }
 0xf53   :  { %759 = vst.msk [vmem:[#allocation3 + $0x20] sm:$0xff] %vm436_vm4, %v757_v49  ;;  %2800 = vmatmul.mubr.msk.f32.vlgmr.msra.gmra.mxu0 %vm436_vm4, %v1200_v56 }
 0xf54   :  { %1574 = vmatpush1.msra.mxu0 %v3893_v32  ;;  %1310 = vmatprep.mubr.f32.mxu0 %v3286_v1 }
 0xf55   :  { %1575 = vmatprep.subr.mxu0 %v3898_v35 }
 0xf56   :  { %v545_v62 = vpop.permute.xlu0 %544  ;;  %1576 = vmatpush1.msra.mxu0 %v3901_v24  ;;  %v1202_v9 = vld [vmem:[#allocation3 + $0x10] sm:$0xff] }
 0xf57   :  { %547 = vst.msk [vmem:[#allocation3 + $0x30] sm:$0xff] %vm436_vm4, %v545_v62  ;;  %2801 = vmatmul.mubr.msk.f32.gmra.mxu0 %vm436_vm4, %v1201_v40  ;;  %1577 = vmatprep.subr.mxu0 %v3905_v7  ;;  %v1475_v40 = vpop.f32.mrf.mxu1 }
 0xf58   :  { %1316 = vmatprep.mubr.f32.mxu0 %v3286_v1  ;;  %1578 = vmatpush1.msra.mxu0 %v3909_v34 }
 0xf59   :  { %1579 = vmatprep.subr.mxu0 %v3913_v18 }
 0xf5a   :  { %v1177_v8 = vpop.permute.xlu0 %1176  ;;  %1580 = vmatpush1.msra.mxu0 %v3917_v45  ;;  %v1204_v11 = vld [vmem:[#allocation3 + $0x20] sm:$0xff] }
 0xf5b   :  { %1179 = vst.msk [vmem:[#allocation2 + $0x38] sm:$0xff] %vm436_vm4, %v1177_v8  ;;  %2802 = vmatmul.mubr.msk.f32.gmra.mxu0 %vm436_vm4, %v1202_v9  ;;  %1581 = vmatprep.subr.mxu0 %v3921_v31 }
 0xf5c   :  { %1322 = vmatprep.mubr.f32.mxu0 %v3286_v1  ;;  %1582 = vmatpush1.msra.mxu0 %v3925_v13 }
 0xf5d   :  { %1583 = vmatprep.subr.mxu0 %v3929_v48 }
 0xf5e   :  { %1584 = vmatpush1.msra.mxu0 %v3932_v37  ;;  %v1206_v15 = vld [vmem:[#allocation3 + $0x30] sm:$0xff] }
 0xf5f   :  { %2803 = vmatmul.mubr.msk.f32.gmra.mxu0 %vm436_vm4, %v1203_v10  ;;  %1585 = vmatprep.subr.mxu0 %v3936_v2 }
 0xf60   :  { %1328 = vmatprep.mubr.f32.mxu0 %v3286_v1  ;;  %1586 = vmatpush1.msra.mxu0 %v3938_v53 }
 0xf61   :  { %1587 = vmatprep.subr.mxu0 %v3942_v30 }
 0xf62   :  { %v1191_v12 = vld [vmem:[#allocation2 + $0x38] sm:$0xff]  ;;  %1588 = vmatpush1.msra.mxu0 %v3944_v59 }
 0xf63   :  { %2804 = vmatmul.mubr.msk.f32.gmra.mxu0 %vm436_vm4, %v1204_v11  ;;  %2815 = vmatmul.mubr.msk.f32.gmra.mxu1 %vm436_vm4, %v1191_v12 }
 0xf64   :  { %1334 = vmatprep.mubr.f32.mxu0 %v3286_v1  ;;  %1731 = vmatprep.mubr.f32.mxu1 %v3286_v1 }
 0xf65   :  { %1789 = vmatprep.subr.mxu0 %v3890_v58 }
 0xf67   :  { %2805 = vmatmul.mubr.msk.f32.gmra.mxu0 %vm436_vm4, %v1205_v14 }
 0xf68   :  { %1340 = vmatprep.mubr.f32.mxu0 %v3286_v1 }
 0xf6b   :  { %2806 = vmatmul.mubr.msk.f32.gmra.mxu0 %vm436_vm4, %v1206_v15  ;;  %v1479_v15 = vpop.f32.mrf.mxu1 }
 0xf6c   :  { %1346 = vmatprep.mubr.f32.mxu0 %v3286_v1 }
 0xf6f   :  { %2807 = vmatmul.mubr.msk.f32.gmra.mxu0 %vm436_vm4, %v1207_v16 }
 0xf70   :  { %1621 = vmatprep.mubr.f32.mxu0 %v3286_v1 }
 0xf73   :  { %2818 = vmatmul.mubr.msk.f32.vlgmr.msra.gmra.mxu0 %vm329_vm1, %v2816_v17 }
 0xf74   :  { %1790 = vmatpush1.msra.mxu0 %v3893_v32  ;;  %1837 = vmatprep.mubr.f32.mxu0 %v3286_v1 }
 0xf75   :  { %1791 = vmatprep.subr.mxu0 %v3898_v35 }
 0xf76   :  { %1792 = vmatpush1.msra.mxu0 %v3901_v24 }
 0xf77   :  { %1793 = vmatprep.subr.mxu0 %v3905_v7 }
 0xf78   :  { %1794 = vmatpush1.msra.mxu0 %v3909_v34 }
 0xf79   :  { %1795 = vmatprep.subr.mxu0 %v3913_v18 }
 0xf7a   :  { %1796 = vmatpush1.msra.mxu0 %v3917_v45 }
 0xf7b   :  { %1797 = vmatprep.subr.mxu0 %v3921_v31 }
 0xf7c   :  { %1798 = vmatpush1.msra.mxu0 %v3925_v13 }
 0xf7d   :  { %1799 = vmatprep.subr.mxu0 %v3929_v48 }
 0xf7e   :  { %1800 = vmatpush1.msra.mxu0 %v3932_v37 }
 0xf7f   :  { %1801 = vmatprep.subr.mxu0 %v3936_v2 }
 0xf80   :  { %1802 = vmatpush1.msra.mxu0 %v3938_v53 }
 0xf81   :  { %1803 = vmatprep.subr.mxu0 %v3942_v30 }
 0xf82   :  { %1804 = vmatpush1.msra.mxu0 %v3944_v59 }
 0xf83   :  { %2001 = vmatprep.subr.mxu0 %v3890_v58 }
0x1013   :  { %v1306_v44 = vpop.f32.mrf.mxu0 }
0x1015   :  { %v1308_v52 = vpop.f32.mrf.mxu0 }
0x1017   :  { %v1312_v50 = vpop.f32.mrf.mxu0 }
0x1018   :  { %v1450_v19 = vadd.f32 %v1449_v22, %v1312_v50  ;;  %v1481_v50 = vpop.f32.mrf.mxu1 }
0x1019   :  { %v1314_v29 = vpop.f32.mrf.mxu0 }
0x101a   :  { %v4021_v6 = vadd.f32 %v1495_v5, %v1450_v19  ;;  %v1452_v39 = vadd.f32 %v1451_v23, %v1314_v29 }
0x101b   :  { %v1318_v55 = vpop.f32.mrf.mxu0 }
0x101c   :  { %v4024_v38 = vadd.f32 %v4019_v28, %v1452_v39  ;;  %v1456_v61 = vadd.f32 %v1455_v25, %v1318_v55 }
0x101d   :  { %v1320_v41 = vpop.f32.mrf.mxu0 }
0x101e   :  { %v4026_v42 = vadd.f32 %v1495_v5, %v1456_v61  ;;  %v1458_v27 = vadd.f32 %v1457_v26, %v1320_v41 }
0x101f   :  { %v1324_v63 = vpop.f32.mrf.mxu0 }
0x1020   :  { %v4029_v46 = vadd.f32 %v4019_v28, %v1458_v27  ;;  %v1462_v33 = vadd.f32 %v1461_v47, %v1324_v63 }
0x1021   :  { %v1326_v49 = vpop.f32.mrf.mxu0 }
0x1022   :  { %v4031_v56 = vadd.f32 %v1495_v5, %v1462_v33  ;;  %v1464_v62 = vadd.f32 %v1463_v43, %v1326_v49  ;;  %v1446_v33 = vadd.f32 %v4013_v21, %v1308_v52 }
0x1023   :  { %v1330_v8 = vpop.f32.mrf.mxu0  ;;  %v1485_v55 = vpop.f32.mrf.mxu1 }
0x1024   :  { %v4034_v9 = vadd.f32 %v4019_v28, %v1464_v62  ;;  %v1468_v10 = vadd.f32 %v1467_v54, %v1330_v8 }
0x1025   :  { %v1332_v11 = vpop.f32.mrf.mxu0 }
0x1026   :  { %v4036_v12 = vadd.f32 %v1495_v5, %v1468_v10  ;;  %v1470_v14 = vadd.f32 %v1469_v4, %v1332_v11  ;;  %v1444_v4 = vadd.f32 %v1443_v20, %v1306_v44  ;;  %v1487_v10 = vpop.f32.mrf.mxu1 }
0x1027   :  { %v1336_v16 = vpop.f32.mrf.mxu0 }
0x1028   :  { %v4039_v17 = vadd.f32 %v4019_v28, %v1470_v14  ;;  %v1474_v22 = vadd.f32 %v1473_v0, %v1336_v16  ;;  %v1524_v23 = vsel %vm3568_vm2, %v4036_v12, %v4031_v56  ;;  %v1526_v25 = vsel %vm3568_vm2, %v4031_v56, %v4036_v12 }
0x1029   :  { %v1338_v26 = vpop.f32.mrf.mxu0  ;;  %v4092_v8 = vadd.f32 %v1495_v5, %v1444_v4 }
0x102a   :  { %v4049_v47 = vadd.f32 %v1495_v5, %v1474_v22  ;;  %v1476_v43 = vadd.f32 %v1475_v40, %v1338_v26  ;;  %v1525_v51 = vsel %vm3574_vm3, %v4039_v17, %v4034_v9  ;;  %v1527_v54 = vsel %vm3574_vm3, %v4034_v9, %v4039_v17 }
0x102b   :  { %v1342_v3 = vpop.f32.mrf.mxu0  ;;  %v4105_v22 = vadd.f32 %v4019_v28, %v1446_v33 }
0x102c   :  { %v4060_v19 = vadd.f32 %v4019_v28, %v1476_v43  ;;  %v1480_v29 = vadd.f32 %v1479_v15, %v1342_v3  ;;  %v1522_v36 = vsel %vm3568_vm2, %v4049_v47, %v4026_v42  ;;  %v1528_v39 = vsel %vm3568_vm2, %v4026_v42, %v4049_v47 }
0x102d   :  { %v1344_v61 = vpop.f32.mrf.mxu0 }
0x102e   :  { %v4070_v41 = vadd.f32 %v1495_v5, %v1480_v29  ;;  %v1482_v27 = vadd.f32 %v1481_v50, %v1344_v61  ;;  %v1523_v0 = vsel %vm3574_vm3, %v4060_v19, %v4029_v46  ;;  %v1529_v63 = vsel %vm3574_vm3, %v4029_v46, %v4060_v19 }
0x102f   :  { %v1348_v49 = vpop.f32.mrf.mxu0 }
0x1030   :  { %v4082_v20 = vadd.f32 %v4019_v28, %v1482_v27  ;;  %v1486_v44 = vadd.f32 %v1485_v55, %v1348_v49  ;;  %v1520_v62 = vsel %vm3568_vm2, %v4070_v41, %v4021_v6  ;;  %v1530_v40 = vsel %vm3568_vm2, %v4021_v6, %v4070_v41  ;;  %v4310_v6 = vld [vmem:[%s4450_s9 + $0x18] sm:$0xff] }
0x1031   :  { %v1350_v11 = vpop.f32.mrf.mxu0 }
0x1032   :  { %v4094_v21 = vadd.f32 %v1495_v5, %v1486_v44  ;;  %v1488_v52 = vadd.f32 %v1487_v10, %v1350_v11  ;;  %v1521_v14 = vsel %vm3574_vm3, %v4082_v20, %v4024_v38  ;;  %v1531_v15 = vsel %vm3574_vm3, %v4024_v38, %v4082_v20 }
0x1033   :  { %v1623_v16 = vpop.f32.mrf.mxu0 }
0x1034   :  { %v4108_v26 = vadd.f32 %v4019_v28, %v1488_v52  ;;  %v1518_v5 = vsel %vm3568_vm2, %v4094_v21, %v4092_v8  ;;  %v1645_v52 = vpop.permute.xlu1 %1644 }
0x1035   :  { %v1628_v50 = vadd.f32 %v1623_v16, %v1518_v5  ;;  %v1625_v4 = vpop.f32.mrf.mxu0 }
0x1036   :  { %v1519_v28 = vsel %vm3574_vm3, %v4108_v26, %v4105_v22 }
0x1037   :  { %v2819_v29 = vmul.f32 -1.442695, %v1628_v50  ;;  %v1629_v55 = vadd.f32 %v1625_v4, %v1519_v28 }
0x1039   :  { %3045 = vpow2.f32 %v2819_v29  ;;  %v2820_v10 = vmul.f32 -1.442695, %v1629_v55 }
0x103a   :  { %3047 = vtanh.f32 %v1629_v55 }
0x1046   :  { %v3046_v61 = vpop.eup %3045 }
0x1047   :  { %v1633_v27 = vadd.f32 1.0, %v3046_v61  ;;  %v3048_v33 = vpop.eup %3047 }
0x1049   :  { %3049 = vrcp.f32 %v1633_v27 }
0x104a   :  { %3051 = vpow2.f32 %v2820_v10 }
0x1056   :  { %v3050_v49 = vpop.eup %3049 }
0x1057   :  { %v1648_v44 = vmul.f32 %v3050_v49, %v3048_v33  ;;  %v3052_v11 = vpop.eup %3051  ;;  %v1647_v5 = vmul.f32 %v3050_v49, %v1645_v52 }
0x1058   :  { %v1640_v16 = vadd.f32 1.0, %v3052_v11 }
0x1059   :  { %1650 = vrot.lane.b32.xlu0 %v1648_v44, %s3287_s27 }
0x105a   :  { %3053 = vrcp.f32 %v1640_v16 }
0x1067   :  { %v3054_v28 = vpop.eup %3053 }
0x10cb   :  { %v1651_v50 = vpop.permute.xlu0 %1650 }
0x10cc   :  { %v1653_v29 = vadd.f32 %v1651_v50, %v1647_v5 }
0x10ce   :  { %3055 = vtanh.f32 %v1653_v29 }
0x10db   :  { %v3056_v4 = vpop.eup %3055 }
0x10dc   :  { %v4127_v61 = vmul.f32 %v3056_v4, %v3054_v28 }
0x10de   :  { %1657 = vrot.lane.b32.xlu1 %v4127_v61, %s3287_s27 }
0x1150   :  { %v1658_v27 = vpop.permute.xlu1 %1657 }
0x1151   :  { %1660 = vst.msk [vmem:[#allocation2] sm:$0xff] %vm436_vm4, %v1658_v27  ;;  %2821 = vmatmul.mubr.msk.f32.vlgmr.msra.gmra.mxu1 %vm329_vm1, %v1658_v27 }
0x1152   :  { %1896 = vmatpush1.msra.mxu1 %v3893_v32  ;;  %1943 = vmatprep.mubr.f32.mxu1 %v3286_v1 }
0x1153   :  { %1897 = vmatprep.subr.mxu1 %v3898_v35 }
0x1154   :  { %1898 = vmatpush1.msra.mxu1 %v3901_v24 }
0x1155   :  { %1899 = vmatprep.subr.mxu1 %v3905_v7 }
0x1156   :  { %1900 = vmatpush1.msra.mxu1 %v3909_v34 }
0x1157   :  { %1901 = vmatprep.subr.mxu1 %v3913_v18 }
0x1158   :  { %1902 = vmatpush1.msra.mxu1 %v3917_v45 }
0x1159   :  { %1903 = vmatprep.subr.mxu1 %v3921_v31 }
0x115a   :  { %1904 = vmatpush1.msra.mxu1 %v3925_v13 }
0x115b   :  { %1905 = vmatprep.subr.mxu1 %v3929_v48 }
0x115c   :  { %1906 = vmatpush1.msra.mxu1 %v3932_v37 }
0x115d   :  { %1907 = vmatprep.subr.mxu1 %v3936_v2 }
0x115e   :  { %1908 = vmatpush1.msra.mxu1 %v3938_v53 }
0x115f   :  { %1909 = vmatprep.subr.mxu1 %v3942_v30 }
0x1160   :  { %1910 = vmatpush1.msra.mxu1 %v3944_v59 }
0x1161   :  { %2107 = vmatprep.subr.mxu1 %v3890_v58 }
0x1211   :  { %v1733_v55 = vpop.f32.mrf.mxu1 }
0x1212   :  { %v1738_v33 = vadd.f32 %v1733_v55, %v1520_v62 }
0x1213   :  { %v1735_v44 = vpop.f32.mrf.mxu1 }
0x1214   :  { %v2822_v49 = vmul.f32 -1.442695, %v1738_v33  ;;  %v1739_v10 = vadd.f32 %v1735_v44, %v1521_v14 }
0x1216   :  { %3057 = vpow2.f32 %v2822_v49  ;;  %v2823_v28 = vmul.f32 -1.442695, %v1739_v10 }
0x1217   :  { %3059 = vtanh.f32 %v1739_v10 }
0x1223   :  { %v3058_v11 = vpop.eup %3057 }
0x1224   :  { %v1743_v52 = vadd.f32 1.0, %v3058_v11  ;;  %v3060_v16 = vpop.eup %3059 }
0x1226   :  { %3061 = vrcp.f32 %v1743_v52 }
0x1227   :  { %3063 = vpow2.f32 %v2823_v28 }
0x1233   :  { %v3062_v5 = vpop.eup %3061 }
0x1234   :  { %v1754_v50 = vmul.f32 %v3062_v5, %v3060_v16  ;;  %v3064_v4 = vpop.eup %3063  ;;  %v1753_v3 = vmul.f32 %v3062_v5, %v1653_v29 }
0x1235   :  { %v1750_v27 = vadd.f32 1.0, %v3064_v4 }
0x1236   :  { %1756 = vrot.lane.b32.xlu0 %v1754_v50, %s3287_s27 }
0x1237   :  { %3065 = vrcp.f32 %v1750_v27 }
0x1244   :  { %v3066_v55 = vpop.eup %3065 }
0x12a8   :  { %v1757_v43 = vpop.permute.xlu0 %1756 }
0x12a9   :  { %v1759_v62 = vadd.f32 %v1757_v43, %v1753_v3 }
0x12ab   :  { %3067 = vtanh.f32 %v1759_v62 }
0x12b8   :  { %v3068_v14 = vpop.eup %3067 }
0x12b9   :  { %v4156_v33 = vmul.f32 %v3068_v14, %v3066_v55 }
0x12bb   :  { %1763 = vrot.lane.b32.xlu1 %v4156_v33, %s3287_s27 }
0x132d   :  { %v1764_v49 = vpop.permute.xlu1 %1763 }
0x132e   :  { %1766 = vst.msk [vmem:[#allocation2 + $0x8] sm:$0xff] %vm436_vm4, %v1764_v49  ;;  %2824 = vmatmul.mubr.msk.f32.vlgmr.msra.gmra.mxu0 %vm329_vm1, %v1764_v49 }
0x132f   :  { %2002 = vmatpush1.msra.mxu0 %v3893_v32  ;;  %2049 = vmatprep.mubr.f32.mxu0 %v3286_v1 }
0x1330   :  { %2003 = vmatprep.subr.mxu0 %v3898_v35 }
0x1331   :  { %2004 = vmatpush1.msra.mxu0 %v3901_v24 }
0x1332   :  { %2005 = vmatprep.subr.mxu0 %v3905_v7 }
0x1333   :  { %2006 = vmatpush1.msra.mxu0 %v3909_v34 }
0x1334   :  { %2007 = vmatprep.subr.mxu0 %v3913_v18 }
0x1335   :  { %2008 = vmatpush1.msra.mxu0 %v3917_v45 }
0x1336   :  { %2009 = vmatprep.subr.mxu0 %v3921_v31 }
0x1337   :  { %2010 = vmatpush1.msra.mxu0 %v3925_v13 }
0x1338   :  { %2011 = vmatprep.subr.mxu0 %v3929_v48 }
0x1339   :  { %2012 = vmatpush1.msra.mxu0 %v3932_v37 }
0x133a   :  { %2013 = vmatprep.subr.mxu0 %v3936_v2 }
0x133b   :  { %2014 = vmatpush1.msra.mxu0 %v3938_v53 }
0x133c   :  { %2015 = vmatprep.subr.mxu0 %v3942_v30 }
0x133d   :  { %2016 = vmatpush1.msra.mxu0 %v3944_v59 }
0x133e   :  { %2213 = vmatprep.subr.mxu0 %v3890_v58 }
0x13ee   :  { %v1839_v43 = vpop.f32.mrf.mxu0 }
0x13ef   :  { %v1844_v3 = vadd.f32 %v1839_v43, %v1522_v36 }
0x13f0   :  { %v1841_v44 = vpop.f32.mrf.mxu0 }
0x13f1   :  { %v2825_v29 = vmul.f32 -1.442695, %v1844_v3  ;;  %v1845_v10 = vadd.f32 %v1841_v44, %v1523_v0 }
0x13f3   :  { %3069 = vpow2.f32 %v2825_v29  ;;  %v2826_v28 = vmul.f32 -1.442695, %v1845_v10 }
0x13f4   :  { %3071 = vtanh.f32 %v1845_v10 }
0x1400   :  { %v3070_v11 = vpop.eup %3069 }
0x1401   :  { %v1849_v52 = vadd.f32 1.0, %v3070_v11  ;;  %v3072_v16 = vpop.eup %3071 }
0x1403   :  { %3073 = vrcp.f32 %v1849_v52 }
0x1404   :  { %3075 = vpow2.f32 %v2826_v28 }
0x1410   :  { %v3074_v5 = vpop.eup %3073 }
0x1411   :  { %v1860_v50 = vmul.f32 %v3074_v5, %v3072_v16  ;;  %v3076_v36 = vpop.eup %3075  ;;  %v1859_v27 = vmul.f32 %v3074_v5, %v1759_v62 }
0x1412   :  { %v1856_v4 = vadd.f32 1.0, %v3076_v36 }
0x1413   :  { %1862 = vrot.lane.b32.xlu0 %v1860_v50, %s3287_s27 }
0x1414   :  { %3077 = vrcp.f32 %v1856_v4 }
0x1421   :  { %v3078_v49 = vpop.eup %3077 }
0x1485   :  { %v1863_v55 = vpop.permute.xlu0 %1862 }
0x1486   :  { %v1865_v14 = vadd.f32 %v1863_v55, %v1859_v27 }
0x1488   :  { %3079 = vtanh.f32 %v1865_v14 }
0x1495   :  { %v3080_v0 = vpop.eup %3079 }
0x1496   :  { %v4190_v43 = vmul.f32 %v3080_v0, %v3078_v49 }
0x1498   :  { %1869 = vrot.lane.b32.xlu1 %v4190_v43, %s3287_s27 }
0x150a   :  { %v1870_v3 = vpop.permute.xlu1 %1869 }
0x150b   :  { %1872 = vst.msk [vmem:[#allocation2 + $0x10] sm:$0xff] %vm436_vm4, %v1870_v3  ;;  %2827 = vmatmul.mubr.msk.f32.vlgmr.msra.gmra.mxu1 %vm329_vm1, %v1870_v3 }
0x150c   :  { %2108 = vmatpush1.msra.mxu1 %v3893_v32  ;;  %2155 = vmatprep.mubr.f32.mxu1 %v3286_v1 }
0x150d   :  { %2109 = vmatprep.subr.mxu1 %v3898_v35 }
0x150e   :  { %2110 = vmatpush1.msra.mxu1 %v3901_v24 }
0x150f   :  { %2111 = vmatprep.subr.mxu1 %v3905_v7 }
0x1510   :  { %2112 = vmatpush1.msra.mxu1 %v3909_v34 }
0x1511   :  { %2113 = vmatprep.subr.mxu1 %v3913_v18 }
0x1512   :  { %2114 = vmatpush1.msra.mxu1 %v3917_v45 }
0x1513   :  { %2115 = vmatprep.subr.mxu1 %v3921_v31 }
0x1514   :  { %2116 = vmatpush1.msra.mxu1 %v3925_v13 }
0x1515   :  { %2117 = vmatprep.subr.mxu1 %v3929_v48 }
0x1516   :  { %2118 = vmatpush1.msra.mxu1 %v3932_v37 }
0x1517   :  { %2119 = vmatprep.subr.mxu1 %v3936_v2 }
0x1518   :  { %2120 = vmatpush1.msra.mxu1 %v3938_v53 }
0x1519   :  { %2121 = vmatprep.subr.mxu1 %v3942_v30 }
0x151a   :  { %2122 = vmatpush1.msra.mxu1 %v3944_v59 }
0x151b   :  { %2319 = vmatprep.subr.mxu1 %v3890_v58 }
0x15cb   :  { %v1945_v62 = vpop.f32.mrf.mxu1 }
0x15cc   :  { %v1950_v29 = vadd.f32 %v1945_v62, %v1524_v23 }
0x15cd   :  { %v1947_v10 = vpop.f32.mrf.mxu1 }
0x15ce   :  { %v2828_v44 = vmul.f32 -1.442695, %v1950_v29  ;;  %v1951_v11 = vadd.f32 %v1947_v10, %v1525_v51 }
0x15d0   :  { %3081 = vpow2.f32 %v2828_v44  ;;  %v2829_v28 = vmul.f32 -1.442695, %v1951_v11 }
0x15d1   :  { %3083 = vtanh.f32 %v1951_v11 }
0x15dd   :  { %v3082_v52 = vpop.eup %3081 }
0x15de   :  { %v1955_v16 = vadd.f32 1.0, %v3082_v52  ;;  %v3084_v58 = vpop.eup %3083 }
0x15e0   :  { %3085 = vrcp.f32 %v1955_v16 }
0x15e1   :  { %3087 = vpow2.f32 %v2829_v28 }
0x15ed   :  { %v3086_v5 = vpop.eup %3085 }
0x15ee   :  { %v1966_v50 = vmul.f32 %v3086_v5, %v3084_v58  ;;  %v3088_v23 = vpop.eup %3087  ;;  %v1965_v4 = vmul.f32 %v3086_v5, %v1865_v14 }
0x15ef   :  { %v1962_v36 = vadd.f32 1.0, %v3088_v23 }
0x15f0   :  { %1968 = vrot.lane.b32.xlu0 %v1966_v50, %s3287_s27 }
0x15f1   :  { %3089 = vrcp.f32 %v1962_v36 }
0x15fe   :  { %v3090_v49 = vpop.eup %3089 }
0x1662   :  { %v1969_v27 = vpop.permute.xlu0 %1968 }
0x1663   :  { %v1971_v55 = vadd.f32 %v1969_v27, %v1965_v4 }
0x1665   :  { %3091 = vtanh.f32 %v1971_v55 }
0x1672   :  { %v3092_v51 = vpop.eup %3091 }
0x1673   :  { %v4224_v0 = vmul.f32 %v3092_v51, %v3090_v49 }
0x1675   :  { %1975 = vrot.lane.b32.xlu1 %v4224_v0, %s3287_s27 }
0x16e7   :  { %v1976_v3 = vpop.permute.xlu1 %1975 }
0x16e8   :  { %1978 = vst.msk [vmem:[#allocation2 + $0x18] sm:$0xff] %vm436_vm4, %v1976_v3  ;;  %2830 = vmatmul.mubr.msk.f32.vlgmr.msra.gmra.mxu0 %vm329_vm1, %v1976_v3 }
0x16e9   :  { %2214 = vmatpush1.msra.mxu0 %v3893_v32  ;;  %2261 = vmatprep.mubr.f32.mxu0 %v3286_v1 }
0x16ea   :  { %2215 = vmatprep.subr.mxu0 %v3898_v35 }
0x16eb   :  { %2216 = vmatpush1.msra.mxu0 %v3901_v24 }
0x16ec   :  { %2217 = vmatprep.subr.mxu0 %v3905_v7 }
0x16ed   :  { %2218 = vmatpush1.msra.mxu0 %v3909_v34 }
0x16ee   :  { %2219 = vmatprep.subr.mxu0 %v3913_v18 }
0x16ef   :  { %2220 = vmatpush1.msra.mxu0 %v3917_v45 }
0x16f0   :  { %2221 = vmatprep.subr.mxu0 %v3921_v31 }
0x16f1   :  { %2222 = vmatpush1.msra.mxu0 %v3925_v13 }
0x16f2   :  { %2223 = vmatprep.subr.mxu0 %v3929_v48 }
0x16f3   :  { %2224 = vmatpush1.msra.mxu0 %v3932_v37 }
0x16f4   :  { %2225 = vmatprep.subr.mxu0 %v3936_v2 }
0x16f5   :  { %2226 = vmatpush1.msra.mxu0 %v3938_v53 }
0x16f6   :  { %2227 = vmatprep.subr.mxu0 %v3942_v30 }
0x16f7   :  { %2228 = vmatpush1.msra.mxu0 %v3944_v59 }
0x17a8   :  { %v2051_v14 = vpop.f32.mrf.mxu0 }
0x17a9   :  { %v2056_v62 = vadd.f32 %v2051_v14, %v1526_v25 }
0x17aa   :  { %v2053_v44 = vpop.f32.mrf.mxu0 }
0x17ab   :  { %v2831_v29 = vmul.f32 -1.442695, %v2056_v62  ;;  %v2057_v10 = vadd.f32 %v2053_v44, %v1527_v54 }
0x17ad   :  { %3093 = vpow2.f32 %v2831_v29  ;;  %v2832_v56 = vmul.f32 -1.442695, %v2057_v10 }
0x17ae   :  { %3095 = vtanh.f32 %v2057_v10 }
0x17ba   :  { %v3094_v11 = vpop.eup %3093 }
0x17bb   :  { %v2061_v52 = vadd.f32 1.0, %v3094_v11  ;;  %v3096_v16 = vpop.eup %3095 }
0x17bd   :  { %3097 = vrcp.f32 %v2061_v52 }
0x17be   :  { %3099 = vpow2.f32 %v2832_v56  ;;  %v4333_v56 = vld [vmem:[%s4450_s9] sm:$0xff] }
0x17ca   :  { %v3098_v58 = vpop.eup %3097 }
0x17cb   :  { %v2072_v5 = vmul.f32 %v3098_v58, %v3096_v16  ;;  %v3100_v12 = vpop.eup %3099  ;;  %v2071_v50 = vmul.f32 %v3098_v58, %v1971_v55  ;;  %v4317_v16 = vld [vmem:[%s4450_s9 + $0x10] sm:$0xff] }
0x17cc   :  { %v2068_v25 = vadd.f32 1.0, %v3100_v12  ;;  %v2409_v58 = vld [vmem:[#allocation2 + $0x10] sm:$0xff]  ;;  %v2410_v12 = vld [vmem:[#allocation2 + $0x18] sm:$0xff] }
0x17cd   :  { %2074 = vrot.lane.b32.xlu0 %v2072_v5, %s3287_s27  ;;  %v4326_v5 = vld [vmem:[%s4450_s9 + $0x8] sm:$0xff] }
0x17ce   :  { %3101 = vrcp.f32 %v2068_v25 }
0x17db   :  { %v3102_v9 = vpop.eup %3101 }
0x183f   :  { %v2075_v28 = vpop.permute.xlu0 %2074 }
0x1840   :  { %v2077_v23 = vadd.f32 %v2075_v28, %v2071_v50 }
0x1842   :  { %3103 = vtanh.f32 %v2077_v23 }
0x184f   :  { %v3104_v17 = vpop.eup %3103 }
0x1850   :  { %v4257_v54 = vmul.f32 %v3104_v17, %v3102_v9  ;;  %v4462_v9 = vsel %vm3568_vm2, %v4092_v8, %v4094_v21 }
0x1852   :  { %2081 = vrot.lane.b32.xlu1 %v4257_v54, %s3287_s27 }
0x18c4   :  { %v2082_v36 = vpop.permute.xlu1 %2081 }
0x18c5   :  { %2084 = vst.msk [vmem:[#allocation2 + $0x20] sm:$0xff] %vm436_vm4, %v2082_v36  ;;  %2833 = vmatmul.mubr.msk.f32.vlgmr.msra.gmra.mxu1 %vm329_vm1, %v2082_v36 }
0x18c6   :  { %2320 = vmatpush1.msra.mxu1 %v3893_v32  ;;  %2367 = vmatprep.mubr.f32.mxu1 %v3286_v1 }
0x18c7   :  { %2321 = vmatprep.subr.mxu1 %v3898_v35 }
0x18c8   :  { %2322 = vmatpush1.msra.mxu1 %v3901_v24 }
0x18c9   :  { %2323 = vmatprep.subr.mxu1 %v3905_v7 }
0x18ca   :  { %2324 = vmatpush1.msra.mxu1 %v3909_v34 }
0x18cb   :  { %2325 = vmatprep.subr.mxu1 %v3913_v18 }
0x18cc   :  { %2326 = vmatpush1.msra.mxu1 %v3917_v45  ;;  %v2411_v25 = vld [vmem:[#allocation2 + $0x20] sm:$0xff] }
0x18cd   :  { %2327 = vmatprep.subr.mxu1 %v3921_v31 }
0x18ce   :  { %2328 = vmatpush1.msra.mxu1 %v3925_v13 }
0x18cf   :  { %2329 = vmatprep.subr.mxu1 %v3929_v48 }
0x18d0   :  { %2330 = vmatpush1.msra.mxu1 %v3932_v37 }
0x18d1   :  { %2331 = vmatprep.subr.mxu1 %v3936_v2 }
0x18d2   :  { %2332 = vmatpush1.msra.mxu1 %v3938_v53 }
0x18d3   :  { %2333 = vmatprep.subr.mxu1 %v3942_v30 }
0x18d4   :  { %2334 = vmatpush1.msra.mxu1 %v3944_v59 }
0x18d5   :  { %2931 = vmatprep.subr.mxu1 %v4310_v6 }
0x1985   :  { %v2157_v1 = vpop.f32.mrf.mxu1 }
0x1986   :  { %v2162_v32 = vadd.f32 %v2157_v1, %v1528_v39 }
0x1987   :  { %v2159_v24 = vpop.f32.mrf.mxu1 }
0x1988   :  { %v2834_v35 = vmul.f32 -1.442695, %v2162_v32  ;;  %v2163_v7 = vadd.f32 %v2159_v24, %v1529_v63  ;;  %v4463_v32 = vsel %vm3574_vm3, %v4105_v22, %v4108_v26 }
0x198a   :  { %3105 = vpow2.f32 %v2834_v35  ;;  %v2835_v48 = vmul.f32 -1.442695, %v2163_v7 }
0x198b   :  { %3107 = vtanh.f32 %v2163_v7 }
0x1997   :  { %v3106_v34 = vpop.eup %3105 }
0x1998   :  { %v2167_v18 = vadd.f32 1.0, %v3106_v34  ;;  %v3108_v45 = vpop.eup %3107 }
0x199a   :  { %3109 = vrcp.f32 %v2167_v18 }
0x199b   :  { %3111 = vpow2.f32 %v2835_v48  ;;  %v2427_v48 = vld [vmem:[%s4450_s9 + $0x20] sm:$0xff] }
0x19a7   :  { %v3110_v31 = vpop.eup %3109 }
0x19a8   :  { %v2178_v13 = vmul.f32 %v3110_v31, %v3108_v45  ;;  %v3112_v37 = vpop.eup %3111  ;;  %v2177_v53 = vmul.f32 %v3110_v31, %v2077_v23 }
0x19a9   :  { %v2174_v2 = vadd.f32 1.0, %v3112_v37 }
0x19aa   :  { %2180 = vrot.lane.b32.xlu0 %v2178_v13, %s3287_s27  ;;  %v2428_v13 = vld [vmem:[%s4450_s9 + $0x28] sm:$0xff] }
0x19ab   :  { %3113 = vrcp.f32 %v2174_v2 }
0x19b8   :  { %v3114_v42 = vpop.eup %3113 }
0x1a1c   :  { %v2181_v30 = vpop.permute.xlu0 %2180 }
0x1a1d   :  { %v2183_v59 = vadd.f32 %v2181_v30, %v2177_v53 }
0x1a1f   :  { %3115 = vtanh.f32 %v2183_v59 }
0x1a2c   :  { %v3116_v46 = vpop.eup %3115 }
0x1a2d   :  { %v4290_v47 = vmul.f32 %v3116_v46, %v3114_v42 }
0x1a2f   :  { %2187 = vrot.lane.b32.xlu1 %v4290_v47, %s3287_s27 }
0x1aa1   :  { %v2188_v19 = vpop.permute.xlu1 %2187 }
0x1aa2   :  { %2190 = vst.msk [vmem:[#allocation2 + $0x28] sm:$0xff] %vm436_vm4, %v2188_v19  ;;  %2836 = vmatmul.mubr.msk.f32.vlgmr.msra.gmra.mxu0 %vm329_vm1, %v2188_v19 }
0x1aa9   :  { %v2412_v50 = vld [vmem:[#allocation2 + $0x28] sm:$0xff] }
0x1b62   :  { %v2263_v39 = vpop.f32.mrf.mxu0 }
0x1b63   :  { %v2268_v63 = vadd.f32 %v2263_v39, %v1530_v40 }
0x1b64   :  { %v2265_v27 = vpop.f32.mrf.mxu0 }
0x1b65   :  { %v2837_v4 = vmul.f32 -1.442695, %v2268_v63  ;;  %v2269_v55 = vadd.f32 %v2265_v27, %v1531_v15 }
0x1b67   :  { %3117 = vpow2.f32 %v2837_v4  ;;  %v2838_v41 = vmul.f32 -1.442695, %v2269_v55 }
0x1b68   :  { %3119 = vtanh.f32 %v2269_v55 }
0x1b74   :  { %v3118_v49 = vpop.eup %3117 }
0x1b75   :  { %v2273_v51 = vadd.f32 1.0, %v3118_v49  ;;  %v3120_v3 = vpop.eup %3119 }
0x1b77   :  { %3121 = vrcp.f32 %v2273_v51 }
0x1b78   :  { %3123 = vpow2.f32 %v2838_v41 }
0x1b84   :  { %v3122_v14 = vpop.eup %3121 }
0x1b85   :  { %v2284_v62 = vmul.f32 %v3122_v14, %v3120_v3  ;;  %v3124_v38 = vpop.eup %3123  ;;  %v2283_v40 = vmul.f32 %v3122_v14, %v2183_v59  ;;  %v2407_v3 = vld [vmem:[#allocation2] sm:$0xff] }
0x1b86   :  { %v2280_v20 = vadd.f32 1.0, %v3124_v38 }
0x1b87   :  { %2286 = vrot.lane.b32.xlu0 %v2284_v62, %s3287_s27  ;;  %v2408_v62 = vld [vmem:[#allocation2 + $0x8] sm:$0xff] }
0x1b88   :  { %3125 = vrcp.f32 %v2280_v20 }
0x1b95   :  { %v3126_v44 = vpop.eup %3125 }
0x1bf9   :  { %v2287_v15 = vpop.permute.xlu0 %2286 }
0x1bfa   :  { %v2289_v29 = vadd.f32 %v2287_v15, %v2283_v40  ;;  %v2858_v15 = vld [vmem:[#allocation4] ss:$0 sm:$0xff] }
0x1bfc   :  { %3127 = vtanh.f32 %v2289_v29 }
0x1c09   :  { %v3128_v10 = vpop.eup %3127 }
0x1c0a   :  { %v2291_v11 = vmul.f32 %v3128_v10, %v3126_v44 }
0x1c0c   :  { %2293 = vrot.lane.b32.xlu1 %v2291_v11, %s3287_s27 }
0x1c7e   :  { %v2294_v52 = vpop.permute.xlu1 %2293 }
0x1c7f   :  { %2296 = vst.msk [vmem:[#allocation2 + $0x30] sm:$0xff] %vm436_vm4, %v2294_v52  ;;  %2839 = vmatmul.mubr.msk.f32.vlgmr.msra.gmra.mxu1 %vm329_vm1, %v2294_v52 }
0x1c80   :  { %2935 = vmatpush3.msra.mxu1 %v4310_v6  ;;  %2922 = vmatprep.mubr.msk.f32.mxu1 %vm436_vm4, %v2409_v58 }
0x1c81   :  { %2932 = vmatprep.subr.mxu1 %v4317_v16 }
0x1c82   :  { %2936 = vmatpush3.msra.mxu1 %v4317_v16 }
0x1c83   :  { %2933 = vmatprep.subr.mxu1 %v4326_v5 }
0x1c84   :  { %2937 = vmatpush3.msra.mxu1 %v4326_v5 }
0x1c85   :  { %2934 = vmatprep.subr.mxu1 %v4333_v56 }
0x1c86   :  { %2938 = vmatpush3.msra.mxu1 %v4333_v56  ;;  %v2413_v28 = vld [vmem:[#allocation2 + $0x30] sm:$0xff] }
0x1c87   :  { %2923 = vmatmul.mubr.msk.f32.vlgmr.msra.gmra.mxu1 %vm436_vm4, %v2410_v12 }
0x1c88   :  { %2925 = vmatprep.mubr.msk.f32.mxu1 %vm436_vm4, %v2411_v25 }
0x1c8b   :  { %2926 = vmatmul.mubr.msk.f32.gmra.mxu1 %vm436_vm4, %v2412_v50 }
0x1c8c   :  { %2928 = vmatprep.mubr.msk.f32.mxu1 %vm436_vm4, %v2413_v28 }
0x1d3f   :  { %v2369_v23 = vpop.f32.mrf.mxu1 }
0x1d40   :  { %v2374_v17 = vadd.f32 %v2369_v23, %v4462_v9 }
0x1d41   :  { %v2371_v1 = vpop.f32.mrf.mxu1 }
0x1d42   :  { %v2840_v36 = vmul.f32 -1.442695, %v2374_v17  ;;  %v2375_v35 = vadd.f32 %v2371_v1, %v4463_v32 }
0x1d44   :  { %3129 = vpow2.f32 %v2840_v36  ;;  %v2841_v60 = vmul.f32 -1.442695, %v2375_v35 }
0x1d45   :  { %3131 = vtanh.f32 %v2375_v35 }
0x1d51   :  { %v3130_v24 = vpop.eup %3129 }
0x1d52   :  { %v2379_v7 = vadd.f32 1.0, %v3130_v24  ;;  %v3132_v34 = vpop.eup %3131 }
0x1d54   :  { %3133 = vrcp.f32 %v2379_v7 }
0x1d55   :  { %3135 = vpow2.f32 %v2841_v60 }
0x1d61   :  { %v3134_v18 = vpop.eup %3133 }
0x1d62   :  { %v2390_v57 = vmul.f32 %v3134_v18, %v3132_v34  ;;  %v3136_v8 = vpop.eup %3135  ;;  %v2389_v22 = vmul.f32 %v3134_v18, %v2289_v29 }
0x1d63   :  { %v2386_v21 = vadd.f32 1.0, %v3136_v8 }
0x1d64   :  { %2392 = vrot.lane.b32.xlu0 %v2390_v57, %s3287_s27 }
0x1d65   :  { %3137 = vrcp.f32 %v2386_v21 }
0x1d68   :  { %2297 = vrot.lane.b32.xlu0 %v2291_v11, %s3288_s0 }
0x1d6c   :  { %2085 = vrot.lane.b32.xlu0 %v4257_v54, %s3288_s0  ;;  %v2430_v54 = vld [vmem:[%s4450_s9 + $0x38] sm:$0xff] }
0x1d6d   :  { %2891 = vmatprep.subr.mxu0 %v2430_v54 }
0x1d6e   :  { %2892 = vmatpush3.msra.mxu0 %v2430_v54 }
0x1d70   :  { %1873 = vrot.lane.b32.xlu0 %v4190_v43, %s3288_s0 }
0x1d72   :  { %v3138_v2 = vpop.eup %3137 }
0x1d74   :  { %1661 = vrot.lane.b32.xlu0 %v4127_v61, %s3288_s0  ;;  %v2429_v61 = vld [vmem:[%s4450_s9 + $0x30] sm:$0xff] }
0x1d75   :  { %2893 = vmatprep.subr.mxu0 %v2429_v61 }
0x1d76   :  { %2894 = vmatpush3.msra.mxu0 %v2429_v61 }
0x1d77   :  { %2895 = vmatprep.subr.mxu0 %v2428_v13 }
0x1d78   :  { %2896 = vmatpush3.msra.mxu0 %v2428_v13 }
0x1d79   :  { %2897 = vmatprep.subr.mxu0 %v2427_v48 }
0x1d7a   :  { %2898 = vmatpush3.msra.mxu0 %v2427_v48 }
0x1d7b   :  { %2911 = vmatprep.subr.mxu0 %v4310_v6 }
0x1dd6   :  { %v2393_v26 = vpop.permute.xlu0 %2392 }
0x1dd7   :  { %v2395_v45 = vadd.f32 %v2393_v26, %v2389_v22 }
0x1dd9   :  { %3139 = vtanh.f32 %v2395_v45 }
0x1dda   :  { %v2298_v31 = vpop.permute.xlu0 %2297 }
0x1ddb   :  { %2300 = vst.msk [vmem:[#allocation3 + $0x8] sm:$0xff] %vm436_vm4, %v2298_v31 }
0x1dde   :  { %v2086_v43 = vpop.permute.xlu0 %2085 }
0x1ddf   :  { %2088 = vst.msk [vmem:[#allocation3 + $0x18] sm:$0xff] %vm436_vm4, %v2086_v43 }
0x1de2   :  { %v1874_v37 = vpop.permute.xlu0 %1873 }
0x1de3   :  { %1876 = vst.msk [vmem:[#allocation3 + $0x28] sm:$0xff] %vm436_vm4, %v1874_v37 }
0x1de6   :  { %v3140_v53 = vpop.eup %3139  ;;  %v1662_v30 = vpop.permute.xlu0 %1661  ;;  %v2422_v63 = vld [vmem:[#allocation3 + $0x18] sm:$0xff] }
0x1de7   :  { %1664 = vst.msk [vmem:[#allocation3 + $0x38] sm:$0xff] %vm436_vm4, %v1662_v30  ;;  %v2397_v59 = vmul.f32 %v3140_v53, %v3138_v2 }
0x1de9   :  { %2403 = vrot.lane.b32.xlu1 %v2397_v59, %s3288_s0 }
0x1dea   :  { %v2424_v55 = vld [vmem:[#allocation3 + $0x28] sm:$0xff] }
0x1ded   :  { %2191 = vrot.lane.b32.xlu1 %v4290_v47, %s3288_s0  ;;  %v2420_v47 = vld [vmem:[#allocation3 + $0x8] sm:$0xff] }
0x1dee   :  { %v2426_v51 = vld [vmem:[#allocation3 + $0x38] sm:$0xff] }
0x1df1   :  { %1979 = vrot.lane.b32.xlu1 %v4224_v0, %s3288_s0 }
0x1df5   :  { %1767 = vrot.lane.b32.xlu1 %v4156_v33, %s3288_s0 }
0x1df9   :  { %2399 = vrot.lane.b32.xlu1 %v2397_v59, %s3287_s27 }
0x1e5b   :  { %v2404_v42 = vpop.permute.xlu1 %2403 }
0x1e5c   :  { %2406 = vst.msk [vmem:[#allocation3] sm:$0xff] %vm436_vm4, %v2404_v42 }
0x1e5f   :  { %v2192_v46 = vpop.permute.xlu1 %2191 }
0x1e60   :  { %2194 = vst.msk [vmem:[#allocation3 + $0x10] sm:$0xff] %vm436_vm4, %v2192_v46 }
0x1e63   :  { %v1980_v19 = vpop.permute.xlu1 %1979  ;;  %v2419_v39 = vld [vmem:[#allocation3] sm:$0xff] }
0x1e64   :  { %1982 = vst.msk [vmem:[#allocation3 + $0x20] sm:$0xff] %vm436_vm4, %v1980_v19  ;;  %2899 = vmatprep.mubr.msk.f32.mxu0 %vm436_vm4, %v2419_v39 }
0x1e65   :  { %2900 = vmatmul.mubr.msk.f32.vlgmr.msra.gmra.mxu0 %vm436_vm4, %v2420_v47 }
0x1e66   :  { %2912 = vmatpush3.msra.mxu0 %v4310_v6  ;;  %v2924_v6 = vpop.f32.mrf.mxu1 }
0x1e67   :  { %v1768_v33 = vpop.permute.xlu1 %1767  ;;  %v2421_v0 = vld [vmem:[#allocation3 + $0x10] sm:$0xff]  ;;  %2913 = vmatprep.subr.mxu0 %v4317_v16 }
0x1e68   :  { %1770 = vst.msk [vmem:[#allocation3 + $0x30] sm:$0xff] %vm436_vm4, %v1768_v33  ;;  %2902 = vmatprep.mubr.msk.f32.mxu0 %vm436_vm4, %v2421_v0  ;;  %2914 = vmatpush3.msra.mxu0 %v4317_v16  ;;  %v2660_v38 = vpop.f32.mrf.mxu1 }
0x1e69   :  { %2903 = vmatmul.mubr.msk.f32.gmra.mxu0 %vm436_vm4, %v2422_v63  ;;  %2915 = vmatprep.subr.mxu0 %v4326_v5 }
0x1e6a   :  { %2916 = vmatpush3.msra.mxu0 %v4326_v5  ;;  %v2927_v44 = vpop.f32.mrf.mxu1 }
0x1e6b   :  { %v2400_v4 = vpop.permute.xlu1 %2399  ;;  %v2423_v27 = vld [vmem:[#allocation3 + $0x20] sm:$0xff]  ;;  %2917 = vmatprep.subr.mxu0 %v4333_v56 }
0x1e6c   :  { %2402 = vst.msk [vmem:[#allocation2 + $0x38] sm:$0xff] %vm436_vm4, %v2400_v4  ;;  %2905 = vmatprep.mubr.msk.f32.mxu0 %vm436_vm4, %v2423_v27  ;;  %2918 = vmatpush3.msra.mxu0 %v4333_v56  ;;  %v2670_v12 = vpop.f32.mrf.mxu1 }
0x1e6d   :  { %2906 = vmatmul.mubr.msk.f32.gmra.mxu0 %vm436_vm4, %v2424_v55 }
0x1e6f   :  { %v2425_v49 = vld [vmem:[#allocation3 + $0x30] sm:$0xff] }
0x1e70   :  { %2908 = vmatprep.mubr.msk.f32.mxu0 %vm436_vm4, %v2425_v49 }
0x1e71   :  { %2909 = vmatmul.mubr.msk.f32.gmra.mxu0 %vm436_vm4, %v2426_v51 }
0x1e72   :  { %2919 = vmatprep.mubr.msk.f32.mxu0 %vm436_vm4, %v2407_v3 }
0x1e73   :  { %v2414_v14 = vld [vmem:[#allocation2 + $0x38] sm:$0xff] }
0x1e74   :  { %2929 = vmatmul.mubr.msk.f32.gmra.mxu1 %vm436_vm4, %v2414_v14 }
0x1e75   :  { %2920 = vmatmul.mubr.msk.f32.vlgmr.msra.gmra.mxu0 %vm436_vm4, %v2408_v62 }
0x1f25   :  { %v2901_v41 = vpop.f32.mrf.mxu0 }
0x1f27   :  { %v2521_v20 = vpop.f32.mrf.mxu0 }
0x1f29   :  { %v2904_v40 = vpop.f32.mrf.mxu0 }
0x1f2a   :  { %v2666_v29 = vadd.f32 %v2924_v6, %v2904_v40 }
0x1f2b   :  { %v2531_v10 = vpop.f32.mrf.mxu0 }
0x1f2c   :  { %v2699_v11 = vadd.f32 %v2858_v15, %v2666_v29  ;;  %v2661_v52 = vadd.f32 %v2660_v38, %v2531_v10 }
0x1f2d   :  { %v2907_v16 = vpop.f32.mrf.mxu0 }
0x1f2e   :  { %v2862_v58 = vmul.f32 -1.442695, %v2699_v11  ;;  %v2698_v5 = vadd.f32 %v2858_v15, %v2661_v52  ;;  %v2676_v56 = vadd.f32 %v2927_v44, %v2907_v16 }
0x1f2f   :  { %v2541_v25 = vpop.f32.mrf.mxu0 }
0x1f30   :  { %3141 = vpow2.f32 %v2862_v58  ;;  %v2861_v50 = vmul.f32 -1.442695, %v2698_v5  ;;  %v2701_v28 = vadd.f32 %v2858_v15, %v2676_v56  ;;  %v2671_v23 = vadd.f32 %v2670_v12, %v2541_v25 }
0x1f31   :  { %v2910_v9 = vpop.f32.mrf.mxu0 }
0x1f32   :  { %3143 = vpow2.f32 %v2861_v50  ;;  %v2864_v17 = vmul.f32 -1.442695, %v2701_v28  ;;  %v2700_v36 = vadd.f32 %v2858_v15, %v2671_v23 }
0x1f33   :  { %v2551_v1 = vpop.f32.mrf.mxu0 }
0x1f34   :  { %3145 = vpow2.f32 %v2864_v17  ;;  %v2863_v32 = vmul.f32 -1.442695, %v2700_v36  ;;  %v2930_v35 = vpop.f32.mrf.mxu1 }
0x1f35   :  { %v2686_v24 = vadd.f32 %v2930_v35, %v2910_v9  ;;  %v2921_v7 = vpop.f32.mrf.mxu0 }
0x1f36   :  { %3147 = vpow2.f32 %v2863_v32  ;;  %v2656_v34 = vadd.f32 %v2921_v7, %v2901_v41  ;;  %v2680_v18 = vpop.f32.mrf.mxu1 }
0x1f37   :  { %v2703_v57 = vadd.f32 %v2858_v15, %v2686_v24  ;;  %v2681_v60 = vadd.f32 %v2680_v18, %v2551_v1  ;;  %v2650_v8 = vpop.f32.mrf.mxu0 }
0x1f38   :  { %v2697_v21 = vadd.f32 %v2858_v15, %v2656_v34  ;;  %v2651_v22 = vadd.f32 %v2650_v8, %v2521_v20 }
0x1f39   :  { %v2866_v26 = vmul.f32 -1.442695, %v2703_v57  ;;  %v2702_v45 = vadd.f32 %v2858_v15, %v2681_v60 }
0x1f3a   :  { %v2860_v31 = vmul.f32 -1.442695, %v2697_v21  ;;  %v2696_v54 = vadd.f32 %v2858_v15, %v2651_v22 }
0x1f3b   :  { %3149 = vpow2.f32 %v2866_v26  ;;  %v2865_v61 = vmul.f32 -1.442695, %v2702_v45 }
0x1f3c   :  { %3151 = vpow2.f32 %v2860_v31  ;;  %v2859_v43 = vmul.f32 -1.442695, %v2696_v54 }
0x1f3d   :  { %v3142_v13 = vpop.eup %3141  ;;  %3153 = vpow2.f32 %v2865_v61 }
0x1f3e   :  { %v2731_v48 = vadd.f32 1.0, %v3142_v13  ;;  %3155 = vpow2.f32 %v2859_v43 }
0x1f3f   :  { %v3144_v37 = vpop.eup %3143 }
0x1f40   :  { %3157 = vrcp.f32 %v2731_v48  ;;  %v2730_v2 = vadd.f32 1.0, %v3144_v37 }
0x1f41   :  { %v3146_v53 = vpop.eup %3145 }
0x1f42   :  { %3159 = vrcp.f32 %v2730_v2  ;;  %v2733_v30 = vadd.f32 1.0, %v3146_v53 }
0x1f43   :  { %v3148_v59 = vpop.eup %3147 }
0x1f44   :  { %3161 = vrcp.f32 %v2733_v30  ;;  %v2732_v42 = vadd.f32 1.0, %v3148_v59 }
0x1f46   :  { %3163 = vrcp.f32 %v2732_v42 }
0x1f48   :  { %v3150_v46 = vpop.eup %3149 }
0x1f49   :  { %v3152_v19 = vpop.eup %3151  ;;  %v2735_v39 = vadd.f32 1.0, %v3150_v46 }
0x1f4a   :  { %v3154_v47 = vpop.eup %3153  ;;  %v2729_v33 = vadd.f32 1.0, %v3152_v19 }
0x1f4b   :  { %v3156_v0 = vpop.eup %3155  ;;  %3165 = vrcp.f32 %v2735_v39  ;;  %v2734_v63 = vadd.f32 1.0, %v3154_v47 }
0x1f4c   :  { %3167 = vrcp.f32 %v2729_v33  ;;  %v2728_v4 = vadd.f32 1.0, %v3156_v0 }
0x1f4d   :  { %v3158_v27 = vpop.eup %3157  ;;  %3169 = vrcp.f32 %v2734_v63 }
0x1f4e   :  { %2756 = vst.msk [vmem:[%s4452_s11 + $0x18] sm:$0xff] %vm2752_vm5, %v3158_v27  ;;  %3171 = vrcp.f32 %v2728_v4 }
0x1f4f   :  { %v3160_v55 = vpop.eup %3159 }
0x1f50   :  { %2755 = vst.msk [vmem:[%s4452_s11 + $0x10] sm:$0xff] %vm2752_vm5, %v3160_v55 }
0x1f51   :  { %v3162_v49 = vpop.eup %3161 }
0x1f52   :  { %2758 = vst.msk [vmem:[%s4452_s11 + $0x28] sm:$0xff] %vm2752_vm5, %v3162_v49 }
0x1f53   :  { %v3164_v51 = vpop.eup %3163 }
0x1f54   :  { %2757 = vst.msk [vmem:[%s4452_s11 + $0x20] sm:$0xff] %vm2752_vm5, %v3164_v51 }
0x1f58   :  { %v3166_v3 = vpop.eup %3165 }
0x1f59   :  { %v3168_v14 = vpop.eup %3167  ;;  %2760 = vst.msk [vmem:[%s4452_s11 + $0x38] sm:$0xff] %vm2752_vm5, %v3166_v3 }
0x1f5a   :  { %v3170_v62 = vpop.eup %3169  ;;  %2754 = vst.msk [vmem:[%s4452_s11 + $0x8] sm:$0xff] %vm2752_vm5, %v3168_v14 }
0x1f5b   :  { %v3172_v6 = vpop.eup %3171  ;;  %2759 = vst.msk [vmem:[%s4452_s11 + $0x30] sm:$0xff] %vm2752_vm5, %v3170_v62 }
0x1f5c   :  { %2753 = vst.msk [vmem:[%s4452_s11] sm:$0xff] %vm2752_vm5, %v3172_v6 }
0x1f5d   :  { %2765 = vsyncpa [#allocation6], 1 }
0x1f5e   :  { %2766 = vsyncpa [#allocation8], 1 }
0x1f5f   :  { %2767 = vsyncpa [#allocation11], 1 }

</bundles_post_ra>
